<compile_context>
chip_gen: v5e
topology: v5e:2x2
jax: 0.10.0
libtpu: 0.0.40
codegen_flags: <defaults>
</compile_context>

<pallas_src>
import math
import jax
import jax.numpy as jnp
from jax.experimental import pallas as pl
from jax.experimental.pallas import tpu as pltpu


def lstm_bi_fc_kernel(x_ref, wih_f_ref, whh_f_ref, b_f_ref,
                      wih_b_ref, b_b_ref,
                      fcw_f_ref, fcw_b_ref, fcb_ref, out_ref):
    Bp, T, D = x_ref.shape
    H = whh_f_ref.shape[0]

    x_all = x_ref[...]                               # (Bp, T, D), loaded once
    x_flat = x_all.reshape(Bp * T, D)                # tile-aligned merge (Bp=8)

    # Hoisted, bias-folded input projection for the forward direction:
    # one MXU call for all T steps instead of one per step.
    xproj = (jnp.dot(x_flat, wih_f_ref[...], preferred_element_type=jnp.float32)
             + b_f_ref[...])                         # (Bp*T, 4H)
    xproj = xproj.reshape(Bp, T, 4 * H)

    whh_f = whh_f_ref[...]                           # (H, 4H), loaded once

    # Forward recurrence (static unroll, T small). Only the h @ W_hh matmul is
    # on the serial critical path now.
    h = jnp.zeros((Bp, H), jnp.float32)
    c = jnp.zeros((Bp, H), jnp.float32)
    for t in range(T):
        gates = xproj[:, t, :] + jnp.dot(h, whh_f,
                                         preferred_element_type=jnp.float32)
        i = jax.nn.sigmoid(gates[:, 0:H])
        f = jax.nn.sigmoid(gates[:, H:2 * H])
        g = jnp.tanh(gates[:, 2 * H:3 * H])
        o = jax.nn.sigmoid(gates[:, 3 * H:4 * H])
        c = f * c + i * g
        h = o * jnp.tanh(c)
    h_fwd = h

    # Backward direction at output position T-1: zero initial state, so the
    # recurrent term h @ W_hh_b is identically zero and the f-gate is unused
    # (it multiplies c == 0).  Only the input projection of x[T-1] remains.
    gates_b = (jnp.dot(x_all[:, T - 1, :], wih_b_ref[...],
                       preferred_element_type=jnp.float32)
               + b_b_ref[...])                       # (Bp, 4H)
    i_b = jax.nn.sigmoid(gates_b[:, 0:H])
    g_b = jnp.tanh(gates_b[:, 2 * H:3 * H])
    o_b = jax.nn.sigmoid(gates_b[:, 3 * H:4 * H])
    h_bwd = o_b * jnp.tanh(i_b * g_b)                # c_b = i_b * g_b

    # Final Linear: split weight avoids a lane-axis concat of [h_fwd, h_bwd].
    out_ref[...] = (jnp.dot(h_fwd, fcw_f_ref[...],
                            preferred_element_type=jnp.float32)
                    + jnp.dot(h_bwd, fcw_b_ref[...],
                              preferred_element_type=jnp.float32)
                    + fcb_ref[...])                  # (Bp, Opad)


def lstm_forward(x, p):
    """x: (B, T, D) float32, PyTorch batch_first layout."""
    B, T, D = x.shape
    H = p["w_hh_f"].shape[1]
    O = p["fc_w"].shape[0]

    Bp = ((B + 7) // 8) * 8      # pad batch to a sublane multiple
    Op = 128                     # pad fc output to a full lane width

    x_pad = jnp.zeros((Bp, T, D), jnp.float32).at[:B].set(x.astype(jnp.float32))

    # Pre-transpose weights to (in_features, out_features); fold the two LSTM
    # biases together (added once into the hoisted projection).
    wih_f = p["w_ih_f"].T                                    # (D, 4H)
    whh_f = p["w_hh_f"].T                                    # (H, 4H)
    b_f = (p["b_ih_f"] + p["b_hh_f"])[None, :]               # (1, 4H)
    wih_b = p["w_ih_b"].T                                    # (D, 4H)
    b_b = (p["b_ih_b"] + p["b_hh_b"])[None, :]               # (1, 4H)

    fcw_t = p["fc_w"].T.astype(jnp.float32)                  # (2H, O)
    fcw_f = jnp.zeros((H, Op), jnp.float32).at[:, :O].set(fcw_t[:H])
    fcw_b = jnp.zeros((H, Op), jnp.float32).at[:, :O].set(fcw_t[H:])
    fcb = jnp.zeros((1, Op), jnp.float32).at[:, :O].set(p["fc_b"][None, :])

    vmem = pl.BlockSpec(memory_space=pltpu.MemorySpace.VMEM)
    out_pad = pl.pallas_call(
        lstm_bi_fc_kernel,
        out_shape=jax.ShapeDtypeStruct((Bp, Op), jnp.float32),
        in_specs=[vmem] * 9,
        out_specs=vmem,
    )(x_pad, wih_f, whh_f, b_f, wih_b, b_b, fcw_f, fcw_b, fcb)

    return out_pad[:B, :O]


def lstm_ref(x, p):
    """Pure-JAX reference with identical semantics (for validation)."""
    B, T, D = x.shape
    H = p["w_hh_f"].shape[1]

    def cell(x_t, h, c, wih, whh, bih, bhh):
        gates = x_t @ wih.T + h @ whh.T + bih + bhh
        i, f, g, o = jnp.split(gates, 4, axis=1)
        c = jax.nn.sigmoid(f) * c + jax.nn.sigmoid(i) * jnp.tanh(g)
        h = jax.nn.sigmoid(o) * jnp.tanh(c)
        return h, c

    h = jnp.zeros((B, H), jnp.float32)
    c = jnp.zeros((B, H), jnp.float32)
    for t in range(T):
        h, c = cell(x[:, t], h, c, p["w_ih_f"], p["w_hh_f"],
                    p["b_ih_f"], p["b_hh_f"])
    hb, _ = cell(x[:, T - 1], jnp.zeros((B, H), jnp.float32),
                 jnp.zeros((B, H), jnp.float32),
                 p["w_ih_b"], p["w_hh_b"], p["b_ih_b"], p["b_hh_b"])
    cat = jnp.concatenate([h, hb], axis=1)
    return cat @ p["fc_w"].T + p["fc_b"]


def init_params(key, input_dim, hidden_dim, output_dim):
    k_lstm = 1.0 / math.sqrt(hidden_dim)
    k_fc = 1.0 / math.sqrt(2 * hidden_dim)
    keys = jax.random.split(key, 10)
    u = lambda kk, shape, bound: jax.random.uniform(
        kk, shape, jnp.float32, -bound, bound)
    H4 = 4 * hidden_dim
    return {
        "w_ih_f": u(keys[0], (H4, input_dim), k_lstm),
        "w_hh_f": u(keys[1], (H4, hidden_dim), k_lstm),
        "b_ih_f": u(keys[2], (H4,), k_lstm),
        "b_hh_f": u(keys[3], (H4,), k_lstm),
        "w_ih_b": u(keys[4], (H4, input_dim), k_lstm),
        "w_hh_b": u(keys[5], (H4, hidden_dim), k_lstm),
        "b_ih_b": u(keys[6], (H4,), k_lstm),
        "b_hh_b": u(keys[7], (H4,), k_lstm),
        "fc_w": u(keys[8], (output_dim, 2 * hidden_dim), k_fc),
        "fc_b": u(keys[9], (output_dim,), k_fc),
    }


if __name__ == "__main__":
    B, T = 2, 8
    input_dim = 12        # len(columns) - 1 from the reference module
    hidden_dim = 32       # small hidden size for the synthetic test
    output_dim = 1

    key = jax.random.PRNGKey(0)
    kx, kp = jax.random.split(key)
    x = jax.random.normal(kx, (B, T, input_dim), jnp.float32)
    params = init_params(kp, input_dim, hidden_dim, output_dim)

    out = lstm_forward(x, params)
    out = jax.block_until_ready(out)

    ref = lstm_ref(x, params)
    assert out.shape == (B, output_dim)
    assert jnp.allclose(out, ref, rtol=1e-2, atol=1e-2), (out, ref)
    print("KERNEL_OK")
</pallas_src>

<mosaic_0001>
module attributes {stable_mosaic.version = 11 : i64} {
  func.func @lstm_bi_fc_kernel(%arg0: memref<8x8x12xf32, #tpu.memory_space<vmem>>, %arg1: memref<12x128xf32, #tpu.memory_space<vmem>>, %arg2: memref<32x128xf32, #tpu.memory_space<vmem>>, %arg3: memref<1x128xf32, #tpu.memory_space<vmem>>, %arg4: memref<12x128xf32, #tpu.memory_space<vmem>>, %arg5: memref<1x128xf32, #tpu.memory_space<vmem>>, %arg6: memref<32x128xf32, #tpu.memory_space<vmem>>, %arg7: memref<32x128xf32, #tpu.memory_space<vmem>>, %arg8: memref<1x128xf32, #tpu.memory_space<vmem>>, %arg9: memref<8x128xf32, #tpu.memory_space<vmem>>) attributes {dimension_semantics = [], scalar_prefetch = 0 : i64, scratch_operands = 0 : i64, tpu.core_type = #tpu.core_type<tc>} {
    %c0 = arith.constant 0 : index
    %c0_0 = arith.constant 0 : index
    %c0_1 = arith.constant 0 : index
    %0 = vector.load %arg0[%c0, %c0_0, %c0_1] : memref<8x8x12xf32, #tpu.memory_space<vmem>>, vector<8x8x12xf32>
    %1 = vector.shape_cast %0 : vector<8x8x12xf32> to vector<64x12xf32>
    %c0_2 = arith.constant 0 : index
    %c0_3 = arith.constant 0 : index
    %2 = vector.load %arg1[%c0_2, %c0_3] : memref<12x128xf32, #tpu.memory_space<vmem>>, vector<12x128xf32>
    %cst = arith.constant dense<0.000000e+00> : vector<64x128xf32>
    %3 = tpu.matmul %1, %2, %cst {dimension_numbers = #tpu.dot_dimension_numbers<[1], [0], [0], [1], [0, 0, 1, 1], [], []>} : vector<64x12xf32>, vector<12x128xf32>, vector<64x128xf32> -> vector<64x128xf32>
    %c0_4 = arith.constant 0 : index
    %c0_5 = arith.constant 0 : index
    %4 = vector.load %arg3[%c0_4, %c0_5] : memref<1x128xf32, #tpu.memory_space<vmem>>, vector<1x128xf32>
    %5 = vector.broadcast %4 : vector<1x128xf32> to vector<64x128xf32>
    %6 = arith.addf %3, %5 : vector<64x128xf32>
    %7 = vector.shape_cast %6 : vector<64x128xf32> to vector<8x8x128xf32>
    %c0_6 = arith.constant 0 : index
    %c0_7 = arith.constant 0 : index
    %8 = vector.load %arg2[%c0_6, %c0_7] : memref<32x128xf32, #tpu.memory_space<vmem>>, vector<32x128xf32>
    %cst_8 = arith.constant 0.000000e+00 : f32
    %9 = vector.broadcast %cst_8 : f32 to vector<8x32xf32>
    %cst_9 = arith.constant 0.000000e+00 : f32
    %10 = vector.broadcast %cst_9 : f32 to vector<8x32xf32>
    %11 = vector.extract_strided_slice %7 {offsets = [0, 0, 0], sizes = [8, 1, 128], strides = [1, 1, 1]} : vector<8x8x128xf32> to vector<8x1x128xf32>
    %12 = vector.shape_cast %11 : vector<8x1x128xf32> to vector<8x128xf32>
    %cst_10 = arith.constant dense<0.000000e+00> : vector<8x128xf32>
    %13 = tpu.matmul %9, %8, %cst_10 {dimension_numbers = #tpu.dot_dimension_numbers<[1], [0], [0], [1], [0, 0, 1, 1], [], []>} : vector<8x32xf32>, vector<32x128xf32>, vector<8x128xf32> -> vector<8x128xf32>
    %14 = arith.addf %12, %13 : vector<8x128xf32>
    %15 = vector.extract_strided_slice %14 {offsets = [0, 0], sizes = [8, 32], strides = [1, 1]} : vector<8x128xf32> to vector<8x32xf32>
    %16 = arith.negf %15 : vector<8x32xf32>
    %17 = math.exp %16 : vector<8x32xf32>
    %cst_11 = arith.constant 1.000000e+00 : f32
    %18 = vector.broadcast %cst_11 : f32 to vector<8x32xf32>
    %19 = arith.addf %18, %17 : vector<8x32xf32>
    %20 = arith.divf %18, %19 : vector<8x32xf32>
    %21 = vector.extract_strided_slice %14 {offsets = [0, 32], sizes = [8, 32], strides = [1, 1]} : vector<8x128xf32> to vector<8x32xf32>
    %22 = arith.negf %21 : vector<8x32xf32>
    %23 = math.exp %22 : vector<8x32xf32>
    %cst_12 = arith.constant 1.000000e+00 : f32
    %24 = vector.broadcast %cst_12 : f32 to vector<8x32xf32>
    %25 = arith.addf %24, %23 : vector<8x32xf32>
    %26 = arith.divf %24, %25 : vector<8x32xf32>
    %27 = vector.extract_strided_slice %14 {offsets = [0, 64], sizes = [8, 32], strides = [1, 1]} : vector<8x128xf32> to vector<8x32xf32>
    %28 = math.tanh %27 : vector<8x32xf32>
    %29 = vector.extract_strided_slice %14 {offsets = [0, 96], sizes = [8, 32], strides = [1, 1]} : vector<8x128xf32> to vector<8x32xf32>
    %30 = arith.negf %29 : vector<8x32xf32>
    %31 = math.exp %30 : vector<8x32xf32>
    %cst_13 = arith.constant 1.000000e+00 : f32
    %32 = vector.broadcast %cst_13 : f32 to vector<8x32xf32>
    %33 = arith.addf %32, %31 : vector<8x32xf32>
    %34 = arith.divf %32, %33 : vector<8x32xf32>
    %35 = arith.mulf %26, %10 : vector<8x32xf32>
    %36 = arith.mulf %20, %28 : vector<8x32xf32>
    %37 = arith.addf %35, %36 : vector<8x32xf32>
    %38 = math.tanh %37 : vector<8x32xf32>
    %39 = arith.mulf %34, %38 : vector<8x32xf32>
    %40 = vector.extract_strided_slice %7 {offsets = [0, 1, 0], sizes = [8, 1, 128], strides = [1, 1, 1]} : vector<8x8x128xf32> to vector<8x1x128xf32>
    %41 = vector.shape_cast %40 : vector<8x1x128xf32> to vector<8x128xf32>
    %cst_14 = arith.constant dense<0.000000e+00> : vector<8x128xf32>
    %42 = tpu.matmul %39, %8, %cst_14 {dimension_numbers = #tpu.dot_dimension_numbers<[1], [0], [0], [1], [0, 0, 1, 1], [], []>} : vector<8x32xf32>, vector<32x128xf32>, vector<8x128xf32> -> vector<8x128xf32>
    %43 = arith.addf %41, %42 : vector<8x128xf32>
    %44 = vector.extract_strided_slice %43 {offsets = [0, 0], sizes = [8, 32], strides = [1, 1]} : vector<8x128xf32> to vector<8x32xf32>
    %45 = arith.negf %44 : vector<8x32xf32>
    %46 = math.exp %45 : vector<8x32xf32>
    %cst_15 = arith.constant 1.000000e+00 : f32
    %47 = vector.broadcast %cst_15 : f32 to vector<8x32xf32>
    %48 = arith.addf %47, %46 : vector<8x32xf32>
    %49 = arith.divf %47, %48 : vector<8x32xf32>
    %50 = vector.extract_strided_slice %43 {offsets = [0, 32], sizes = [8, 32], strides = [1, 1]} : vector<8x128xf32> to vector<8x32xf32>
    %51 = arith.negf %50 : vector<8x32xf32>
    %52 = math.exp %51 : vector<8x32xf32>
    %cst_16 = arith.constant 1.000000e+00 : f32
    %53 = vector.broadcast %cst_16 : f32 to vector<8x32xf32>
    %54 = arith.addf %53, %52 : vector<8x32xf32>
    %55 = arith.divf %53, %54 : vector<8x32xf32>
    %56 = vector.extract_strided_slice %43 {offsets = [0, 64], sizes = [8, 32], strides = [1, 1]} : vector<8x128xf32> to vector<8x32xf32>
    %57 = math.tanh %56 : vector<8x32xf32>
    %58 = vector.extract_strided_slice %43 {offsets = [0, 96], sizes = [8, 32], strides = [1, 1]} : vector<8x128xf32> to vector<8x32xf32>
    %59 = arith.negf %58 : vector<8x32xf32>
    %60 = math.exp %59 : vector<8x32xf32>
    %cst_17 = arith.constant 1.000000e+00 : f32
    %61 = vector.broadcast %cst_17 : f32 to vector<8x32xf32>
    %62 = arith.addf %61, %60 : vector<8x32xf32>
    %63 = arith.divf %61, %62 : vector<8x32xf32>
    %64 = arith.mulf %55, %37 : vector<8x32xf32>
    %65 = arith.mulf %49, %57 : vector<8x32xf32>
    %66 = arith.addf %64, %65 : vector<8x32xf32>
    %67 = math.tanh %66 : vector<8x32xf32>
    %68 = arith.mulf %63, %67 : vector<8x32xf32>
    %69 = vector.extract_strided_slice %7 {offsets = [0, 2, 0], sizes = [8, 1, 128], strides = [1, 1, 1]} : vector<8x8x128xf32> to vector<8x1x128xf32>
    %70 = vector.shape_cast %69 : vector<8x1x128xf32> to vector<8x128xf32>
    %cst_18 = arith.constant dense<0.000000e+00> : vector<8x128xf32>
    %71 = tpu.matmul %68, %8, %cst_18 {dimension_numbers = #tpu.dot_dimension_numbers<[1], [0], [0], [1], [0, 0, 1, 1], [], []>} : vector<8x32xf32>, vector<32x128xf32>, vector<8x128xf32> -> vector<8x128xf32>
    %72 = arith.addf %70, %71 : vector<8x128xf32>
    %73 = vector.extract_strided_slice %72 {offsets = [0, 0], sizes = [8, 32], strides = [1, 1]} : vector<8x128xf32> to vector<8x32xf32>
    %74 = arith.negf %73 : vector<8x32xf32>
    %75 = math.exp %74 : vector<8x32xf32>
    %cst_19 = arith.constant 1.000000e+00 : f32
    %76 = vector.broadcast %cst_19 : f32 to vector<8x32xf32>
    %77 = arith.addf %76, %75 : vector<8x32xf32>
    %78 = arith.divf %76, %77 : vector<8x32xf32>
    %79 = vector.extract_strided_slice %72 {offsets = [0, 32], sizes = [8, 32], strides = [1, 1]} : vector<8x128xf32> to vector<8x32xf32>
    %80 = arith.negf %79 : vector<8x32xf32>
    %81 = math.exp %80 : vector<8x32xf32>
    %cst_20 = arith.constant 1.000000e+00 : f32
    %82 = vector.broadcast %cst_20 : f32 to vector<8x32xf32>
    %83 = arith.addf %82, %81 : vector<8x32xf32>
    %84 = arith.divf %82, %83 : vector<8x32xf32>
    %85 = vector.extract_strided_slice %72 {offsets = [0, 64], sizes = [8, 32], strides = [1, 1]} : vector<8x128xf32> to vector<8x32xf32>
    %86 = math.tanh %85 : vector<8x32xf32>
    %87 = vector.extract_strided_slice %72 {offsets = [0, 96], sizes = [8, 32], strides = [1, 1]} : vector<8x128xf32> to vector<8x32xf32>
    %88 = arith.negf %87 : vector<8x32xf32>
    %89 = math.exp %88 : vector<8x32xf32>
    %cst_21 = arith.constant 1.000000e+00 : f32
    %90 = vector.broadcast %cst_21 : f32 to vector<8x32xf32>
    %91 = arith.addf %90, %89 : vector<8x32xf32>
    %92 = arith.divf %90, %91 : vector<8x32xf32>
    %93 = arith.mulf %84, %66 : vector<8x32xf32>
    %94 = arith.mulf %78, %86 : vector<8x32xf32>
    %95 = arith.addf %93, %94 : vector<8x32xf32>
    %96 = math.tanh %95 : vector<8x32xf32>
    %97 = arith.mulf %92, %96 : vector<8x32xf32>
    %98 = vector.extract_strided_slice %7 {offsets = [0, 3, 0], sizes = [8, 1, 128], strides = [1, 1, 1]} : vector<8x8x128xf32> to vector<8x1x128xf32>
    %99 = vector.shape_cast %98 : vector<8x1x128xf32> to vector<8x128xf32>
    %cst_22 = arith.constant dense<0.000000e+00> : vector<8x128xf32>
    %100 = tpu.matmul %97, %8, %cst_22 {dimension_numbers = #tpu.dot_dimension_numbers<[1], [0], [0], [1], [0, 0, 1, 1], [], []>} : vector<8x32xf32>, vector<32x128xf32>, vector<8x128xf32> -> vector<8x128xf32>
    %101 = arith.addf %99, %100 : vector<8x128xf32>
    %102 = vector.extract_strided_slice %101 {offsets = [0, 0], sizes = [8, 32], strides = [1, 1]} : vector<8x128xf32> to vector<8x32xf32>
    %103 = arith.negf %102 : vector<8x32xf32>
    %104 = math.exp %103 : vector<8x32xf32>
    %cst_23 = arith.constant 1.000000e+00 : f32
    %105 = vector.broadcast %cst_23 : f32 to vector<8x32xf32>
    %106 = arith.addf %105, %104 : vector<8x32xf32>
    %107 = arith.divf %105, %106 : vector<8x32xf32>
    %108 = vector.extract_strided_slice %101 {offsets = [0, 32], sizes = [8, 32], strides = [1, 1]} : vector<8x128xf32> to vector<8x32xf32>
    %109 = arith.negf %108 : vector<8x32xf32>
    %110 = math.exp %109 : vector<8x32xf32>
    %cst_24 = arith.constant 1.000000e+00 : f32
    %111 = vector.broadcast %cst_24 : f32 to vector<8x32xf32>
    %112 = arith.addf %111, %110 : vector<8x32xf32>
    %113 = arith.divf %111, %112 : vector<8x32xf32>
    %114 = vector.extract_strided_slice %101 {offsets = [0, 64], sizes = [8, 32], strides = [1, 1]} : vector<8x128xf32> to vector<8x32xf32>
    %115 = math.tanh %114 : vector<8x32xf32>
    %116 = vector.extract_strided_slice %101 {offsets = [0, 96], sizes = [8, 32], strides = [1, 1]} : vector<8x128xf32> to vector<8x32xf32>
    %117 = arith.negf %116 : vector<8x32xf32>
    %118 = math.exp %117 : vector<8x32xf32>
    %cst_25 = arith.constant 1.000000e+00 : f32
    %119 = vector.broadcast %cst_25 : f32 to vector<8x32xf32>
    %120 = arith.addf %119, %118 : vector<8x32xf32>
    %121 = arith.divf %119, %120 : vector<8x32xf32>
    %122 = arith.mulf %113, %95 : vector<8x32xf32>
    %123 = arith.mulf %107, %115 : vector<8x32xf32>
    %124 = arith.addf %122, %123 : vector<8x32xf32>
    %125 = math.tanh %124 : vector<8x32xf32>
    %126 = arith.mulf %121, %125 : vector<8x32xf32>
    %127 = vector.extract_strided_slice %7 {offsets = [0, 4, 0], sizes = [8, 1, 128], strides = [1, 1, 1]} : vector<8x8x128xf32> to vector<8x1x128xf32>
    %128 = vector.shape_cast %127 : vector<8x1x128xf32> to vector<8x128xf32>
    %cst_26 = arith.constant dense<0.000000e+00> : vector<8x128xf32>
    %129 = tpu.matmul %126, %8, %cst_26 {dimension_numbers = #tpu.dot_dimension_numbers<[1], [0], [0], [1], [0, 0, 1, 1], [], []>} : vector<8x32xf32>, vector<32x128xf32>, vector<8x128xf32> -> vector<8x128xf32>
    %130 = arith.addf %128, %129 : vector<8x128xf32>
    %131 = vector.extract_strided_slice %130 {offsets = [0, 0], sizes = [8, 32], strides = [1, 1]} : vector<8x128xf32> to vector<8x32xf32>
    %132 = arith.negf %131 : vector<8x32xf32>
    %133 = math.exp %132 : vector<8x32xf32>
    %cst_27 = arith.constant 1.000000e+00 : f32
    %134 = vector.broadcast %cst_27 : f32 to vector<8x32xf32>
    %135 = arith.addf %134, %133 : vector<8x32xf32>
    %136 = arith.divf %134, %135 : vector<8x32xf32>
    %137 = vector.extract_strided_slice %130 {offsets = [0, 32], sizes = [8, 32], strides = [1, 1]} : vector<8x128xf32> to vector<8x32xf32>
    %138 = arith.negf %137 : vector<8x32xf32>
    %139 = math.exp %138 : vector<8x32xf32>
    %cst_28 = arith.constant 1.000000e+00 : f32
    %140 = vector.broadcast %cst_28 : f32 to vector<8x32xf32>
    %141 = arith.addf %140, %139 : vector<8x32xf32>
    %142 = arith.divf %140, %141 : vector<8x32xf32>
    %143 = vector.extract_strided_slice %130 {offsets = [0, 64], sizes = [8, 32], strides = [1, 1]} : vector<8x128xf32> to vector<8x32xf32>
    %144 = math.tanh %143 : vector<8x32xf32>
    %145 = vector.extract_strided_slice %130 {offsets = [0, 96], sizes = [8, 32], strides = [1, 1]} : vector<8x128xf32> to vector<8x32xf32>
    %146 = arith.negf %145 : vector<8x32xf32>
    %147 = math.exp %146 : vector<8x32xf32>
    %cst_29 = arith.constant 1.000000e+00 : f32
    %148 = vector.broadcast %cst_29 : f32 to vector<8x32xf32>
    %149 = arith.addf %148, %147 : vector<8x32xf32>
    %150 = arith.divf %148, %149 : vector<8x32xf32>
    %151 = arith.mulf %142, %124 : vector<8x32xf32>
    %152 = arith.mulf %136, %144 : vector<8x32xf32>
    %153 = arith.addf %151, %152 : vector<8x32xf32>
    %154 = math.tanh %153 : vector<8x32xf32>
    %155 = arith.mulf %150, %154 : vector<8x32xf32>
    %156 = vector.extract_strided_slice %7 {offsets = [0, 5, 0], sizes = [8, 1, 128], strides = [1, 1, 1]} : vector<8x8x128xf32> to vector<8x1x128xf32>
    %157 = vector.shape_cast %156 : vector<8x1x128xf32> to vector<8x128xf32>
    %cst_30 = arith.constant dense<0.000000e+00> : vector<8x128xf32>
    %158 = tpu.matmul %155, %8, %cst_30 {dimension_numbers = #tpu.dot_dimension_numbers<[1], [0], [0], [1], [0, 0, 1, 1], [], []>} : vector<8x32xf32>, vector<32x128xf32>, vector<8x128xf32> -> vector<8x128xf32>
    %159 = arith.addf %157, %158 : vector<8x128xf32>
    %160 = vector.extract_strided_slice %159 {offsets = [0, 0], sizes = [8, 32], strides = [1, 1]} : vector<8x128xf32> to vector<8x32xf32>
    %161 = arith.negf %160 : vector<8x32xf32>
    %162 = math.exp %161 : vector<8x32xf32>
    %cst_31 = arith.constant 1.000000e+00 : f32
    %163 = vector.broadcast %cst_31 : f32 to vector<8x32xf32>
    %164 = arith.addf %163, %162 : vector<8x32xf32>
    %165 = arith.divf %163, %164 : vector<8x32xf32>
    %166 = vector.extract_strided_slice %159 {offsets = [0, 32], sizes = [8, 32], strides = [1, 1]} : vector<8x128xf32> to vector<8x32xf32>
    %167 = arith.negf %166 : vector<8x32xf32>
    %168 = math.exp %167 : vector<8x32xf32>
    %cst_32 = arith.constant 1.000000e+00 : f32
    %169 = vector.broadcast %cst_32 : f32 to vector<8x32xf32>
    %170 = arith.addf %169, %168 : vector<8x32xf32>
    %171 = arith.divf %169, %170 : vector<8x32xf32>
    %172 = vector.extract_strided_slice %159 {offsets = [0, 64], sizes = [8, 32], strides = [1, 1]} : vector<8x128xf32> to vector<8x32xf32>
    %173 = math.tanh %172 : vector<8x32xf32>
    %174 = vector.extract_strided_slice %159 {offsets = [0, 96], sizes = [8, 32], strides = [1, 1]} : vector<8x128xf32> to vector<8x32xf32>
    %175 = arith.negf %174 : vector<8x32xf32>
    %176 = math.exp %175 : vector<8x32xf32>
    %cst_33 = arith.constant 1.000000e+00 : f32
    %177 = vector.broadcast %cst_33 : f32 to vector<8x32xf32>
    %178 = arith.addf %177, %176 : vector<8x32xf32>
    %179 = arith.divf %177, %178 : vector<8x32xf32>
    %180 = arith.mulf %171, %153 : vector<8x32xf32>
    %181 = arith.mulf %165, %173 : vector<8x32xf32>
    %182 = arith.addf %180, %181 : vector<8x32xf32>
    %183 = math.tanh %182 : vector<8x32xf32>
    %184 = arith.mulf %179, %183 : vector<8x32xf32>
    %185 = vector.extract_strided_slice %7 {offsets = [0, 6, 0], sizes = [8, 1, 128], strides = [1, 1, 1]} : vector<8x8x128xf32> to vector<8x1x128xf32>
    %186 = vector.shape_cast %185 : vector<8x1x128xf32> to vector<8x128xf32>
    %cst_34 = arith.constant dense<0.000000e+00> : vector<8x128xf32>
    %187 = tpu.matmul %184, %8, %cst_34 {dimension_numbers = #tpu.dot_dimension_numbers<[1], [0], [0], [1], [0, 0, 1, 1], [], []>} : vector<8x32xf32>, vector<32x128xf32>, vector<8x128xf32> -> vector<8x128xf32>
    %188 = arith.addf %186, %187 : vector<8x128xf32>
    %189 = vector.extract_strided_slice %188 {offsets = [0, 0], sizes = [8, 32], strides = [1, 1]} : vector<8x128xf32> to vector<8x32xf32>
    %190 = arith.negf %189 : vector<8x32xf32>
    %191 = math.exp %190 : vector<8x32xf32>
    %cst_35 = arith.constant 1.000000e+00 : f32
    %192 = vector.broadcast %cst_35 : f32 to vector<8x32xf32>
    %193 = arith.addf %192, %191 : vector<8x32xf32>
    %194 = arith.divf %192, %193 : vector<8x32xf32>
    %195 = vector.extract_strided_slice %188 {offsets = [0, 32], sizes = [8, 32], strides = [1, 1]} : vector<8x128xf32> to vector<8x32xf32>
    %196 = arith.negf %195 : vector<8x32xf32>
    %197 = math.exp %196 : vector<8x32xf32>
    %cst_36 = arith.constant 1.000000e+00 : f32
    %198 = vector.broadcast %cst_36 : f32 to vector<8x32xf32>
    %199 = arith.addf %198, %197 : vector<8x32xf32>
    %200 = arith.divf %198, %199 : vector<8x32xf32>
    %201 = vector.extract_strided_slice %188 {offsets = [0, 64], sizes = [8, 32], strides = [1, 1]} : vector<8x128xf32> to vector<8x32xf32>
    %202 = math.tanh %201 : vector<8x32xf32>
    %203 = vector.extract_strided_slice %188 {offsets = [0, 96], sizes = [8, 32], strides = [1, 1]} : vector<8x128xf32> to vector<8x32xf32>
    %204 = arith.negf %203 : vector<8x32xf32>
    %205 = math.exp %204 : vector<8x32xf32>
    %cst_37 = arith.constant 1.000000e+00 : f32
    %206 = vector.broadcast %cst_37 : f32 to vector<8x32xf32>
    %207 = arith.addf %206, %205 : vector<8x32xf32>
    %208 = arith.divf %206, %207 : vector<8x32xf32>
    %209 = arith.mulf %200, %182 : vector<8x32xf32>
    %210 = arith.mulf %194, %202 : vector<8x32xf32>
    %211 = arith.addf %209, %210 : vector<8x32xf32>
    %212 = math.tanh %211 : vector<8x32xf32>
    %213 = arith.mulf %208, %212 : vector<8x32xf32>
    %214 = vector.extract_strided_slice %7 {offsets = [0, 7, 0], sizes = [8, 1, 128], strides = [1, 1, 1]} : vector<8x8x128xf32> to vector<8x1x128xf32>
    %215 = vector.shape_cast %214 : vector<8x1x128xf32> to vector<8x128xf32>
    %cst_38 = arith.constant dense<0.000000e+00> : vector<8x128xf32>
    %216 = tpu.matmul %213, %8, %cst_38 {dimension_numbers = #tpu.dot_dimension_numbers<[1], [0], [0], [1], [0, 0, 1, 1], [], []>} : vector<8x32xf32>, vector<32x128xf32>, vector<8x128xf32> -> vector<8x128xf32>
    %217 = arith.addf %215, %216 : vector<8x128xf32>
    %218 = vector.extract_strided_slice %217 {offsets = [0, 0], sizes = [8, 32], strides = [1, 1]} : vector<8x128xf32> to vector<8x32xf32>
    %219 = arith.negf %218 : vector<8x32xf32>
    %220 = math.exp %219 : vector<8x32xf32>
    %cst_39 = arith.constant 1.000000e+00 : f32
    %221 = vector.broadcast %cst_39 : f32 to vector<8x32xf32>
    %222 = arith.addf %221, %220 : vector<8x32xf32>
    %223 = arith.divf %221, %222 : vector<8x32xf32>
    %224 = vector.extract_strided_slice %217 {offsets = [0, 32], sizes = [8, 32], strides = [1, 1]} : vector<8x128xf32> to vector<8x32xf32>
    %225 = arith.negf %224 : vector<8x32xf32>
    %226 = math.exp %225 : vector<8x32xf32>
    %cst_40 = arith.constant 1.000000e+00 : f32
    %227 = vector.broadcast %cst_40 : f32 to vector<8x32xf32>
    %228 = arith.addf %227, %226 : vector<8x32xf32>
    %229 = arith.divf %227, %228 : vector<8x32xf32>
    %230 = vector.extract_strided_slice %217 {offsets = [0, 64], sizes = [8, 32], strides = [1, 1]} : vector<8x128xf32> to vector<8x32xf32>
    %231 = math.tanh %230 : vector<8x32xf32>
    %232 = vector.extract_strided_slice %217 {offsets = [0, 96], sizes = [8, 32], strides = [1, 1]} : vector<8x128xf32> to vector<8x32xf32>
    %233 = arith.negf %232 : vector<8x32xf32>
    %234 = math.exp %233 : vector<8x32xf32>
    %cst_41 = arith.constant 1.000000e+00 : f32
    %235 = vector.broadcast %cst_41 : f32 to vector<8x32xf32>
    %236 = arith.addf %235, %234 : vector<8x32xf32>
    %237 = arith.divf %235, %236 : vector<8x32xf32>
    %238 = arith.mulf %229, %211 : vector<8x32xf32>
    %239 = arith.mulf %223, %231 : vector<8x32xf32>
    %240 = arith.addf %238, %239 : vector<8x32xf32>
    %241 = math.tanh %240 : vector<8x32xf32>
    %242 = arith.mulf %237, %241 : vector<8x32xf32>
    %243 = vector.extract_strided_slice %0 {offsets = [0, 7, 0], sizes = [8, 1, 12], strides = [1, 1, 1]} : vector<8x8x12xf32> to vector<8x1x12xf32>
    %244 = vector.shape_cast %243 : vector<8x1x12xf32> to vector<8x12xf32>
    %c0_42 = arith.constant 0 : index
    %c0_43 = arith.constant 0 : index
    %245 = vector.load %arg4[%c0_42, %c0_43] : memref<12x128xf32, #tpu.memory_space<vmem>>, vector<12x128xf32>
    %cst_44 = arith.constant dense<0.000000e+00> : vector<8x128xf32>
    %246 = tpu.matmul %244, %245, %cst_44 {dimension_numbers = #tpu.dot_dimension_numbers<[1], [0], [0], [1], [0, 0, 1, 1], [], []>} : vector<8x12xf32>, vector<12x128xf32>, vector<8x128xf32> -> vector<8x128xf32>
    %c0_45 = arith.constant 0 : index
    %c0_46 = arith.constant 0 : index
    %247 = vector.load %arg5[%c0_45, %c0_46] : memref<1x128xf32, #tpu.memory_space<vmem>>, vector<1x128xf32>
    %248 = vector.broadcast %247 : vector<1x128xf32> to vector<8x128xf32>
    %249 = arith.addf %246, %248 : vector<8x128xf32>
    %250 = vector.extract_strided_slice %249 {offsets = [0, 0], sizes = [8, 32], strides = [1, 1]} : vector<8x128xf32> to vector<8x32xf32>
    %251 = arith.negf %250 : vector<8x32xf32>
    %252 = math.exp %251 : vector<8x32xf32>
    %cst_47 = arith.constant 1.000000e+00 : f32
    %253 = vector.broadcast %cst_47 : f32 to vector<8x32xf32>
    %254 = arith.addf %253, %252 : vector<8x32xf32>
    %255 = arith.divf %253, %254 : vector<8x32xf32>
    %256 = vector.extract_strided_slice %249 {offsets = [0, 64], sizes = [8, 32], strides = [1, 1]} : vector<8x128xf32> to vector<8x32xf32>
    %257 = math.tanh %256 : vector<8x32xf32>
    %258 = vector.extract_strided_slice %249 {offsets = [0, 96], sizes = [8, 32], strides = [1, 1]} : vector<8x128xf32> to vector<8x32xf32>
    %259 = arith.negf %258 : vector<8x32xf32>
    %260 = math.exp %259 : vector<8x32xf32>
    %cst_48 = arith.constant 1.000000e+00 : f32
    %261 = vector.broadcast %cst_48 : f32 to vector<8x32xf32>
    %262 = arith.addf %261, %260 : vector<8x32xf32>
    %263 = arith.divf %261, %262 : vector<8x32xf32>
    %264 = arith.mulf %255, %257 : vector<8x32xf32>
    %265 = math.tanh %264 : vector<8x32xf32>
    %266 = arith.mulf %263, %265 : vector<8x32xf32>
    %c0_49 = arith.constant 0 : index
    %c0_50 = arith.constant 0 : index
    %267 = vector.load %arg6[%c0_49, %c0_50] : memref<32x128xf32, #tpu.memory_space<vmem>>, vector<32x128xf32>
    %cst_51 = arith.constant dense<0.000000e+00> : vector<8x128xf32>
    %268 = tpu.matmul %242, %267, %cst_51 {dimension_numbers = #tpu.dot_dimension_numbers<[1], [0], [0], [1], [0, 0, 1, 1], [], []>} : vector<8x32xf32>, vector<32x128xf32>, vector<8x128xf32> -> vector<8x128xf32>
    %c0_52 = arith.constant 0 : index
    %c0_53 = arith.constant 0 : index
    %269 = vector.load %arg7[%c0_52, %c0_53] : memref<32x128xf32, #tpu.memory_space<vmem>>, vector<32x128xf32>
    %cst_54 = arith.constant dense<0.000000e+00> : vector<8x128xf32>
    %270 = tpu.matmul %266, %269, %cst_54 {dimension_numbers = #tpu.dot_dimension_numbers<[1], [0], [0], [1], [0, 0, 1, 1], [], []>} : vector<8x32xf32>, vector<32x128xf32>, vector<8x128xf32> -> vector<8x128xf32>
    %271 = arith.addf %268, %270 : vector<8x128xf32>
    %c0_55 = arith.constant 0 : index
    %c0_56 = arith.constant 0 : index
    %272 = vector.load %arg8[%c0_55, %c0_56] : memref<1x128xf32, #tpu.memory_space<vmem>>, vector<1x128xf32>
    %273 = vector.broadcast %272 : vector<1x128xf32> to vector<8x128xf32>
    %274 = arith.addf %271, %273 : vector<8x128xf32>
    %c0_57 = arith.constant 0 : index
    %c0_58 = arith.constant 0 : index
    %275 = vector.load %arg9[%c0_57, %c0_58] : memref<8x128xf32, #tpu.memory_space<vmem>>, vector<8x128xf32>
    tpu.vector_store %arg9[%c0_57, %c0_58], %274 {strides = array<i32>} : memref<8x128xf32, #tpu.memory_space<vmem>>, vector<8x128xf32>,
    return
  }
}

</mosaic_0001>

<bundles_post_ra>
// kernel: tpu_custom_call.1
= control target key start
LH: loop header
LB: loop body
LE: loop exit
PB: predicated region body
PF: predicated region fallthrough
CT: control target
= control target key end

     0   :  { %14 = vsyncpa [#allocation3], 0  ;;  %s6085_s0 = inlined_call_operand.hbm [shape: f32[8,8,12], index: 0, kind: input, shape index: {}]   ;;  %s6086_s1 = inlined_call_operand.hbm [shape: f32[12,128], index: 1, kind: input, shape index: {}]   ;;  %s6087_s2 = inlined_call_operand.hbm [shape: f32[32,128], index: 2, kind: input, shape index: {}]   ;;  %s6088_s3 = inlined_call_operand.vmem [shape: f32[1,128], index: 3, kind: input, shape index: {}]   ;;  %s6089_s4 = inlined_call_operand.hbm [shape: f32[12,128], index: 4, kind: input, shape index: {}]   ;;  %s6090_s5 = inlined_call_operand.vmem [shape: f32[1,128], index: 5, kind: input, shape index: {}]   ;;  %s6091_s6 = inlined_call_operand.hbm [shape: f32[32,128], index: 6, kind: input, shape index: {}]   ;;  %s6092_s7 = inlined_call_operand.hbm [shape: f32[32,128], index: 7, kind: input, shape index: {}]   ;;  %s6093_s8 = inlined_call_operand.vmem [shape: f32[1,128], index: 8, kind: input, shape index: {}]   ;;  %s6094_s9 = inlined_call_operand.hbm [shape: f32[8,128], index: 9, kind: output, shape index: {}]  }
   0x1   :  { %15 = vsyncpa [#allocation6], 0 }
   0x2   :  { %16 = vsyncpa [#allocation9], 0 }
   0x3   :  { %17 = vsyncpa [#allocation12], 0 }
   0x4   :  { %18 = vsyncpa [#allocation4], 0  ;;  %s36_s11 = sshll.u32 %s6086_s1, 4  ;;  %s4282_s12 = smov [#allocation5]   ;;  %s37_s11 = int_to_ptr.hbm [resolvable:$true] %s36_s11 }
   0x5   :  { %s38_s13 = sshll.u32 %s4282_s12, 4  ;;  %s64_s16 = sshll.u32 %s6089_s4, 4  ;;  %s39_s13 = int_to_ptr.vmem [resolvable:$true] %s38_s13  ;;  %s65_s16 = int_to_ptr.hbm [resolvable:$true] %s64_s16 }
   0x6   :  { %s4283_s17 = smov 128   ;;  %s4284_s18 = smov 8  }
   0x7   :  { %44 = dma.hbm_to_vmem [thread:$0]  %s37_s11, 256, %s39_s13, [#allocation6], %s4283_s17, %s4283_s17, %s4284_s18  }
   0x8   :  { %s4285_s19 = smov [#allocation8]   ;;  %s23_s1 = sshll.u32 %s6085_s0, 4  ;;  %s24_s1 = int_to_ptr.hbm [resolvable:$true] %s23_s1 }
   0x9   :  { %s66_s20 = sshll.u32 %s4285_s19, 4  ;;  %s49_s24 = sshll.u32 %s6087_s2, 4  ;;  %s67_s20 = int_to_ptr.vmem [resolvable:$true] %s66_s20  ;;  %s50_s24 = int_to_ptr.hbm [resolvable:$true] %s49_s24 }
   0xa   :  { %72 = dma.hbm_to_vmem [thread:$0]  %s65_s16, 256, %s67_s20, [#allocation9], %s4283_s17, %s4283_s17, %s4284_s18  }
   0xb   :  { %s4286_s25 = smov [#allocation2]   ;;  %s4287_s27 = smov [#allocation7]  }
   0xc   :  { %s25_s26 = sshll.u32 %s4286_s25, 4  ;;  %s51_s0 = sshll.u32 %s4287_s27, 4  ;;  %s26_s26 = int_to_ptr.vmem [resolvable:$true] %s25_s26  ;;  %s52_s0 = int_to_ptr.vmem [resolvable:$true] %s51_s0 }
   0xd   :  { %31 = dma.hbm_to_vmem [thread:$0]  %s24_s1, 1024, %s26_s26, [#allocation3], %s4283_s17, %s4283_s17, %s4284_s18  }
   0xe   :  { %s79_s30 = sshll.u32 %s6091_s6, 4  ;;  %s92_s11 = sshll.u32 %s6092_s7, 4  ;;  %s80_s30 = int_to_ptr.hbm [resolvable:$true] %s79_s30  ;;  %s93_s11 = int_to_ptr.hbm [resolvable:$true] %s92_s11 }
   0xf   :  { %57 = dma.hbm_to_vmem [thread:$0]  %s50_s24, 512, %s52_s0, [#allocation6], %s4283_s17, %s4283_s17, %s4284_s18  }
  0x10   :  { %s4288_s12 = smov [#allocation10]   ;;  %s4289_s14 = smov [#allocation11]  }
  0x11   :  { %s81_s13 = sshll.u32 %s4288_s12, 4  ;;  %s94_s6 = sshll.u32 %s4289_s14, 4  ;;  %s82_s13 = int_to_ptr.vmem [resolvable:$true] %s81_s13  ;;  %s95_s6 = int_to_ptr.vmem [resolvable:$true] %s94_s6 }
  0x12   :  { %87 = dma.hbm_to_vmem [thread:$0]  %s80_s30, 512, %s82_s13, [#allocation9], %s4283_s17, %s4283_s17, %s4284_s18  }
  0x13   :  { %100 = dma.hbm_to_vmem [thread:$0]  %s93_s11, 512, %s95_s6, [#allocation12], %s4283_s17, %s4283_s17, %s4284_s18  }
  0x14   :  { %4272 = dma.done.wait [#allocation3], 1024  }
  0x15   :  { %4273 = vsyncadd [#allocation3], 4294966272 }
  0x16   :  { %4274 = dma.done.wait [#allocation6], 768  }
  0x17   :  { %4275 = vsyncadd [#allocation6], 4294966528 }
  0x18   :  { %4276 = dma.done.wait [#allocation9], 768  }
  0x19   :  { %4277 = vsyncadd [#allocation9], 4294966528 }
  0x1a   :  { %4278 = dma.done.wait [#allocation12], 512  }
  0x1b   :  { %4279 = vsyncadd [#allocation12], 4294966784  ;;  %vm6096_vm0 = vcmask 1043456   ;;  %v136_v0 = vld [vmem:[#allocation5 + $0x8] sm:$0xf]  ;;  %v135_v1 = vld [vmem:[#allocation5] sm:$0xff] }
  0x1c   :  { %3477 = vmatpush.msk.msra.mxu0 %vm6096_vm0, %v136_v0  ;;  %3562 = vmatpush.msk.msra.mxu1 %vm6096_vm0, %v136_v0  ;;  %v127_v2 = vld [vmem:[#allocation2] sm:$0xff]  ;;  %vm6095_vm1 = vcmask 97280   ;;  %v4383_v3 = vld [vmem:[#allocation7 + $0x18] sm:$0xff]  ;;  %v133_v6 = vld [vmem:[#allocation2 + $0x30] sm:$0xff]  ;;  %vm568_vm2 = vcmask 1041409   ;;  %vm571_vm3 = vcmask 1042434  }
  0x1d   :  { %3563 = vmatpush.msk.msra.mxu3 %vm6096_vm0, %v136_v0  ;;  %v3302_v4 = vrot.slane %v127_v2, 7  ;;  %v132_v5 = vld [vmem:[#allocation2 + $0x28] sm:$0xff]  ;;  %604 = vmatpush.msra.mxu2 %v4383_v3  ;;  %v129_v8 = vld [vmem:[#allocation2 + $0x10] sm:$0xff]  ;;  %v130_v11 = vld [vmem:[#allocation2 + $0x18] sm:$0xff]  ;;  %vm574_vm4 = vcmask 1043459   ;;  %vm577_vm5 = vcmask 1044484  }
  0x1e   :  { %185 = vmatpush.msra.mxu0 %v135_v1  ;;  %3564 = vmatpush.msra.mxu1 %v135_v1  ;;  %v128_v7 = vld [vmem:[#allocation2 + $0x8] sm:$0xff]  ;;  %v3305_v10 = vrot.slane %v129_v8, 5  ;;  %v131_v12 = vld [vmem:[#allocation2 + $0x20] sm:$0xff]  ;;  %v3307_v14 = vrot.slane %v130_v11, 4  ;;  %v3311_v16 = vrot.slane %v132_v5, 2  ;;  %v4395_v18 = vld [vmem:[#allocation7 + $0x8] sm:$0xff] }
  0x1f   :  { %3565 = vmatpush.msra.mxu3 %v135_v1  ;;  %3478 = vmatmul.msk.f32.vlgmr.msra.gmra.mxu0 %vm6095_vm1, %v127_v2  ;;  %v3303_v9 = vrot.slane %v128_v7, 6  ;;  %v4390_v13 = vld [vmem:[#allocation7 + $0x10] sm:$0xff]  ;;  %v3309_v15 = vrot.slane %v131_v12, 3  ;;  %v4402_v21 = vld [vmem:[#allocation7] sm:$0xff]  ;;  %vm580_vm6 = vcmask 1045509   ;;  %v134_v23 = vld [vmem:[#allocation2 + $0x38] sm:$0xff] }
  0x20   :  { %3483 = vmatmul.msk.f32.vlgmr.msra.gmra.mxu1 %vm6095_vm1, %v132_v5  ;;  %3484 = vmatmul.msk.f32.vlgmr.msra.gmra.mxu3 %vm6095_vm1, %v133_v6  ;;  %v4290_v25 = vmov 0.0   ;;  %v3579_v28 = vld [vmem:[%s6088_s3] ss:$0 sm:$0xff]  ;;  %s4291_s3 = smov 64   ;;  %s4292_s16 = smov 32  }
  0x21   :  { %231 = vmatpush.msrb.mxu1 %v4383_v3  ;;  %v3304_v17 = vsel %vm568_vm2, %v3303_v9, %v3302_v4  ;;  %605 = vmatpush.msra.mxu2 %v4390_v13  ;;  %s4294_s21 = smov [#allocation13]   ;;  %s3464_s23 = sshll.u32 %s6094_s9, 4  ;;  %s3465_s23 = int_to_ptr.hbm [resolvable:$true] %s3464_s23 }
  0x22   :  { %v3306_v19 = vsel %vm571_vm3, %v3305_v10, %v3304_v17  ;;  %994 = vmatpush.msrb.mxu3 %v4383_v3  ;;  %s3462_s22 = sshll.u32 %s4294_s21, 4  ;;  %s3463_s22 = int_to_ptr.vmem [resolvable:$true] %s3462_s22 }
  0x23   :  { %232 = vmatpush.msrb.mxu1 %v4390_v13  ;;  %v3308_v20 = vsel %vm574_vm4, %v3307_v14, %v3306_v19  ;;  %606 = vmatpush.msra.mxu2 %v4395_v18 }
  0x24   :  { %v3310_v22 = vsel %vm577_vm5, %v3309_v15, %v3308_v20  ;;  %995 = vmatpush.msrb.mxu3 %v4390_v13 }
  0x25   :  { %233 = vmatpush.msrb.mxu1 %v4395_v18  ;;  %v4408_v24 = vsel %vm580_vm6, %v3311_v16, %v3310_v22  ;;  %607 = vmatpush.msra.mxu2 %v4402_v21 }
  0x26   :  { %996 = vmatpush.msrb.mxu3 %v4395_v18 }
  0x27   :  { %1774 = vmatpush.msrb.mxu2 %v4383_v3  ;;  %234 = vmatpush.msrb.mxu1 %v4402_v21 }
  0x28   :  { %3479 = vmatmul.msk.f32.gmra.mxu0 %vm6095_vm1, %v128_v7  ;;  %3485 = vmatmul.msk.f32.gmra.mxu3 %vm6095_vm1, %v134_v23 }
  0x29   :  { %235 = vmatmul.f32.vlgmr.msrb.gmra.mxu1 %v4290_v25  ;;  %997 = vmatpush.msrb.mxu3 %v4402_v21 }
  0x2a   :  { %1384 = vmatpush.msra.mxu1 %v4383_v3  ;;  %1775 = vmatpush.msrb.mxu2 %v4390_v13 }
  0x2b   :  { %2164 = vmatpush.msra.mxu3 %v4383_v3 }
  0x2c   :  { %1385 = vmatpush.msra.mxu1 %v4390_v13  ;;  %1776 = vmatpush.msrb.mxu2 %v4395_v18 }
  0x2d   :  { %2165 = vmatpush.msra.mxu3 %v4390_v13 }
  0x2e   :  { %1386 = vmatpush.msra.mxu1 %v4395_v18  ;;  %1777 = vmatpush.msrb.mxu2 %v4402_v21 }
  0x2f   :  { %2166 = vmatpush.msra.mxu3 %v4395_v18 }
  0x30   :  { %3480 = vmatmul.msk.f32.gmra.mxu0 %vm6095_vm1, %v129_v8  ;;  %1387 = vmatpush.msra.mxu1 %v4402_v21 }
  0x31   :  { %2167 = vmatpush.msra.mxu3 %v4402_v21 }
  0x32   :  { %2554 = vmatpush.msrb.mxu1 %v4383_v3 }
  0x34   :  { %2555 = vmatpush.msrb.mxu1 %v4390_v13 }
  0x36   :  { %2556 = vmatpush.msrb.mxu1 %v4395_v18 }
  0x38   :  { %2557 = vmatpush.msrb.mxu1 %v4402_v21  ;;  %3481 = vmatmul.msk.f32.gmra.mxu0 %vm6095_vm1, %v130_v11 }
  0x40   :  { %3482 = vmatmul.msk.f32.gmra.mxu0 %vm6095_vm1, %v131_v12 }
  0x9c   :  { %v187_v26 = vpop.f32.mrf.mxu0 }
  0x9d   :  { %v202_v27 = vpop.f32.mrf.mxu1  ;;  %v4438_v29 = vadd.f32 %v3579_v28, %v187_v26 }
  0x9e   :  { %v4464_v62 = vadd.f32 %v3579_v28, %v202_v27 }
  0xa3   :  { %v205_v36 = vpop.f32.mrf.mxu3 }
  0xa4   :  { %v4449_v44 = vadd.f32 %v3579_v28, %v205_v36 }
  0xa5   :  { %v190_v30 = vpop.f32.mrf.mxu0 }
  0xa6   :  { %v4440_v31 = vadd.f32 %v3579_v28, %v190_v30  ;;  %v236_v32 = vpop.f32.mrf.mxu1 }
  0xa7   :  { %v255_v33 = vadd.f32 %v236_v32, %v4438_v29  ;;  %v240_v34 = vrot.slane %v236_v32, 1  ;;  %v241_v39 = vrot.slane %v236_v32, 2  ;;  %v245_v47 = vrot.slane %v236_v32, 6 }
  0xa8   :  { %v242_v48 = vrot.slane %v236_v32, 3  ;;  %v246_v53 = vrot.slane %v236_v32, 7  ;;  %v243_v57 = vrot.slane %v236_v32, 4  ;;  %v244_v61 = vrot.slane %v236_v32, 5 }
  0xa9   :  { %3582 = vtanh.f32 %v255_v33  ;;  %v256_v35 = vadd.f32 %v240_v34, %v4440_v31  ;;  %v261_v52 = vadd.f32 %v245_v47, %v4449_v44  ;;  %v3486_v4 = vmul.f32 -1.442695, %v255_v33 }
  0xaa   :  { %v260_v63 = vadd.f32 %v244_v61, %v4464_v62 }
  0xab   :  { %3584 = vtanh.f32 %v256_v35  ;;  %v208_v45 = vpop.f32.mrf.mxu3  ;;  %v3487_v5 = vmul.f32 -1.442695, %v256_v35  ;;  %v3492_v20 = vmul.f32 -1.442695, %v261_v52 }
  0xac   :  { %v4454_v51 = vadd.f32 %v3579_v28, %v208_v45  ;;  %v3491_v6 = vmul.f32 -1.442695, %v260_v63 }
  0xad   :  { %v193_v37 = vpop.f32.mrf.mxu0 }
  0xae   :  { %v4444_v38 = vadd.f32 %v3579_v28, %v193_v37  ;;  %v262_v55 = vadd.f32 %v246_v53, %v4454_v51 }
  0xaf   :  { %v3583_v40 = vpop.eup %3582 }
  0xb0   :  { %439 = vrot.lane.b32.xlu1 %v3583_v40, %s4291_s3  ;;  %v257_v41 = vadd.f32 %v241_v39, %v4444_v38  ;;  %v3493_v23 = vmul.f32 -1.442695, %v262_v55 }
  0xb1   :  { %v3585_v42 = vpop.eup %3584 }
  0xb2   :  { %3586 = vtanh.f32 %v257_v41  ;;  %441 = vrot.lane.b32.xlu0 %v3585_v42, %s4291_s3  ;;  %v3488_v8 = vmul.f32 -1.442695, %v257_v41 }
  0xb5   :  { %v196_v43 = vpop.f32.mrf.mxu0 }
  0xb6   :  { %v4451_v46 = vadd.f32 %v3579_v28, %v196_v43 }
  0xb8   :  { %v3587_v49 = vpop.eup %3586  ;;  %v258_v50 = vadd.f32 %v242_v48, %v4451_v46 }
  0xba   :  { %3588 = vtanh.f32 %v258_v50  ;;  %443 = vrot.lane.b32.xlu0 %v3587_v49, %s4291_s3  ;;  %v3489_v12 = vmul.f32 -1.442695, %v258_v50 }
  0xbb   :  { %3590 = vtanh.f32 %v261_v52 }
  0xbc   :  { %3592 = vtanh.f32 %v262_v55 }
  0xbd   :  { %v199_v54 = vpop.f32.mrf.mxu0 }
  0xbe   :  { %v4459_v56 = vadd.f32 %v3579_v28, %v199_v54 }
  0xc0   :  { %v3589_v58 = vpop.eup %3588  ;;  %v259_v59 = vadd.f32 %v243_v57, %v4459_v56 }
  0xc1   :  { %445 = vrot.lane.b32.xlu1 %v3589_v58, %s4291_s3  ;;  %v3591_v60 = vpop.eup %3590 }
  0xc2   :  { %3594 = vtanh.f32 %v259_v59  ;;  %451 = vrot.lane.b32.xlu0 %v3591_v60, %s4291_s3  ;;  %v3593_v0 = vpop.eup %3592  ;;  %v3490_v15 = vmul.f32 -1.442695, %v259_v59 }
  0xc3   :  { %3596 = vtanh.f32 %v260_v63 }
  0xc4   :  { %3598 = vpow2.f32 %v3486_v4 }
  0xc5   :  { %3600 = vpow2.f32 %v3487_v5 }
  0xc6   :  { %3602 = vpow2.f32 %v3491_v6 }
  0xc7   :  { %3604 = vpow2.f32 %v3488_v8 }
  0xc8   :  { %v3595_v1 = vpop.eup %3594 }
  0xc9   :  { %447 = vrot.lane.b32.xlu2 %v3595_v1, %s4291_s3  ;;  %453 = vrot.lane.b32.xlu1 %v3593_v0, %s4291_s3  ;;  %v3597_v2 = vpop.eup %3596 }
  0xca   :  { %v3599_v7 = vpop.eup %3598 }
  0xcb   :  { %v3601_v9 = vpop.eup %3600  ;;  %v4470_v10 = vadd.f32 1.0, %v3599_v7 }
  0xcc   :  { %v4472_v11 = vadd.f32 1.0, %v3601_v9  ;;  %v3603_v14 = vpop.eup %3602 }
  0xcd   :  { %3606 = vrcp.f32 %v4470_v10  ;;  %v3605_v16 = vpop.eup %3604  ;;  %v4476_v17 = vadd.f32 1.0, %v3603_v14  ;;  %v306_v50 = vand.u32 2147483648, %v4470_v10  ;;  %vm300_vm8 = vweird.f32 %v4470_v10 }
  0xce   :  { %3608 = vrcp.f32 %v4472_v11  ;;  %v4478_v22 = vadd.f32 1.0, %v3605_v16  ;;  %v304_v54 = vand.u32 2147483647, %v4470_v10  ;;  %vm315_vm11 = vweird.f32 %v4472_v11 }
  0xcf   :  { %3610 = vpow2.f32 %v3489_v12  ;;  %v321_v61 = vand.u32 2147483648, %v4472_v11  ;;  %v307_v63 = vor.u32 1.1754944e-38, %v306_v50  ;;  %v319_v0 = vand.u32 2147483647, %v4472_v11 }
  0xd0   :  { %3612 = vpow2.f32 %v3490_v15  ;;  %vm305_vm12 = vcmp.eq.f32.partialorder %v304_v54, 8.507059e+37 }
  0xd1   :  { %449 = vrot.lane.b32.xlu2 %v3597_v2, %s4291_s3  ;;  %3614 = vrcp.f32 %v4476_v17  ;;  %v322_v12 = vor.u32 1.1754944e-38, %v321_v61  ;;  %vm320_vm14 = vcmp.eq.f32.partialorder %v319_v0, 8.507059e+37 }
  0xd2   :  { %3616 = vpow2.f32 %v3492_v20 }
  0xd3   :  { %v3607_v19 = vpop.eup %3606  ;;  %3618 = vrcp.f32 %v4478_v22 }
  0xd4   :  { %v4480_v25 = vpop.eup %3608  ;;  %v296_v26 = vmul.f32 %v3607_v19, %v4470_v10  ;;  %3620 = vpow2.f32 %v3493_v23  ;;  %vm301_vm7 = vweird.f32 %v3607_v19 }
  0xd5   :  { %v3611_v27 = vpop.eup %3610  ;;  %v311_v30 = vmul.f32 %v4480_v25, %v4472_v11  ;;  %vm4511_vm9 = vmor %vm300_vm8, %vm301_vm7  ;;  %vm316_vm10 = vweird.f32 %v4480_v25  ;;  %vm375_vm7 = vweird.f32 %v4476_v17 }
  0xd6   :  { %v3613_v28 = vpop.eup %3612  ;;  %v297_v32 = vsub.f32 1.0, %v296_v26  ;;  %v4487_v33 = vadd.f32 1.0, %v3611_v27  ;;  %vm4529_vm13 = vmor %vm315_vm11, %vm316_vm10  ;;  %v381_v26 = vand.u32 2147483648, %v4476_v17  ;;  %vm330_vm10 = vweird.f32 %v4478_v22 }
  0xd7   :  { %v4489_v34 = vpop.eup %3614  ;;  %v4491_v35 = vadd.f32 1.0, %v3613_v28  ;;  %v312_v37 = vsub.f32 1.0, %v311_v30 }
  0xd8   :  { %v3617_v36 = vpop.eup %3616  ;;  %v298_v40 = vmul.f32 %v3607_v19, %v297_v32  ;;  %3622 = vrcp.f32 %v4487_v33  ;;  %v371_v42 = vmul.f32 %v4489_v34, %v4476_v17  ;;  %vm376_vm15 = vweird.f32 %v4489_v34 }
  0xd9   :  { %v4493_v39 = vpop.eup %3618  ;;  %3624 = vrcp.f32 %v4491_v35  ;;  %v313_v43 = vmul.f32 %v4480_v25, %v312_v37  ;;  %v4502_v47 = vadd.f32 1.0, %v3617_v36  ;;  %v334_v32 = vand.u32 2147483647, %v4478_v22 }
  0xda   :  { %v3621_v41 = vpop.eup %3620  ;;  %v326_v45 = vmul.f32 %v4493_v39, %v4478_v22  ;;  %v299_v48 = vadd.f32 %v3607_v19, %v298_v40  ;;  %v372_v52 = vsub.f32 1.0, %v371_v42  ;;  %vm331_vm8 = vweird.f32 %v4493_v39 }
  0xdb   :  { %v4504_v49 = vadd.f32 1.0, %v3621_v41  ;;  %v314_v57 = vadd.f32 %v4480_v25, %v313_v43  ;;  %3626 = vrcp.f32 %v4502_v47  ;;  %v336_v36 = vand.u32 2147483648, %v4478_v22  ;;  %vm332_vm11 = vmor %vm330_vm10, %vm331_vm8 }
  0xdc   :  { %v327_v58 = vsub.f32 1.0, %v326_v45  ;;  %v303_v60 = vsel %vm4511_vm9, %v3607_v19, %v299_v48  ;;  %v373_v1 = vmul.f32 %v4489_v34, %v372_v52  ;;  %vm377_vm9 = vmor %vm375_vm7, %vm376_vm15  ;;  %v382_v42 = vor.u32 1.1754944e-38, %v381_v26 }
  0xdd   :  { %3628 = vrcp.f32 %v4504_v49  ;;  %v4533_v6 = vsel %vm305_vm12, %v307_v63, %v303_v60  ;;  %v318_v8 = vsel %vm4529_vm13, %v4480_v25, %v314_v57  ;;  %v379_v25 = vand.u32 2147483647, %v4476_v17 }
  0xde   :  { %v4507_v53 = vpop.eup %3622  ;;  %v328_v9 = vmul.f32 %v4493_v39, %v327_v58  ;;  %v374_v15 = vadd.f32 %v4489_v34, %v373_v1  ;;  %v4550_v23 = vsel %vm320_vm14, %v322_v12, %v318_v8  ;;  %vm335_vm13 = vcmp.eq.f32.partialorder %v334_v32, 8.507059e+37 }
  0xdf   :  { %v4518_v59 = vpop.eup %3624  ;;  %v341_v2 = vmul.f32 %v4507_v53, %v4487_v33  ;;  %vm380_vm12 = vcmp.eq.f32.partialorder %v379_v25, 8.507059e+37  ;;  %v337_v52 = vor.u32 1.1754944e-38, %v336_v36  ;;  %vm346_vm14 = vweird.f32 %v4507_v53 }
  0xe0   :  { %v356_v7 = vmul.f32 %v4518_v59, %v4491_v35  ;;  %v329_v30 = vadd.f32 %v4493_v39, %v328_v9  ;;  %v378_v40 = vsel %vm377_vm9, %v4489_v34, %v374_v15  ;;  %vm345_vm15 = vweird.f32 %v4487_v33 }
  0xe1   :  { %v4544_v14 = vpop.eup %3626  ;;  %v342_v16 = vsub.f32 1.0, %v341_v2  ;;  %v4571_v48 = vsel %vm380_vm12, %v382_v42, %v378_v40  ;;  %vm361_vm7 = vweird.f32 %v4518_v59  ;;  %v349_v63 = vand.u32 2147483647, %v4487_v33  ;;  %vm347_vm8 = vmor %vm345_vm15, %vm346_vm14 }
  0xe2   :  { %v357_v27 = vsub.f32 1.0, %v356_v7  ;;  %v386_v37 = vmul.f32 %v4544_v14, %v4502_v47  ;;  %v333_v45 = vsel %vm332_vm11, %v4493_v39, %v329_v30  ;;  %v351_v39 = vand.u32 2147483648, %v4487_v33 }
  0xe3   :  { %v4548_v19 = vpop.eup %3628  ;;  %v343_v17 = vmul.f32 %v4507_v53, %v342_v16  ;;  %v4576_v57 = vsel %vm335_vm13, %v337_v52, %v333_v45  ;;  %v366_v0 = vand.u32 2147483648, %v4491_v35  ;;  %vm360_vm9 = vweird.f32 %v4491_v35 }
  0xe4   :  { %v401_v41 = vmul.f32 %v4548_v19, %v4504_v49  ;;  %v358_v43 = vmul.f32 %v4518_v59, %v357_v27  ;;  %v387_v34 = vsub.f32 1.0, %v386_v37  ;;  %v364_v2 = vand.u32 2147483647, %v4491_v35  ;;  %vm362_vm10 = vmor %vm360_vm9, %vm361_vm7 }
  0xe5   :  { %v344_v54 = vadd.f32 %v4507_v53, %v343_v17  ;;  %v352_v7 = vor.u32 1.1754944e-38, %v351_v39  ;;  %vm350_vm11 = vcmp.eq.f32.partialorder %v349_v63, 8.507059e+37  ;;  %v367_v33 = vor.u32 1.1754944e-38, %v366_v0 }
  0xe6   :  { %v402_v55 = vsub.f32 1.0, %v401_v41  ;;  %v359_v60 = vadd.f32 %v4518_v59, %v358_v43  ;;  %v388_v1 = vmul.f32 %v4544_v14, %v387_v34  ;;  %vm391_vm12 = vweird.f32 %v4544_v14 }
  0xe7   :  { %v348_v4 = vsel %vm347_vm8, %v4507_v53, %v344_v54  ;;  %vm365_vm13 = vcmp.eq.f32.partialorder %v364_v2, 8.507059e+37  ;;  %vm406_vm14 = vweird.f32 %v4548_v19  ;;  %vm390_vm15 = vweird.f32 %v4502_v47 }
  0xe8   :  { %v363_v8 = vsel %vm362_vm10, %v4518_v59, %v359_v60  ;;  %v389_v9 = vadd.f32 %v4544_v14, %v388_v1  ;;  %v396_v59 = vand.u32 2147483648, %v4502_v47  ;;  %v411_v16 = vand.u32 2147483648, %v4504_v49  ;;  %vm392_vm7 = vmor %vm390_vm15, %vm391_vm12 }
  0xe9   :  { %v4600_v15 = vsel %vm365_vm13, %v367_v33, %v363_v8  ;;  %v394_v25 = vand.u32 2147483647, %v4502_v47  ;;  %vm405_vm8 = vweird.f32 %v4504_v49  ;;  %v409_v26 = vand.u32 2147483647, %v4504_v49 }
  0xea   :  { %vm407_vm9 = vmor %vm405_vm8, %vm406_vm14  ;;  %v393_v27 = vsel %vm392_vm7, %v4544_v14, %v389_v9  ;;  %v397_v30 = vor.u32 1.1754944e-38, %v396_v59  ;;  %v412_v36 = vor.u32 1.1754944e-38, %v411_v16  ;;  %v424_v14 = vmul.f32 0.0, %v4550_v23 }
  0xeb   :  { %vm395_vm10 = vcmp.eq.f32.partialorder %v394_v25, 8.507059e+37  ;;  %v428_v39 = vmul.f32 0.0, %v4571_v48  ;;  %v425_v0 = vmul.f32 0.0, %v4576_v57  ;;  %vm583_vm12 = vcmask 1046534  }
  0xec   :  { %vm586_vm13 = vcmask 1047559   ;;  %vm215_vm14 = vcmask 261120  }
 0x122   :  { %v440_v5 = vpop.permute.xlu1 %439 }
 0x123   :  { %v463_v10 = vmul.f32 %v440_v5, %v4533_v6  ;;  %v4542_v11 = vpop.permute.xlu2 %447  ;;  %v403_v5 = vmul.f32 %v4548_v19, %v402_v55 }
 0x124   :  { %v442_v20 = vpop.permute.xlu0 %441 }
 0x125   :  { %479 = vrot.lane.b32.xlu1 %v463_v10, %s4292_s16  ;;  %v464_v28 = vmul.f32 %v442_v20, %v4550_v23  ;;  %v4595_v10 = vsel %vm350_vm11, %v352_v7, %v348_v4  ;;  %v404_v53 = vadd.f32 %v4548_v19, %v403_v5  ;;  %v467_v20 = vmul.f32 %v4542_v11, %v4600_v15 }
 0x126   :  { %vm410_vm11 = vcmp.eq.f32.partialorder %v409_v26, 8.507059e+37  ;;  %v4614_v11 = vsel %vm395_vm10, %v397_v30, %v393_v27  ;;  %v426_v42 = vmul.f32 0.0, %v4595_v10  ;;  %v427_v7 = vmul.f32 0.0, %v4600_v15 }
 0x127   :  { %481 = vrot.lane.b32.xlu2 %v464_v28, %s4292_s16  ;;  %v408_v28 = vsel %vm407_vm9, %v4548_v19, %v404_v53  ;;  %v429_v34 = vmul.f32 0.0, %v4614_v11 }
 0x128   :  { %v4616_v47 = vsel %vm410_vm11, %v412_v36, %v408_v28 }
 0x12b   :  { %v450_v50 = vpop.permute.xlu2 %449 }
 0x12c   :  { %v468_v22 = vmul.f32 %v450_v50, %v4571_v48  ;;  %v444_v58 = vpop.permute.xlu0 %443  ;;  %v423_v50 = vmul.f32 0.0, %v4533_v6 }
 0x12d   :  { %v465_v61 = vmul.f32 %v444_v58, %v4576_v57 }
 0x12e   :  { %489 = vrot.lane.b32.xlu1 %v468_v22, %s4292_s16 }
 0x12f   :  { %483 = vrot.lane.b32.xlu0 %v465_v61, %s4292_s16 }
 0x133   :  { %v446_v12 = vpop.permute.xlu1 %445 }
 0x134   :  { %v466_v35 = vmul.f32 %v446_v12, %v4595_v10  ;;  %v452_v32 = vpop.permute.xlu0 %451  ;;  %v430_v12 = vmul.f32 0.0, %v4616_v47 }
 0x135   :  { %v469_v40 = vmul.f32 %v452_v32, %v4614_v11 }
 0x136   :  { %485 = vrot.lane.b32.xlu2 %v466_v35, %s4292_s16 }
 0x137   :  { %487 = vrot.lane.b32.xlu0 %v467_v20, %s4292_s16 }
 0x13b   :  { %v454_v37 = vpop.permute.xlu1 %453 }
 0x13c   :  { %v470_v49 = vmul.f32 %v454_v37, %v4616_v47 }
 0x13e   :  { %491 = vrot.lane.b32.xlu2 %v469_v40, %s4292_s16 }
 0x13f   :  { %493 = vrot.lane.b32.xlu0 %v470_v49, %s4292_s16 }
 0x181   :  { %v482_v19 = vpop.permute.xlu2 %481 }
 0x182   :  { %v4623_v17 = vadd.f32 %v482_v19, %v424_v14 }
 0x184   :  { %3630 = vtanh.f32 %v4623_v17 }
 0x18a   :  { %v3631_v41 = vpop.eup %3630 }
 0x18b   :  { %529 = vrot.lane.b32.xlu1 %v3631_v41, %s4291_s3 }
 0x190   :  { %v486_v43 = vpop.permute.xlu2 %485 }
 0x191   :  { %v4628_v45 = vadd.f32 %v486_v43, %v426_v42 }
 0x193   :  { %3632 = vtanh.f32 %v4628_v45 }
 0x197   :  { %v480_v52 = vpop.permute.xlu1 %479 }
 0x198   :  { %v4633_v22 = vadd.f32 %v480_v52, %v423_v50  ;;  %v492_v54 = vpop.permute.xlu2 %491 }
 0x199   :  { %v3633_v55 = vpop.eup %3632  ;;  %v4635_v58 = vadd.f32 %v492_v54, %v429_v34 }
 0x19a   :  { %3634 = vtanh.f32 %v4633_v22  ;;  %533 = vrot.lane.b32.xlu1 %v3633_v55, %s4291_s3 }
 0x19b   :  { %3636 = vtanh.f32 %v4635_v58 }
 0x1a0   :  { %v3635_v60 = vpop.eup %3634  ;;  %v490_v61 = vpop.permute.xlu1 %489 }
 0x1a1   :  { %v3637_v63 = vpop.eup %3636  ;;  %v4642_v1 = vadd.f32 %v490_v61, %v428_v39  ;;  %527 = vrot.lane.b32.xlu0 %v3635_v60, %s4291_s3  ;;  %v484_v2 = vpop.permute.xlu0 %483 }
 0x1a2   :  { %539 = vrot.lane.b32.xlu1 %v3637_v63, %s4291_s3  ;;  %v4646_v4 = vadd.f32 %v484_v2, %v425_v0 }
 0x1a3   :  { %3638 = vtanh.f32 %v4642_v1 }
 0x1a4   :  { %3640 = vtanh.f32 %v4646_v4 }
 0x1a9   :  { %v3639_v5 = vpop.eup %3638  ;;  %v488_v8 = vpop.permute.xlu0 %487 }
 0x1aa   :  { %537 = vrot.lane.b32.xlu0 %v3639_v5, %s4291_s3  ;;  %v3641_v33 = vpop.eup %3640  ;;  %v4652_v9 = vadd.f32 %v488_v8, %v427_v7 }
 0x1ab   :  { %531 = vrot.lane.b32.xlu2 %v3641_v33, %s4291_s3 }
 0x1ac   :  { %3642 = vtanh.f32 %v4652_v9 }
 0x1b1   :  { %v494_v35 = vpop.permute.xlu0 %493 }
 0x1b2   :  { %v3643_v53 = vpop.eup %3642  ;;  %v4657_v59 = vadd.f32 %v494_v35, %v430_v12 }
 0x1b3   :  { %535 = vrot.lane.b32.xlu2 %v3643_v53, %s4291_s3 }
 0x1b4   :  { %3644 = vtanh.f32 %v4657_v59 }
 0x1ba   :  { %v3645_v16 = vpop.eup %3644 }
 0x1bb   :  { %541 = vrot.lane.b32.xlu2 %v3645_v16, %s4291_s3 }
 0x1fd   :  { %v530_v25 = vpop.permute.xlu1 %529 }
 0x1fe   :  { %v552_v28 = vmul.f32 %v530_v25, %v4550_v23 }
 0x200   :  { %v567_v37 = vrot.slane %v552_v28, 7 }
 0x205   :  { %v532_v20 = vpop.permute.xlu2 %531 }
 0x206   :  { %v553_v32 = vmul.f32 %v532_v20, %v4576_v57 }
 0x208   :  { %v570_v14 = vrot.slane %v553_v32, 6 }
 0x20c   :  { %v534_v26 = vpop.permute.xlu1 %533 }
 0x20d   :  { %v536_v27 = vpop.permute.xlu2 %535  ;;  %v554_v40 = vmul.f32 %v534_v26, %v4595_v10 }
 0x20e   :  { %v555_v41 = vmul.f32 %v536_v27, %v4600_v15 }
 0x20f   :  { %v573_v50 = vrot.slane %v554_v40, 5 }
 0x210   :  { %v576_v10 = vrot.slane %v555_v41, 4 }
 0x213   :  { %v528_v30 = vpop.permute.xlu0 %527 }
 0x214   :  { %v551_v36 = vmul.f32 %v528_v30, %v4533_v6  ;;  %v540_v19 = vpop.permute.xlu1 %539 }
 0x215   :  { %v542_v43 = vpop.permute.xlu2 %541  ;;  %v557_v23 = vmul.f32 %v540_v19, %v4614_v11 }
 0x216   :  { %v569_v49 = vsel %vm568_vm2, %v567_v37, %v551_v36  ;;  %v558_v57 = vmul.f32 %v542_v43, %v4616_v47 }
 0x217   :  { %v572_v42 = vsel %vm571_vm3, %v570_v14, %v569_v49  ;;  %v582_v55 = vrot.slane %v557_v23, 2 }
 0x218   :  { %v575_v34 = vsel %vm574_vm4, %v573_v50, %v572_v42  ;;  %v585_v15 = vrot.slane %v558_v57, 1 }
 0x219   :  { %v578_v39 = vsel %vm577_vm5, %v576_v10, %v575_v34 }
 0x21c   :  { %v538_v52 = vpop.permute.xlu0 %537 }
 0x21d   :  { %v556_v6 = vmul.f32 %v538_v52, %v4571_v48 }
 0x21f   :  { %v579_v54 = vrot.slane %v556_v6, 3 }
 0x221   :  { %v581_v60 = vsel %vm580_vm6, %v579_v54, %v578_v39 }
 0x222   :  { %v584_v61 = vsel %vm583_vm12, %v582_v55, %v581_v60 }
 0x223   :  { %v587_v11 = vsel %vm586_vm13, %v585_v15, %v584_v61 }
 0x224   :  { %588 = vrot.lane.b32.xlu0 %v587_v11, %s4292_s16 }
 0x296   :  { %v589_v48 = vpop.permute.xlu0 %588 }
 0x297   :  { %3494 = vmatmul.msk.f32.vlgmr.msra.gmra.mxu2 %vm215_vm14, %v589_v48 }
 0x298   :  { %2944 = vmatpush.msra.mxu2 %v4383_v3 }
 0x29a   :  { %2945 = vmatpush.msra.mxu2 %v4390_v13 }
 0x29c   :  { %2946 = vmatpush.msra.mxu2 %v4395_v18 }
 0x29e   :  { %2947 = vmatpush.msra.mxu2 %v4402_v21 }
 0x31a   :  { %v609_v47 = vpop.f32.mrf.mxu2 }
 0x31b   :  { %v629_v63 = vadd.f32 %v609_v47, %v4440_v31  ;;  %v614_v0 = vrot.slane %v609_v47, 1  ;;  %v613_v2 = vrot.slane %v609_v47, 7  ;;  %v617_v7 = vrot.slane %v609_v47, 4 }
 0x31c   :  { %v616_v33 = vrot.slane %v609_v47, 3  ;;  %v615_v13 = vrot.slane %v609_v47, 2  ;;  %v619_v16 = vrot.slane %v609_v47, 6  ;;  %v618_v20 = vrot.slane %v609_v47, 5 }
 0x31d   :  { %3646 = vtanh.f32 %v629_v63  ;;  %v630_v5 = vadd.f32 %v614_v0, %v4444_v38  ;;  %v628_v8 = vadd.f32 %v613_v2, %v4438_v29  ;;  %v633_v3 = vadd.f32 %v617_v7, %v4464_v62 }
 0x31e   :  { %v632_v21 = vadd.f32 %v616_v33, %v4459_v56  ;;  %v631_v35 = vadd.f32 %v615_v13, %v4451_v46  ;;  %v635_v26 = vadd.f32 %v619_v16, %v4454_v51  ;;  %v634_v28 = vadd.f32 %v618_v20, %v4449_v44 }
 0x31f   :  { %3648 = vtanh.f32 %v630_v5  ;;  %v3497_v37 = vmul.f32 -1.442695, %v630_v5  ;;  %v3496_v42 = vmul.f32 -1.442695, %v629_v63  ;;  %v3495_v52 = vmul.f32 -1.442695, %v628_v8 }
 0x320   :  { %3650 = vtanh.f32 %v628_v8  ;;  %v3499_v40 = vmul.f32 -1.442695, %v632_v21  ;;  %v3502_v19 = vmul.f32 -1.442695, %v635_v26  ;;  %v3500_v6 = vmul.f32 -1.442695, %v633_v3 }
 0x321   :  { %3652 = vtanh.f32 %v633_v3  ;;  %v3498_v39 = vmul.f32 -1.442695, %v631_v35  ;;  %v3501_v7 = vmul.f32 -1.442695, %v634_v28 }
 0x322   :  { %3654 = vtanh.f32 %v632_v21 }
 0x323   :  { %v3647_v18 = vpop.eup %3646  ;;  %3656 = vtanh.f32 %v631_v35 }
 0x324   :  { %838 = vrot.lane.b32.xlu0 %v3647_v18, %s4291_s3  ;;  %3658 = vtanh.f32 %v635_v26 }
 0x325   :  { %v3649_v12 = vpop.eup %3648  ;;  %3660 = vtanh.f32 %v634_v28 }
 0x326   :  { %840 = vrot.lane.b32.xlu2 %v3649_v12, %s4291_s3  ;;  %v3651_v53 = vpop.eup %3650  ;;  %3662 = vpow2.f32 %v3497_v37 }
 0x327   :  { %836 = vrot.lane.b32.xlu1 %v3651_v53, %s4291_s3  ;;  %v3653_v25 = vpop.eup %3652  ;;  %3664 = vpow2.f32 %v3499_v40 }
 0x328   :  { %v3655_v27 = vpop.eup %3654 }
 0x329   :  { %v3657_v30 = vpop.eup %3656 }
 0x32a   :  { %v3659_v32 = vpop.eup %3658 }
 0x32b   :  { %v3661_v36 = vpop.eup %3660 }
 0x32c   :  { %846 = vrot.lane.b32.xlu0 %v3653_v25, %s4291_s3  ;;  %v3663_v49 = vpop.eup %3662 }
 0x32d   :  { %v662_v14 = vadd.f32 1.0, %v3663_v49  ;;  %v3665_v41 = vpop.eup %3664 }
 0x32e   :  { %844 = vrot.lane.b32.xlu2 %v3655_v27, %s4291_s3  ;;  %v4699_v43 = vadd.f32 1.0, %v3665_v41 }
 0x32f   :  { %842 = vrot.lane.b32.xlu1 %v3657_v30, %s4291_s3  ;;  %3666 = vrcp.f32 %v662_v14  ;;  %v709_v2 = vand.u32 2147483648, %v662_v14  ;;  %vm703_vm7 = vweird.f32 %v662_v14  ;;  %v707_v8 = vand.u32 2147483647, %v662_v14 }
 0x330   :  { %3668 = vpow2.f32 %v3502_v19  ;;  %v739_v27 = vand.u32 2147483648, %v4699_v43  ;;  %vm733_vm11 = vweird.f32 %v4699_v43 }
 0x331   :  { %3670 = vpow2.f32 %v3496_v42  ;;  %v710_v12 = vor.u32 1.1754944e-38, %v709_v2  ;;  %vm708_vm9 = vcmp.eq.f32.partialorder %v707_v8, 8.507059e+37 }
 0x332   :  { %3672 = vrcp.f32 %v4699_v43  ;;  %v740_v19 = vor.u32 1.1754944e-38, %v739_v27 }
 0x333   :  { %3674 = vpow2.f32 %v3495_v52 }
 0x334   :  { %3676 = vpow2.f32 %v3500_v6 }
 0x335   :  { %v3667_v50 = vpop.eup %3666 }
 0x336   :  { %850 = vrot.lane.b32.xlu2 %v3659_v32, %s4291_s3  ;;  %v3669_v23 = vpop.eup %3668  ;;  %v699_v57 = vmul.f32 %v3667_v50, %v662_v14  ;;  %vm704_vm15 = vweird.f32 %v3667_v50  ;;  %v737_v32 = vand.u32 2147483647, %v4699_v43 }
 0x337   :  { %848 = vrot.lane.b32.xlu1 %v3661_v36, %s4291_s3  ;;  %v4702_v34 = vadd.f32 1.0, %v3669_v23  ;;  %v3671_v10 = vpop.eup %3670  ;;  %vm705_vm8 = vmor %vm703_vm7, %vm704_vm15 }
 0x338   :  { %v700_v54 = vsub.f32 1.0, %v699_v57  ;;  %v3673_v55 = vpop.eup %3672  ;;  %v4706_v61 = vadd.f32 1.0, %v3671_v10  ;;  %vm738_vm7 = vcmp.eq.f32.partialorder %v737_v32, 8.507059e+37 }
 0x339   :  { %3678 = vrcp.f32 %v4702_v34  ;;  %v729_v60 = vmul.f32 %v3673_v55, %v4699_v43  ;;  %v3675_v11 = vpop.eup %3674  ;;  %vm734_vm10 = vweird.f32 %v3673_v55  ;;  %v784_v57 = vand.u32 2147483648, %v4702_v34 }
 0x33a   :  { %v701_v15 = vmul.f32 %v3667_v50, %v700_v54  ;;  %3680 = vpow2.f32 %v3498_v39  ;;  %v3677_v48 = vpop.eup %3676  ;;  %v4711_v5 = vadd.f32 1.0, %v3675_v11  ;;  %vm735_vm15 = vmor %vm733_vm11, %vm734_vm10 }
 0x33b   :  { %v730_v63 = vsub.f32 1.0, %v729_v60  ;;  %3682 = vrcp.f32 %v4706_v61  ;;  %v4713_v33 = vadd.f32 1.0, %v3677_v48  ;;  %v785_v11 = vor.u32 1.1754944e-38, %v784_v57 }
 0x33c   :  { %v702_v47 = vadd.f32 %v3667_v50, %v701_v15  ;;  %3684 = vrcp.f32 %v4711_v5 }
 0x33d   :  { %v731_v13 = vmul.f32 %v3673_v55, %v730_v63  ;;  %3686 = vpow2.f32 %v3501_v7  ;;  %v694_v63 = vand.u32 2147483648, %v4706_v61  ;;  %v754_v32 = vand.u32 2147483648, %v4713_v33 }
 0x33e   :  { %v706_v3 = vsel %vm705_vm8, %v3667_v50, %v702_v47  ;;  %3688 = vrcp.f32 %v4713_v33 }
 0x33f   :  { %v4709_v0 = vpop.eup %3678  ;;  %v4720_v16 = vsel %vm708_vm9, %v710_v12, %v706_v3  ;;  %v732_v25 = vadd.f32 %v3673_v55, %v731_v13  ;;  %vm778_vm9 = vweird.f32 %v4702_v34 }
 0x340   :  { %v774_v18 = vmul.f32 %v4709_v0, %v4702_v34  ;;  %v3681_v21 = vpop.eup %3680  ;;  %vm779_vm8 = vweird.f32 %v4709_v0 }
 0x341   :  { %v4718_v35 = vpop.eup %3682  ;;  %v4727_v30 = vadd.f32 1.0, %v3681_v21  ;;  %v736_v40 = vsel %vm735_vm15, %v3673_v55, %v732_v25  ;;  %v782_v55 = vand.u32 2147483647, %v4702_v34  ;;  %vm780_vm10 = vmor %vm778_vm9, %vm779_vm8  ;;  %v695_v21 = vor.u32 1.1754944e-38, %v694_v63 }
 0x342   :  { %v775_v26 = vsub.f32 1.0, %v774_v18  ;;  %v684_v28 = vmul.f32 %v4718_v35, %v4706_v61  ;;  %v4732_v36 = vpop.eup %3684  ;;  %v4740_v50 = vsel %vm738_vm7, %v740_v19, %v736_v40  ;;  %vm689_vm11 = vweird.f32 %v4718_v35 }
 0x343   :  { %v3687_v37 = vpop.eup %3686  ;;  %3690 = vrcp.f32 %v4727_v30  ;;  %v669_v42 = vmul.f32 %v4732_v36, %v4711_v5  ;;  %vm783_vm15 = vcmp.eq.f32.partialorder %v782_v55, 8.507059e+37  ;;  %vm688_vm7 = vweird.f32 %v4706_v61 }
 0x344   :  { %v776_v49 = vmul.f32 %v4709_v0, %v775_v26  ;;  %v4735_v14 = vpop.eup %3688  ;;  %v685_v41 = vsub.f32 1.0, %v684_v28  ;;  %v4749_v54 = vadd.f32 1.0, %v3687_v37  ;;  %vm690_vm8 = vmor %vm688_vm7, %vm689_vm11  ;;  %vm674_vm9 = vweird.f32 %v4732_v36 }
 0x345   :  { %v744_v10 = vmul.f32 %v4735_v14, %v4713_v33  ;;  %v670_v39 = vsub.f32 1.0, %v669_v42  ;;  %v679_v25 = vand.u32 2147483648, %v4711_v5  ;;  %vm673_vm11 = vweird.f32 %v4711_v5 }
 0x346   :  { %v777_v52 = vadd.f32 %v4709_v0, %v776_v49  ;;  %v686_v6 = vmul.f32 %v4718_v35, %v685_v41  ;;  %3692 = vrcp.f32 %v4749_v54  ;;  %vm749_vm7 = vweird.f32 %v4735_v14 }
 0x347   :  { %v745_v47 = vsub.f32 1.0, %v744_v10  ;;  %v671_v2 = vmul.f32 %v4732_v36, %v670_v39  ;;  %v680_v19 = vor.u32 1.1754944e-38, %v679_v25 }
 0x348   :  { %v781_v60 = vsel %vm780_vm10, %v4709_v0, %v777_v52  ;;  %v687_v48 = vadd.f32 %v4718_v35, %v686_v6  ;;  %v692_v0 = vand.u32 2147483647, %v4706_v61  ;;  %v724_v6 = vand.u32 2147483648, %v4727_v30 }
 0x349   :  { %v4754_v15 = vpop.eup %3690  ;;  %v4764_v7 = vsel %vm783_vm15, %v785_v11, %v781_v60  ;;  %v746_v18 = vmul.f32 %v4735_v14, %v745_v47  ;;  %v672_v12 = vadd.f32 %v4732_v36, %v671_v2  ;;  %vm675_vm15 = vmor %vm673_vm11, %vm674_vm9 }
 0x34a   :  { %v714_v34 = vmul.f32 %v4754_v15, %v4727_v30  ;;  %v691_v13 = vsel %vm690_vm8, %v4718_v35, %v687_v48  ;;  %vm693_vm10 = vcmp.eq.f32.partialorder %v692_v0, 8.507059e+37  ;;  %v677_v35 = vand.u32 2147483647, %v4711_v5 }
 0x34b   :  { %v4775_v26 = vsel %vm693_vm10, %v695_v21, %v691_v13  ;;  %v747_v28 = vadd.f32 %v4735_v14, %v746_v18  ;;  %v676_v37 = vsel %vm675_vm15, %v4732_v36, %v672_v12  ;;  %vm748_vm8 = vweird.f32 %v4713_v33 }
 0x34c   :  { %v752_v5 = vand.u32 2147483647, %v4713_v33  ;;  %vm678_vm9 = vcmp.eq.f32.partialorder %v677_v35, 8.507059e+37  ;;  %vm750_vm10 = vmor %vm748_vm8, %vm749_vm7  ;;  %vm719_vm11 = vweird.f32 %v4754_v15  ;;  %vm718_vm7 = vweird.f32 %v4727_v30 }
 0x34d   :  { %v4789_v42 = vsel %vm678_vm9, %v680_v19, %v676_v37  ;;  %vm720_vm8 = vmor %vm718_vm7, %vm719_vm11  ;;  %v725_v11 = vor.u32 1.1754944e-38, %v724_v6  ;;  %vm763_vm11 = vweird.f32 %v4749_v54  ;;  %v805_v18 = vrot.slane %v4623_v17, 7 }
 0x34e   :  { %vm753_vm15 = vcmp.eq.f32.partialorder %v752_v5, 8.507059e+37  ;;  %v806_v12 = vrot.slane %v4646_v4, 7  ;;  %v809_v35 = vrot.slane %v4642_v1, 7  ;;  %v811_v1 = vrot.slane %v4657_v59, 7 }
 0x34f   :  { %v821_v21 = vmul.f32 %v805_v18, %v4775_v26 }
 0x350   :  { %v827_v5 = vmul.f32 %v811_v1, %v4764_v7 }
 0x380   :  { %v841_v53 = vpop.permute.xlu2 %840 }
 0x381   :  { %v862_v20 = vmul.f32 %v841_v53, %v4720_v16  ;;  %v715_v53 = vsub.f32 1.0, %v714_v34  ;;  %v769_v34 = vand.u32 2147483648, %v4749_v54 }
 0x383   :  { %880 = vrot.lane.b32.xlu1 %v862_v20, %s4292_s16  ;;  %v3693_v20 = vpop.eup %3692  ;;  %v716_v40 = vmul.f32 %v4754_v15, %v715_v53 }
 0x384   :  { %v759_v49 = vmul.f32 %v3693_v20, %v4749_v54 }
 0x385   :  { %v717_v52 = vadd.f32 %v4754_v15, %v716_v40 }
 0x386   :  { %v760_v57 = vsub.f32 1.0, %v759_v49 }
 0x387   :  { %v721_v39 = vsel %vm720_vm8, %v4754_v15, %v717_v52 }
 0x388   :  { %v845_v43 = vpop.permute.xlu2 %844  ;;  %v761_v60 = vmul.f32 %v3693_v20, %v760_v57 }
 0x389   :  { %v864_v23 = vmul.f32 %v845_v43, %v4740_v50  ;;  %v751_v43 = vsel %vm750_vm10, %v4735_v14, %v747_v28  ;;  %v722_v14 = vand.u32 2147483647, %v4727_v30  ;;  %vm764_vm10 = vweird.f32 %v3693_v20 }
 0x38a   :  { %v762_v2 = vadd.f32 %v3693_v20, %v761_v60  ;;  %v767_v30 = vand.u32 2147483647, %v4749_v54  ;;  %v822_v54 = vmul.f32 %v806_v12, %v4720_v16 }
 0x38b   :  { %884 = vrot.lane.b32.xlu1 %v864_v23, %s4292_s16  ;;  %v755_v23 = vor.u32 1.1754944e-38, %v754_v32  ;;  %vm723_vm9 = vcmp.eq.f32.partialorder %v722_v14, 8.507059e+37 }
 0x38c   :  { %v4804_v48 = vsel %vm723_vm9, %v725_v11, %v721_v39  ;;  %vm768_vm7 = vcmp.eq.f32.partialorder %v767_v30, 8.507059e+37 }
 0x38d   :  { %v4797_v10 = vsel %vm753_vm15, %v755_v23, %v751_v43  ;;  %vm765_vm15 = vmor %vm763_vm11, %vm764_vm10 }
 0x38e   :  { %v766_v15 = vsel %vm765_vm15, %v3693_v20, %v762_v2  ;;  %v825_v17 = vmul.f32 %v809_v35, %v4797_v10 }
 0x390   :  { %v851_v8 = vpop.permute.xlu2 %850 }
 0x391   :  { %v867_v3 = vmul.f32 %v851_v8, %v4764_v7  ;;  %v770_v8 = vor.u32 1.1754944e-38, %v769_v34 }
 0x393   :  { %890 = vrot.lane.b32.xlu1 %v867_v3, %s4292_s16  ;;  %v4811_v0 = vsel %vm768_vm7, %v770_v8, %v766_v15 }
 0x396   :  { %v839_v61 = vpop.permute.xlu0 %838 }
 0x397   :  { %v861_v27 = vmul.f32 %v839_v61, %v4775_v26 }
 0x399   :  { %878 = vrot.lane.b32.xlu2 %v861_v27, %s4292_s16  ;;  %v837_v41 = vpop.permute.xlu1 %836  ;;  %v808_v27 = vrot.slane %v4652_v9, 7 }
 0x39a   :  { %v860_v36 = vmul.f32 %v837_v41, %v4789_v42 }
 0x39b   :  { %v824_v37 = vmul.f32 %v808_v27, %v4740_v50 }
 0x39c   :  { %876 = vrot.lane.b32.xlu0 %v860_v36, %s4292_s16  ;;  %v804_v36 = vrot.slane %v4633_v22, 7  ;;  %v810_v22 = vrot.slane %v4635_v58, 7 }
 0x39e   :  { %v847_v33 = vpop.permute.xlu0 %846  ;;  %v820_v57 = vmul.f32 %v804_v36, %v4789_v42  ;;  %v826_v11 = vmul.f32 %v810_v22, %v4811_v0 }
 0x39f   :  { %v865_v55 = vmul.f32 %v847_v33, %v4797_v10  ;;  %v807_v33 = vrot.slane %v4628_v45, 7 }
 0x3a1   :  { %886 = vrot.lane.b32.xlu2 %v865_v55, %s4292_s16  ;;  %v843_v47 = vpop.permute.xlu1 %842  ;;  %v823_v14 = vmul.f32 %v807_v33, %v4804_v48 }
 0x3a2   :  { %v863_v63 = vmul.f32 %v843_v47, %v4804_v48 }
 0x3a4   :  { %882 = vrot.lane.b32.xlu0 %v863_v63, %s4292_s16 }
 0x3a9   :  { %v849_v3 = vpop.permute.xlu1 %848 }
 0x3aa   :  { %v866_v13 = vmul.f32 %v849_v3, %v4811_v0 }
 0x3ac   :  { %888 = vrot.lane.b32.xlu0 %v866_v13, %s4292_s16 }
 0x3f3   :  { %v879_v53 = vpop.permute.xlu2 %878 }
 0x3f4   :  { %v4818_v25 = vadd.f32 %v879_v53, %v821_v21 }
 0x3f5   :  { %v881_v20 = vpop.permute.xlu1 %880 }
 0x3f6   :  { %3694 = vtanh.f32 %v4818_v25  ;;  %v4822_v61 = vadd.f32 %v881_v20, %v822_v54 }
 0x3f8   :  { %3696 = vtanh.f32 %v4822_v61 }
 0x3fb   :  { %v887_v28 = vpop.permute.xlu2 %886 }
 0x3fc   :  { %v3695_v4 = vpop.eup %3694  ;;  %v4828_v32 = vadd.f32 %v887_v28, %v825_v17 }
 0x3fd   :  { %926 = vrot.lane.b32.xlu1 %v3695_v4, %s4291_s3  ;;  %v885_v40 = vpop.permute.xlu1 %884 }
 0x3fe   :  { %3698 = vtanh.f32 %v4828_v32  ;;  %v3697_v49 = vpop.eup %3696  ;;  %v4833_v19 = vadd.f32 %v885_v40, %v824_v37 }
 0x3ff   :  { %928 = vrot.lane.b32.xlu0 %v3697_v49, %s4291_s3 }
 0x400   :  { %3700 = vtanh.f32 %v4833_v19 }
 0x404   :  { %v3699_v9 = vpop.eup %3698 }
 0x405   :  { %934 = vrot.lane.b32.xlu1 %v3699_v9, %s4291_s3  ;;  %v891_v41 = vpop.permute.xlu1 %890 }
 0x406   :  { %v3701_v43 = vpop.eup %3700  ;;  %v4840_v23 = vadd.f32 %v891_v41, %v827_v5 }
 0x407   :  { %932 = vrot.lane.b32.xlu0 %v3701_v43, %s4291_s3 }
 0x408   :  { %3702 = vtanh.f32 %v4840_v23 }
 0x40e   :  { %v3703_v52 = vpop.eup %3702  ;;  %v877_v6 = vpop.permute.xlu0 %876 }
 0x40f   :  { %938 = vrot.lane.b32.xlu0 %v3703_v52, %s4291_s3  ;;  %v4847_v59 = vadd.f32 %v877_v6, %v820_v57 }
 0x411   :  { %3704 = vtanh.f32 %v4847_v59 }
 0x416   :  { %v883_v55 = vpop.permute.xlu0 %882 }
 0x417   :  { %v3705_v39 = vpop.eup %3704  ;;  %v4852_v60 = vadd.f32 %v883_v55, %v823_v14 }
 0x418   :  { %924 = vrot.lane.b32.xlu2 %v3705_v39, %s4291_s3 }
 0x419   :  { %3706 = vtanh.f32 %v4852_v60 }
 0x41e   :  { %v889_v47 = vpop.permute.xlu0 %888 }
 0x41f   :  { %v3707_v63 = vpop.eup %3706  ;;  %v4858_v2 = vadd.f32 %v889_v47, %v826_v11 }
 0x420   :  { %930 = vrot.lane.b32.xlu2 %v3707_v63, %s4291_s3 }
 0x421   :  { %3708 = vtanh.f32 %v4858_v2 }
 0x427   :  { %v3709_v45 = vpop.eup %3708 }
 0x428   :  { %936 = vrot.lane.b32.xlu2 %v3709_v45, %s4291_s3 }
 0x46f   :  { %v927_v15 = vpop.permute.xlu1 %926 }
 0x470   :  { %v949_v18 = vmul.f32 %v927_v15, %v4775_v26 }
 0x471   :  { %v929_v34 = vpop.permute.xlu0 %928 }
 0x472   :  { %v925_v30 = vpop.permute.xlu2 %924  ;;  %v950_v58 = vmul.f32 %v929_v34, %v4720_v16 }
 0x473   :  { %v948_v8 = vmul.f32 %v925_v30, %v4789_v42 }
 0x474   :  { %v966_v12 = vrot.slane %v950_v58, 7 }
 0x475   :  { %v964_v3 = vrot.slane %v948_v8, 1 }
 0x477   :  { %v965_v20 = vsel %vm568_vm2, %v949_v18, %v964_v3  ;;  %v935_v35 = vpop.permute.xlu1 %934 }
 0x478   :  { %v967_v28 = vsel %vm571_vm3, %v966_v12, %v965_v20  ;;  %v953_v42 = vmul.f32 %v935_v35, %v4797_v10 }
 0x479   :  { %v933_v13 = vpop.permute.xlu0 %932 }
 0x47a   :  { %v931_v21 = vpop.permute.xlu2 %930  ;;  %v952_v53 = vmul.f32 %v933_v13, %v4740_v50 }
 0x47b   :  { %v951_v54 = vmul.f32 %v931_v21, %v4804_v48  ;;  %v972_v48 = vrot.slane %v953_v42, 4 }
 0x47c   :  { %v970_v27 = vrot.slane %v952_v53, 5 }
 0x47d   :  { %v968_v17 = vrot.slane %v951_v54, 6 }
 0x47f   :  { %v969_v16 = vsel %vm574_vm4, %v968_v17, %v967_v28 }
 0x480   :  { %v971_v50 = vsel %vm577_vm5, %v970_v27, %v969_v16 }
 0x481   :  { %v939_v4 = vpop.permute.xlu0 %938  ;;  %v973_v9 = vsel %vm580_vm6, %v972_v48, %v971_v50 }
 0x482   :  { %v955_v26 = vmul.f32 %v939_v4, %v4764_v7  ;;  %v937_v37 = vpop.permute.xlu2 %936 }
 0x483   :  { %v954_v40 = vmul.f32 %v937_v37, %v4811_v0 }
 0x484   :  { %v976_v49 = vrot.slane %v955_v26, 2 }
 0x485   :  { %v974_v1 = vrot.slane %v954_v40, 3 }
 0x487   :  { %v975_v5 = vsel %vm583_vm12, %v974_v1, %v973_v9 }
 0x488   :  { %v977_v41 = vsel %vm586_vm13, %v976_v49, %v975_v5 }
 0x489   :  { %978 = vrot.lane.b32.xlu1 %v977_v41, %s4292_s16 }
 0x4fb   :  { %v979_v10 = vpop.permute.xlu1 %978 }
 0x4fc   :  { %3503 = vmatmul.msk.f32.vlgmr.msrb.gmra.mxu3 %vm215_vm14, %v979_v10 }
 0x57f   :  { %v999_v7 = vpop.f32.mrf.mxu3 }
 0x580   :  { %v1020_v43 = vadd.f32 %v999_v7, %v4444_v38  ;;  %v1005_v0 = vrot.slane %v999_v7, 1  ;;  %v1004_v36 = vrot.slane %v999_v7, 7  ;;  %v1003_v57 = vrot.slane %v999_v7, 6 }
 0x581   :  { %v1007_v33 = vrot.slane %v999_v7, 3  ;;  %v1006_v55 = vrot.slane %v999_v7, 2  ;;  %v1008_v11 = vrot.slane %v999_v7, 4  ;;  %v1009_v30 = vrot.slane %v999_v7, 5 }
 0x582   :  { %3710 = vtanh.f32 %v1020_v43  ;;  %v1021_v52 = vadd.f32 %v1005_v0, %v4451_v46  ;;  %v1019_v6 = vadd.f32 %v1004_v36, %v4440_v31  ;;  %v1018_v14 = vadd.f32 %v1003_v57, %v4438_v29 }
 0x583   :  { %v1023_v22 = vadd.f32 %v1007_v33, %v4464_v62  ;;  %v1022_v63 = vadd.f32 %v1006_v55, %v4459_v56  ;;  %v1024_v34 = vadd.f32 %v1008_v11, %v4449_v44  ;;  %v1025_v58 = vadd.f32 %v1009_v30, %v4454_v51 }
 0x584   :  { %3712 = vtanh.f32 %v1021_v52  ;;  %v3506_v21 = vmul.f32 -1.442695, %v1020_v43  ;;  %v3504_v12 = vmul.f32 -1.442695, %v1018_v14  ;;  %v3507_v16 = vmul.f32 -1.442695, %v1021_v52 }
 0x585   :  { %3714 = vtanh.f32 %v1019_v6  ;;  %v3510_v20 = vmul.f32 -1.442695, %v1024_v34  ;;  %v3505_v4 = vmul.f32 -1.442695, %v1019_v6  ;;  %v3509_v49 = vmul.f32 -1.442695, %v1023_v22 }
 0x586   :  { %3716 = vtanh.f32 %v1018_v14  ;;  %v3508_v9 = vmul.f32 -1.442695, %v1022_v63 }
 0x587   :  { %3718 = vtanh.f32 %v1023_v22 }
 0x588   :  { %v3711_v39 = vpop.eup %3710  ;;  %3720 = vtanh.f32 %v1022_v63 }
 0x589   :  { %1230 = vrot.lane.b32.xlu2 %v3711_v39, %s4291_s3  ;;  %3722 = vtanh.f32 %v1024_v34  ;;  %v3511_v39 = vmul.f32 -1.442695, %v1025_v58 }
 0x58a   :  { %v3713_v47 = vpop.eup %3712  ;;  %3724 = vtanh.f32 %v1025_v58 }
 0x58b   :  { %1232 = vrot.lane.b32.xlu1 %v3713_v47, %s4291_s3  ;;  %v3715_v45 = vpop.eup %3714  ;;  %3726 = vpow2.f32 %v3506_v21 }
 0x58c   :  { %1228 = vrot.lane.b32.xlu0 %v3715_v45, %s4291_s3  ;;  %v3717_v15 = vpop.eup %3716  ;;  %3728 = vpow2.f32 %v3504_v12 }
 0x58d   :  { %v3719_v8 = vpop.eup %3718 }
 0x58e   :  { %v3721_v3 = vpop.eup %3720 }
 0x58f   :  { %v3723_v13 = vpop.eup %3722 }
 0x590   :  { %v3725_v18 = vpop.eup %3724 }
 0x591   :  { %1226 = vrot.lane.b32.xlu2 %v3717_v15, %s4291_s3  ;;  %v3727_v53 = vpop.eup %3726 }
 0x592   :  { %v1052_v54 = vadd.f32 1.0, %v3727_v53  ;;  %v3729_v35 = vpop.eup %3728 }
 0x593   :  { %1236 = vrot.lane.b32.xlu1 %v3719_v8, %s4291_s3  ;;  %v1050_v17 = vadd.f32 1.0, %v3729_v35 }
 0x594   :  { %1234 = vrot.lane.b32.xlu0 %v3721_v3, %s4291_s3  ;;  %3730 = vrcp.f32 %v1052_v54  ;;  %v1099_v43 = vand.u32 2147483648, %v1052_v54  ;;  %vm1093_vm9 = vweird.f32 %v1052_v54  ;;  %v1097_v0 = vand.u32 2147483647, %v1052_v54 }
 0x595   :  { %3732 = vpow2.f32 %v3510_v20  ;;  %v1069_v30 = vand.u32 2147483648, %v1050_v17  ;;  %vm1063_vm7 = vweird.f32 %v1050_v17  ;;  %v1067_v15 = vand.u32 2147483647, %v1050_v17 }
 0x596   :  { %3734 = vrcp.f32 %v1050_v17  ;;  %v1100_v14 = vor.u32 1.1754944e-38, %v1099_v43  ;;  %vm1098_vm11 = vcmp.eq.f32.partialorder %v1097_v0, 8.507059e+37 }
 0x597   :  { %3736 = vpow2.f32 %v3507_v16  ;;  %v1070_v12 = vor.u32 1.1754944e-38, %v1069_v30 }
 0x598   :  { %3738 = vpow2.f32 %v3505_v4 }
 0x599   :  { %1238 = vrot.lane.b32.xlu2 %v3723_v13, %s4291_s3 }
 0x59a   :  { %v3731_v27 = vpop.eup %3730 }
 0x59b   :  { %v3733_v28 = vpop.eup %3732  ;;  %v1089_v42 = vmul.f32 %v3731_v27, %v1052_v54  ;;  %vm1094_vm8 = vweird.f32 %v3731_v27 }
 0x59c   :  { %1240 = vrot.lane.b32.xlu0 %v3725_v18, %s4291_s3  ;;  %v4896_v26 = vadd.f32 1.0, %v3733_v28  ;;  %v3735_v40 = vpop.eup %3734  ;;  %vm1095_vm10 = vmor %vm1093_vm9, %vm1094_vm8  ;;  %vm1068_vm9 = vcmp.eq.f32.partialorder %v1067_v15, 8.507059e+37 }
 0x59d   :  { %v1090_v37 = vsub.f32 1.0, %v1089_v42  ;;  %v1059_v48 = vmul.f32 %v3735_v40, %v1050_v17  ;;  %v3737_v1 = vpop.eup %3736  ;;  %vm1064_vm15 = vweird.f32 %v3735_v40 }
 0x59e   :  { %3740 = vrcp.f32 %v4896_v26  ;;  %v3739_v5 = vpop.eup %3738  ;;  %v4901_v36 = vadd.f32 1.0, %v3737_v1  ;;  %vm1065_vm8 = vmor %vm1063_vm7, %vm1064_vm15  ;;  %v1159_v28 = vand.u32 2147483648, %v4896_v26  ;;  %v1157_v16 = vand.u32 2147483647, %v4896_v26 }
 0x59f   :  { %v1091_v50 = vmul.f32 %v3731_v27, %v1090_v37  ;;  %v1060_v10 = vsub.f32 1.0, %v1059_v48  ;;  %3742 = vpow2.f32 %v3509_v49  ;;  %v4903_v52 = vadd.f32 1.0, %v3739_v5 }
 0x5a0   :  { %3744 = vpow2.f32 %v3508_v9  ;;  %v1160_v48 = vor.u32 1.1754944e-38, %v1159_v28  ;;  %vm1158_vm7 = vcmp.eq.f32.partialorder %v1157_v16, 8.507059e+37 }
 0x5a1   :  { %v1092_v41 = vadd.f32 %v3731_v27, %v1091_v50  ;;  %v1061_v6 = vmul.f32 %v3735_v40, %v1060_v10  ;;  %3746 = vrcp.f32 %v4901_v36 }
 0x5a2   :  { %3748 = vrcp.f32 %v4903_v52 }
 0x5a3   :  { %v1096_v57 = vsel %vm1095_vm10, %v3731_v27, %v1092_v41  ;;  %v1062_v63 = vadd.f32 %v3735_v40, %v1061_v6  ;;  %3750 = vpow2.f32 %v3511_v39  ;;  %v1114_v6 = vand.u32 2147483648, %v4901_v36 }
 0x5a4   :  { %v4899_v7 = vpop.eup %3740  ;;  %v4908_v11 = vsel %vm1098_vm11, %v1100_v14, %v1096_v57  ;;  %vm1153_vm11 = vweird.f32 %v4896_v26 }
 0x5a5   :  { %v1149_v33 = vmul.f32 %v4899_v7, %v4896_v26  ;;  %v3743_v55 = vpop.eup %3742  ;;  %v1066_v3 = vsel %vm1065_vm8, %v3735_v40, %v1062_v63  ;;  %vm1154_vm10 = vweird.f32 %v4899_v7  ;;  %v1082_v63 = vand.u32 2147483647, %v4903_v52 }
 0x5a6   :  { %v3745_v34 = vpop.eup %3744  ;;  %v4913_v8 = vadd.f32 1.0, %v3743_v55  ;;  %v4923_v54 = vsel %vm1068_vm9, %v1070_v12, %v1066_v3  ;;  %vm1155_vm15 = vmor %vm1153_vm11, %vm1154_vm10  ;;  %vm1108_vm9 = vweird.f32 %v4901_v36 }
 0x5a7   :  { %v1150_v45 = vsub.f32 1.0, %v1149_v33  ;;  %v4915_v58 = vpop.eup %3746  ;;  %v4918_v18 = vadd.f32 1.0, %v3745_v34  ;;  %v1112_v33 = vand.u32 2147483647, %v4901_v36  ;;  %v1115_v34 = vor.u32 1.1754944e-38, %v1114_v6 }
 0x5a8   :  { %v4920_v21 = vpop.eup %3748  ;;  %3752 = vrcp.f32 %v4913_v8  ;;  %v1104_v20 = vmul.f32 %v4915_v58, %v4901_v36  ;;  %vm1109_vm8 = vweird.f32 %v4915_v58 }
 0x5a9   :  { %v1151_v13 = vmul.f32 %v4899_v7, %v1150_v45  ;;  %3754 = vrcp.f32 %v4918_v18  ;;  %v3751_v27 = vpop.eup %3750  ;;  %v1074_v42 = vmul.f32 %v4920_v21, %v4903_v52  ;;  %vm1079_vm10 = vweird.f32 %v4920_v21  ;;  %vm1110_vm11 = vmor %vm1108_vm9, %vm1109_vm8 }
 0x5aa   :  { %v1105_v4 = vsub.f32 1.0, %v1104_v20  ;;  %v4940_v50 = vadd.f32 1.0, %v3751_v27  ;;  %vm1113_vm1 = vcmp.eq.f32.partialorder %v1112_v33, 8.507059e+37  ;;  %vm1083_vm8 = vcmp.eq.f32.partialorder %v1082_v63, 8.507059e+37 }
 0x5ab   :  { %v1152_v17 = vadd.f32 %v4899_v7, %v1151_v13  ;;  %v1075_v49 = vsub.f32 1.0, %v1074_v42  ;;  %v1129_v42 = vand.u32 2147483648, %v4918_v18 }
 0x5ac   :  { %v1106_v41 = vmul.f32 %v4915_v58, %v1105_v4  ;;  %3756 = vrcp.f32 %v4940_v50 }
 0x5ad   :  { %v1156_v40 = vsel %vm1155_vm15, %v4899_v7, %v1152_v17  ;;  %v1076_v7 = vmul.f32 %v4920_v21, %v1075_v49  ;;  %vm1078_vm15 = vweird.f32 %v4903_v52 }
 0x5ae   :  { %v4937_v37 = vpop.eup %3752  ;;  %v4944_v9 = vsel %vm1158_vm7, %v1160_v48, %v1156_v40  ;;  %v1107_v0 = vadd.f32 %v4915_v58, %v1106_v41  ;;  %vm1080_vm7 = vmor %vm1078_vm15, %vm1079_vm10  ;;  %vm1138_vm10 = vweird.f32 %v4913_v8  ;;  %vm1123_vm15 = vweird.f32 %v4918_v18 }
 0x5af   :  { %v4942_v1 = vpop.eup %3754  ;;  %v1134_v26 = vmul.f32 %v4937_v37, %v4913_v8  ;;  %v1077_v14 = vadd.f32 %v4920_v21, %v1076_v7  ;;  %vm1139_vm9 = vweird.f32 %v4937_v37  ;;  %v1130_v41 = vor.u32 1.1754944e-38, %v1129_v42 }
 0x5b0   :  { %v1119_v43 = vmul.f32 %v4942_v1, %v4918_v18 }
 0x5b1   :  { %v1135_v57 = vsub.f32 1.0, %v1134_v26  ;;  %v1081_v36 = vsel %vm1080_vm7, %v4920_v21, %v1077_v14  ;;  %v1142_v21 = vand.u32 2147483647, %v4913_v8 }
 0x5b2   :  { %v1120_v55 = vsub.f32 1.0, %v1119_v43  ;;  %v3757_v39 = vpop.eup %3756  ;;  %v1174_v43 = vand.u32 2147483648, %v4940_v50 }
 0x5b3   :  { %v1136_v45 = vmul.f32 %v4937_v37, %v1135_v57  ;;  %v1164_v15 = vmul.f32 %v3757_v39, %v4940_v50 }
 0x5b4   :  { %v1121_v30 = vmul.f32 %v4942_v1, %v1120_v55  ;;  %v1175_v57 = vor.u32 1.1754944e-38, %v1174_v43  ;;  %v1196_v55 = vrot.slane %v4822_v61, 7 }
 0x5b5   :  { %v1165_v28 = vsub.f32 1.0, %v1164_v15 }
 0x5b6   :  { %v1122_v27 = vadd.f32 %v4942_v1, %v1121_v30 }
 0x5b7   :  { %v1166_v48 = vmul.f32 %v3757_v39, %v1165_v28 }
 0x5e3   :  { %v1231_v22 = vpop.permute.xlu2 %1230 }
 0x5e4   :  { %v1252_v47 = vmul.f32 %v1231_v22, %v4908_v11  ;;  %v1084_v22 = vand.u32 2147483648, %v4903_v52  ;;  %v1137_v52 = vadd.f32 %v4937_v37, %v1136_v45  ;;  %v1194_v45 = vrot.slane %v4847_v59, 7 }
 0x5e5   :  { %v1200_v59 = vrot.slane %v4858_v2, 7 }
 0x5e6   :  { %1270 = vrot.lane.b32.xlu1 %v1252_v47, %s4292_s16  ;;  %v1111_v47 = vsel %vm1110_vm11, %v4915_v58, %v1107_v0  ;;  %v1085_v12 = vor.u32 1.1754944e-38, %v1084_v22  ;;  %vm1140_vm11 = vmor %vm1138_vm10, %vm1139_vm9  ;;  %vm1169_vm10 = vweird.f32 %v3757_v39  ;;  %v1212_v22 = vmul.f32 %v1196_v55, %v4908_v11 }
 0x5e7   :  { %v4970_v13 = vsel %vm1113_vm1, %v1115_v34, %v1111_v47  ;;  %vm1124_vm1 = vweird.f32 %v4942_v1  ;;  %v1141_v16 = vsel %vm1140_vm11, %v4937_v37, %v1137_v52  ;;  %v1210_v30 = vmul.f32 %v1194_v45, %v4923_v54 }
 0x5e8   :  { %v4975_v20 = vsel %vm1083_vm8, %v1085_v12, %v1081_v36  ;;  %vm1125_vm7 = vmor %vm1123_vm15, %vm1124_vm1  ;;  %vm1143_vm8 = vcmp.eq.f32.partialorder %v1142_v21, 8.507059e+37  ;;  %vm1168_vm1 = vweird.f32 %v4940_v50  ;;  %v1198_v12 = vrot.slane %v4833_v19, 7 }
 0x5e9   :  { %v1126_v40 = vsel %vm1125_vm7, %v4942_v1, %v1122_v27  ;;  %v1172_v1 = vand.u32 2147483647, %v4940_v50  ;;  %vm1170_vm11 = vmor %vm1168_vm1, %vm1169_vm10  ;;  %v1195_v50 = vrot.slane %v4818_v25, 7  ;;  %v1216_v21 = vmul.f32 %v1200_v59, %v4944_v9 }
 0x5ea   :  { %v1201_v27 = vrot.slane %v4840_v23, 7 }
 0x5eb   :  { %v1227_v53 = vpop.permute.xlu2 %1226  ;;  %vm1173_vm15 = vcmp.eq.f32.partialorder %v1172_v1, 8.507059e+37 }
 0x5ec   :  { %v1250_v35 = vmul.f32 %v1227_v53, %v4923_v54 }
 0x5ee   :  { %1266 = vrot.lane.b32.xlu1 %v1250_v35, %s4292_s16  ;;  %v1144_v35 = vand.u32 2147483648, %v4913_v8  ;;  %v1127_v8 = vand.u32 2147483647, %v4918_v18  ;;  %v1167_v18 = vadd.f32 %v3757_v39, %v1166_v48 }
 0x5f0   :  { %v1145_v4 = vor.u32 1.1754944e-38, %v1144_v35  ;;  %vm1128_vm9 = vcmp.eq.f32.partialorder %v1127_v8, 8.507059e+37  ;;  %v1171_v0 = vsel %vm1170_vm11, %v3757_v39, %v1167_v18  ;;  %v1211_v39 = vmul.f32 %v1195_v50, %v4975_v20 }
 0x5f1   :  { %v5001_v6 = vsel %vm1173_vm15, %v1175_v57, %v1171_v0  ;;  %v1197_v8 = vrot.slane %v4852_v60, 7 }
 0x5f2   :  { %v4990_v49 = vsel %vm1143_vm8, %v1145_v4, %v1141_v16  ;;  %v1217_v2 = vmul.f32 %v1201_v27, %v5001_v6 }
 0x5f3   :  { %v1239_v5 = vpop.permute.xlu2 %1238 }
 0x5f4   :  { %v1256_v10 = vmul.f32 %v1239_v5, %v4944_v9 }
 0x5f6   :  { %1278 = vrot.lane.b32.xlu1 %v1256_v10, %s4292_s16  ;;  %v4993_v10 = vsel %vm1128_vm9, %v1130_v41, %v1126_v40  ;;  %v1213_v40 = vmul.f32 %v1197_v8, %v4970_v13  ;;  %v1199_v41 = vrot.slane %v4828_v32, 7 }
 0x5f7   :  { %v1214_v25 = vmul.f32 %v1198_v12, %v4993_v10 }
 0x5fd   :  { %v1233_v3 = vpop.permute.xlu1 %1232 }
 0x5fe   :  { %v1253_v58 = vmul.f32 %v1233_v3, %v4970_v13  ;;  %v1229_v53 = vpop.permute.xlu0 %1228 }
 0x5ff   :  { %v1251_v17 = vmul.f32 %v1229_v53, %v4975_v20 }
 0x600   :  { %1272 = vrot.lane.b32.xlu0 %v1253_v58, %s4292_s16 }
 0x601   :  { %1268 = vrot.lane.b32.xlu2 %v1251_v17, %s4292_s16 }
 0x605   :  { %v1237_v5 = vpop.permute.xlu1 %1236 }
 0x606   :  { %v1255_v26 = vmul.f32 %v1237_v5, %v4990_v49  ;;  %v1235_v37 = vpop.permute.xlu0 %1234 }
 0x607   :  { %v1254_v7 = vmul.f32 %v1235_v37, %v4993_v10 }
 0x608   :  { %1276 = vrot.lane.b32.xlu0 %v1255_v26, %s4292_s16  ;;  %v1215_v26 = vmul.f32 %v1199_v41, %v4990_v49 }
 0x609   :  { %1274 = vrot.lane.b32.xlu2 %v1254_v7, %s4292_s16 }
 0x60e   :  { %v1241_v33 = vpop.permute.xlu0 %1240 }
 0x60f   :  { %v1257_v14 = vmul.f32 %v1241_v33, %v5001_v6 }
 0x611   :  { %1280 = vrot.lane.b32.xlu2 %v1257_v14, %s4292_s16 }
 0x658   :  { %v1271_v47 = vpop.permute.xlu1 %1270 }
 0x659   :  { %v5007_v63 = vadd.f32 %v1271_v47, %v1212_v22 }
 0x65b   :  { %3758 = vtanh.f32 %v5007_v63  ;;  %v1269_v34 = vpop.permute.xlu2 %1268 }
 0x65c   :  { %v5013_v36 = vadd.f32 %v1269_v34, %v1211_v39 }
 0x65e   :  { %3760 = vtanh.f32 %v5013_v36 }
 0x660   :  { %v1267_v61 = vpop.permute.xlu1 %1266 }
 0x661   :  { %v3759_v15 = vpop.eup %3758  ;;  %v5017_v3 = vadd.f32 %v1267_v61, %v1210_v30 }
 0x662   :  { %1318 = vrot.lane.b32.xlu0 %v3759_v15, %s4291_s3 }
 0x663   :  { %3762 = vtanh.f32 %v5017_v3  ;;  %v1275_v58 = vpop.permute.xlu2 %1274 }
 0x664   :  { %v3761_v52 = vpop.eup %3760  ;;  %v5024_v53 = vadd.f32 %v1275_v58, %v1214_v25 }
 0x665   :  { %1316 = vrot.lane.b32.xlu1 %v3761_v52, %s4291_s3 }
 0x666   :  { %3764 = vtanh.f32 %v5024_v53 }
 0x668   :  { %v1279_v35 = vpop.permute.xlu1 %1278 }
 0x669   :  { %v3763_v19 = vpop.eup %3762  ;;  %v5029_v17 = vadd.f32 %v1279_v35, %v1216_v21 }
 0x66a   :  { %1314 = vrot.lane.b32.xlu0 %v3763_v19, %s4291_s3 }
 0x66b   :  { %3766 = vtanh.f32 %v5029_v17  ;;  %v1281_v28 = vpop.permute.xlu2 %1280 }
 0x66c   :  { %v3765_v42 = vpop.eup %3764  ;;  %v5035_v16 = vadd.f32 %v1281_v28, %v1217_v2 }
 0x66d   :  { %1322 = vrot.lane.b32.xlu1 %v3765_v42, %s4291_s3 }
 0x66e   :  { %3768 = vtanh.f32 %v5035_v16 }
 0x671   :  { %v3767_v4 = vpop.eup %3766 }
 0x672   :  { %1326 = vrot.lane.b32.xlu0 %v3767_v4, %s4291_s3  ;;  %v1273_v23 = vpop.permute.xlu0 %1272 }
 0x673   :  { %v5042_v48 = vadd.f32 %v1273_v23, %v1213_v40 }
 0x674   :  { %v3769_v5 = vpop.eup %3768 }
 0x675   :  { %3770 = vtanh.f32 %v5042_v48  ;;  %1328 = vrot.lane.b32.xlu1 %v3769_v5, %s4291_s3 }
 0x67a   :  { %v1277_v60 = vpop.permute.xlu0 %1276 }
 0x67b   :  { %v3771_v37 = vpop.eup %3770  ;;  %v5048_v7 = vadd.f32 %v1277_v60, %v1215_v26 }
 0x67c   :  { %1320 = vrot.lane.b32.xlu2 %v3771_v37, %s4291_s3 }
 0x67d   :  { %3772 = vtanh.f32 %v5048_v7 }
 0x683   :  { %v3773_v18 = vpop.eup %3772 }
 0x684   :  { %1324 = vrot.lane.b32.xlu2 %v3773_v18, %s4291_s3 }
 0x6d4   :  { %v1319_v43 = vpop.permute.xlu0 %1318 }
 0x6d5   :  { %v1340_v47 = vmul.f32 %v1319_v43, %v4908_v11 }
 0x6d6   :  { %v1321_v1 = vpop.permute.xlu2 %1320 }
 0x6d7   :  { %v1317_v0 = vpop.permute.xlu1 %1316  ;;  %v1341_v14 = vmul.f32 %v1321_v1, %v4970_v13 }
 0x6d8   :  { %v1339_v57 = vmul.f32 %v1317_v0, %v4975_v20 }
 0x6d9   :  { %v1358_v34 = vrot.slane %v1341_v14, 7 }
 0x6da   :  { %v1355_v55 = vrot.slane %v1339_v57, 1 }
 0x6dc   :  { %v1315_v33 = vpop.permute.xlu0 %1314 }
 0x6dd   :  { %v1338_v32 = vmul.f32 %v1315_v33, %v4923_v54 }
 0x6de   :  { %v1325_v39 = vpop.permute.xlu2 %1324 }
 0x6df   :  { %v1354_v22 = vrot.slane %v1338_v32, 2  ;;  %v1323_v45 = vpop.permute.xlu1 %1322  ;;  %v1343_v20 = vmul.f32 %v1325_v39, %v4990_v49 }
 0x6e0   :  { %v1342_v61 = vmul.f32 %v1323_v45, %v4993_v10 }
 0x6e1   :  { %v1356_v50 = vsel %vm568_vm2, %v1355_v55, %v1354_v22  ;;  %v1362_v59 = vrot.slane %v1343_v20, 5 }
 0x6e2   :  { %v1357_v30 = vsel %vm571_vm3, %v1340_v47, %v1356_v50  ;;  %v1360_v54 = vrot.slane %v1342_v61, 6 }
 0x6e3   :  { %v1359_v15 = vsel %vm574_vm4, %v1358_v34, %v1357_v30 }
 0x6e4   :  { %v1327_v12 = vpop.permute.xlu0 %1326  ;;  %v1361_v25 = vsel %vm577_vm5, %v1360_v54, %v1359_v15 }
 0x6e5   :  { %v1344_v13 = vmul.f32 %v1327_v12, %v4944_v9  ;;  %v1363_v21 = vsel %vm580_vm6, %v1362_v59, %v1361_v25 }
 0x6e7   :  { %v1364_v11 = vrot.slane %v1344_v13, 4  ;;  %v1329_v58 = vpop.permute.xlu1 %1328 }
 0x6e8   :  { %v1345_v52 = vmul.f32 %v1329_v58, %v5001_v6 }
 0x6e9   :  { %v1365_v35 = vsel %vm583_vm12, %v1364_v11, %v1363_v21 }
 0x6ea   :  { %v1366_v10 = vrot.slane %v1345_v52, 3 }
 0x6ec   :  { %v1367_v49 = vsel %vm586_vm13, %v1366_v10, %v1365_v35 }
 0x6ed   :  { %1368 = vrot.lane.b32.xlu2 %v1367_v49, %s4292_s16 }
 0x747   :  { %v1369_v19 = vpop.permute.xlu2 %1368 }
 0x748   :  { %3512 = vmatmul.msk.f32.vlgmr.msra.gmra.mxu1 %vm215_vm14, %v1369_v19 }
 0x7c5   :  { %v1389_v9 = vpop.f32.mrf.mxu1 }
 0x7c6   :  { %v1411_v27 = vadd.f32 %v1389_v9, %v4451_v46  ;;  %v1395_v2 = vrot.slane %v1389_v9, 7  ;;  %v1393_v28 = vrot.slane %v1389_v9, 5  ;;  %v1394_v8 = vrot.slane %v1389_v9, 6 }
 0x7c7   :  { %v1397_v4 = vrot.slane %v1389_v9, 2  ;;  %v1396_v40 = vrot.slane %v1389_v9, 1  ;;  %v1399_v37 = vrot.slane %v1389_v9, 4  ;;  %v1398_v43 = vrot.slane %v1389_v9, 3 }
 0x7c8   :  { %3774 = vtanh.f32 %v1411_v27  ;;  %v1410_v6 = vadd.f32 %v1395_v2, %v4444_v38  ;;  %v1408_v42 = vadd.f32 %v1393_v28, %v4438_v29  ;;  %v1409_v23 = vadd.f32 %v1394_v8, %v4440_v31 }
 0x7c9   :  { %v1413_v41 = vadd.f32 %v1397_v4, %v4464_v62  ;;  %v1412_v26 = vadd.f32 %v1396_v40, %v4459_v56  ;;  %v1415_v1 = vadd.f32 %v1399_v37, %v4454_v51  ;;  %v1414_v57 = vadd.f32 %v1398_v43, %v4449_v44 }
 0x7ca   :  { %3776 = vtanh.f32 %v1410_v6  ;;  %v3515_v22 = vmul.f32 -1.442695, %v1410_v6  ;;  %v3516_v30 = vmul.f32 -1.442695, %v1411_v27  ;;  %v3513_v20 = vmul.f32 -1.442695, %v1408_v42 }
 0x7cb   :  { %3778 = vtanh.f32 %v1408_v42  ;;  %v3518_v47 = vmul.f32 -1.442695, %v1413_v41  ;;  %v3514_v54 = vmul.f32 -1.442695, %v1409_v23  ;;  %v3517_v11 = vmul.f32 -1.442695, %v1412_v26 }
 0x7cc   :  { %3780 = vtanh.f32 %v1409_v23  ;;  %v3520_v35 = vmul.f32 -1.442695, %v1415_v1  ;;  %v3519_v28 = vmul.f32 -1.442695, %v1414_v57 }
 0x7cd   :  { %3782 = vtanh.f32 %v1413_v41 }
 0x7ce   :  { %v3775_v5 = vpop.eup %3774  ;;  %3784 = vtanh.f32 %v1412_v26 }
 0x7cf   :  { %1622 = vrot.lane.b32.xlu1 %v3775_v5, %s4291_s3  ;;  %3786 = vtanh.f32 %v1415_v1 }
 0x7d0   :  { %v3777_v60 = vpop.eup %3776  ;;  %3788 = vtanh.f32 %v1414_v57 }
 0x7d1   :  { %v3779_v18 = vpop.eup %3778  ;;  %1620 = vrot.lane.b32.xlu2 %v3777_v60, %s4291_s3  ;;  %3790 = vpow2.f32 %v3515_v22 }
 0x7d2   :  { %1616 = vrot.lane.b32.xlu0 %v3779_v18, %s4291_s3  ;;  %v3781_v0 = vpop.eup %3780  ;;  %3792 = vpow2.f32 %v3518_v47 }
 0x7d3   :  { %v3783_v33 = vpop.eup %3782 }
 0x7d4   :  { %v3785_v32 = vpop.eup %3784 }
 0x7d5   :  { %v3787_v14 = vpop.eup %3786 }
 0x7d6   :  { %v3789_v55 = vpop.eup %3788 }
 0x7d7   :  { %1618 = vrot.lane.b32.xlu1 %v3781_v0, %s4291_s3  ;;  %v3791_v50 = vpop.eup %3790 }
 0x7d8   :  { %v1442_v39 = vadd.f32 1.0, %v3791_v50  ;;  %v3793_v45 = vpop.eup %3792 }
 0x7d9   :  { %1626 = vrot.lane.b32.xlu2 %v3783_v33, %s4291_s3  ;;  %v1445_v34 = vadd.f32 1.0, %v3793_v45 }
 0x7da   :  { %1624 = vrot.lane.b32.xlu0 %v3785_v32, %s4291_s3  ;;  %3794 = vrcp.f32 %v1442_v39  ;;  %v1489_v9 = vand.u32 2147483648, %v1442_v39  ;;  %vm1483_vm8 = vweird.f32 %v1442_v39  ;;  %v1487_v2 = vand.u32 2147483647, %v1442_v39 }
 0x7db   :  { %3796 = vrcp.f32 %v1445_v34  ;;  %v1534_v43 = vand.u32 2147483648, %v1445_v34  ;;  %vm1528_vm11 = vweird.f32 %v1445_v34  ;;  %v1532_v0 = vand.u32 2147483647, %v1445_v34 }
 0x7dc   :  { %3798 = vpow2.f32 %v3516_v30  ;;  %v1490_v4 = vor.u32 1.1754944e-38, %v1489_v9  ;;  %vm1488_vm10 = vcmp.eq.f32.partialorder %v1487_v2, 8.507059e+37 }
 0x7dd   :  { %3800 = vpow2.f32 %v3513_v20 }
 0x7de   :  { %3802 = vpow2.f32 %v3514_v54 }
 0x7df   :  { %1630 = vrot.lane.b32.xlu1 %v3787_v14, %s4291_s3  ;;  %3804 = vpow2.f32 %v3517_v11  ;;  %v1535_v14 = vor.u32 1.1754944e-38, %v1534_v43 }
 0x7e0   :  { %v3795_v61 = vpop.eup %3794 }
 0x7e1   :  { %v1479_v15 = vmul.f32 %v3795_v61, %v1442_v39  ;;  %v3797_v13 = vpop.eup %3796  ;;  %vm1484_vm7 = vweird.f32 %v3795_v61 }
 0x7e2   :  { %1628 = vrot.lane.b32.xlu0 %v3789_v55, %s4291_s3  ;;  %v3799_v25 = vpop.eup %3798  ;;  %v1524_v58 = vmul.f32 %v3797_v13, %v1445_v34  ;;  %vm1485_vm9 = vmor %vm1483_vm8, %vm1484_vm7  ;;  %vm1529_vm1 = vweird.f32 %v3797_v13  ;;  %vm1533_vm7 = vcmp.eq.f32.partialorder %v1532_v0, 8.507059e+37 }
 0x7e3   :  { %v1480_v12 = vsub.f32 1.0, %v1479_v15  ;;  %v3801_v52 = vpop.eup %3800  ;;  %v5086_v21 = vadd.f32 1.0, %v3799_v25  ;;  %vm1530_vm15 = vmor %vm1528_vm11, %vm1529_vm1 }
 0x7e4   :  { %v1525_v49 = vsub.f32 1.0, %v1524_v58  ;;  %v5088_v19 = vadd.f32 1.0, %v3801_v52  ;;  %v3803_v27 = vpop.eup %3802 }
 0x7e5   :  { %v1481_v59 = vmul.f32 %v3795_v61, %v1480_v12  ;;  %3806 = vrcp.f32 %v5086_v21  ;;  %v3805_v8 = vpop.eup %3804  ;;  %v5092_v40 = vadd.f32 1.0, %v3803_v27  ;;  %v1504_v58 = vand.u32 2147483648, %v5086_v21 }
 0x7e6   :  { %3808 = vpow2.f32 %v3520_v35  ;;  %v1526_v42 = vmul.f32 %v3797_v13, %v1525_v49  ;;  %v5099_v37 = vadd.f32 1.0, %v3805_v8  ;;  %v1502_v52 = vand.u32 2147483647, %v5086_v21 }
 0x7e7   :  { %v1482_v10 = vadd.f32 %v3795_v61, %v1481_v59  ;;  %3810 = vrcp.f32 %v5088_v19  ;;  %v1459_v35 = vand.u32 2147483648, %v5088_v19  ;;  %vm1453_vm11 = vweird.f32 %v5088_v19 }
 0x7e8   :  { %3812 = vpow2.f32 %v3519_v28  ;;  %v1527_v60 = vadd.f32 %v3797_v13, %v1526_v42  ;;  %v1457_v42 = vand.u32 2147483647, %v5088_v19  ;;  %v1474_v0 = vand.u32 2147483648, %v5092_v40 }
 0x7e9   :  { %v1486_v6 = vsel %vm1485_vm9, %v3795_v61, %v1482_v10  ;;  %3814 = vrcp.f32 %v5092_v40  ;;  %vm1498_vm9 = vweird.f32 %v5086_v21  ;;  %v1460_v8 = vor.u32 1.1754944e-38, %v1459_v35 }
 0x7ea   :  { %v5096_v41 = vsel %vm1488_vm10, %v1490_v4, %v1486_v6  ;;  %v1531_v33 = vsel %vm1530_vm15, %v3797_v13, %v1527_v60  ;;  %3816 = vrcp.f32 %v5099_v37  ;;  %v1505_v6 = vor.u32 1.1754944e-38, %v1504_v58 }
 0x7eb   :  { %v5094_v23 = vpop.eup %3806  ;;  %v5114_v39 = vsel %vm1533_vm7, %v1535_v14, %v1531_v33  ;;  %vm1503_vm15 = vcmp.eq.f32.partialorder %v1502_v52, 8.507059e+37 }
 0x7ec   :  { %v3809_v18 = vpop.eup %3808  ;;  %v1494_v57 = vmul.f32 %v5094_v23, %v5086_v21  ;;  %vm1499_vm8 = vweird.f32 %v5094_v23 }
 0x7ed   :  { %v5102_v1 = vpop.eup %3810  ;;  %v5110_v22 = vadd.f32 1.0, %v3809_v18  ;;  %vm5138_vm10 = vmor %vm1498_vm9, %vm1499_vm8  ;;  %vm1458_vm9 = vcmp.eq.f32.partialorder %v1457_v42, 8.507059e+37 }
 0x7ee   :  { %v3813_v32 = vpop.eup %3812  ;;  %v1449_v55 = vmul.f32 %v5102_v1, %v5088_v19  ;;  %v1495_v47 = vsub.f32 1.0, %v1494_v57  ;;  %vm1454_vm1 = vweird.f32 %v5102_v1 }
 0x7ef   :  { %v5112_v50 = vpop.eup %3814  ;;  %v5117_v30 = vadd.f32 1.0, %v3813_v32  ;;  %3818 = vrcp.f32 %v5110_v22  ;;  %vm1455_vm7 = vmor %vm1453_vm11, %vm1454_vm1  ;;  %v1564_v58 = vand.u32 2147483648, %v5110_v22 }
 0x7f0   :  { %v1450_v61 = vsub.f32 1.0, %v1449_v55  ;;  %v5120_v20 = vpop.eup %3816  ;;  %v1496_v15 = vmul.f32 %v5094_v23, %v1495_v47  ;;  %v1464_v54 = vmul.f32 %v5112_v50, %v5092_v40  ;;  %vm1469_vm8 = vweird.f32 %v5112_v50 }
 0x7f1   :  { %3820 = vrcp.f32 %v5117_v30  ;;  %v1509_v13 = vmul.f32 %v5120_v20, %v5099_v37  ;;  %vm1514_vm11 = vweird.f32 %v5120_v20 }
 0x7f2   :  { %v1451_v12 = vmul.f32 %v5102_v1, %v1450_v61  ;;  %v1497_v25 = vadd.f32 %v5094_v23, %v1496_v15  ;;  %v1465_v11 = vsub.f32 1.0, %v1464_v54  ;;  %v1475_v61 = vor.u32 1.1754944e-38, %v1474_v0 }
 0x7f3   :  { %v1510_v9 = vsub.f32 1.0, %v1509_v13 }
 0x7f4   :  { %v1452_v49 = vadd.f32 %v5102_v1, %v1451_v12  ;;  %v1501_v2 = vsel %vm5138_vm10, %v5094_v23, %v1497_v25  ;;  %v1466_v28 = vmul.f32 %v5112_v50, %v1465_v11  ;;  %vm1468_vm10 = vweird.f32 %v5092_v40 }
 0x7f5   :  { %v5132_v59 = vpop.eup %3818  ;;  %v1511_v23 = vmul.f32 %v5120_v20, %v1510_v9  ;;  %vm1470_vm1 = vmor %vm1468_vm10, %vm1469_vm8  ;;  %v1549_v9 = vand.u32 2147483648, %v5117_v30 }
 0x7f6   :  { %v1554_v21 = vmul.f32 %v5132_v59, %v5110_v22  ;;  %v1467_v43 = vadd.f32 %v5112_v50, %v1466_v28  ;;  %v1547_v28 = vand.u32 2147483647, %v5117_v30 }
 0x7f7   :  { %v5144_v27 = vpop.eup %3820  ;;  %v1512_v14 = vadd.f32 %v5120_v20, %v1511_v23  ;;  %v1584_v23 = vrot.slane %v5017_v3, 7 }
 0x7f8   :  { %v1539_v60 = vmul.f32 %v5144_v27, %v5117_v30  ;;  %v1555_v19 = vsub.f32 1.0, %v1554_v21  ;;  %v1471_v47 = vsel %vm1470_vm1, %v5112_v50, %v1467_v43  ;;  %vm1558_vm1 = vweird.f32 %v5110_v22 }
 0x7fa   :  { %v1540_v55 = vsub.f32 1.0, %v1539_v60 }
 0x7fc   :  { %v1541_v50 = vmul.f32 %v5144_v27, %v1540_v55 }
 0x7fe   :  { %v1542_v10 = vadd.f32 %v5144_v27, %v1541_v50  ;;  %v1587_v50 = vrot.slane %v5042_v48, 7 }
 0x82b   :  { %v1621_v5 = vpop.permute.xlu2 %1620 }
 0x82c   :  { %v1642_v26 = vmul.f32 %v1621_v5, %v5096_v41  ;;  %v5154_v5 = vsel %vm1503_vm15, %v1505_v6, %v1501_v2  ;;  %vm1513_vm15 = vweird.f32 %v5099_v37  ;;  %v1565_v2 = vor.u32 1.1754944e-38, %v1564_v58 }
 0x82d   :  { %vm1515_vm8 = vmor %vm1513_vm15, %vm1514_vm11  ;;  %vm1544_vm15 = vweird.f32 %v5144_v27  ;;  %v1585_v58 = vrot.slane %v5013_v36, 7 }
 0x82e   :  { %1660 = vrot.lane.b32.xlu1 %v1642_v26, %s4292_s16  ;;  %v1456_v26 = vsel %vm1455_vm7, %v5102_v1, %v1452_v49  ;;  %v1472_v1 = vand.u32 2147483647, %v5092_v40  ;;  %v1517_v40 = vand.u32 2147483647, %v5099_v37  ;;  %v1516_v12 = vsel %vm1515_vm8, %v5120_v20, %v1512_v14 }
 0x82f   :  { %v5164_v33 = vsel %vm1458_vm9, %v1460_v8, %v1456_v26  ;;  %vm1559_vm9 = vweird.f32 %v5132_v59  ;;  %v1562_v20 = vand.u32 2147483647, %v5110_v22  ;;  %v1550_v8 = vor.u32 1.1754944e-38, %v1549_v9 }
 0x830   :  { %vm1473_vm7 = vcmp.eq.f32.partialorder %v1472_v1, 8.507059e+37  ;;  %vm1518_vm10 = vcmp.eq.f32.partialorder %v1517_v40, 8.507059e+37  ;;  %vm1560_vm11 = vmor %vm1558_vm1, %vm1559_vm9  ;;  %vm1548_vm9 = vcmp.eq.f32.partialorder %v1547_v28, 8.507059e+37 }
 0x831   :  { %v5178_v54 = vsel %vm1473_vm7, %v1475_v61, %v1471_v47  ;;  %vm1543_vm7 = vweird.f32 %v5117_v30  ;;  %vm1563_vm8 = vcmp.eq.f32.partialorder %v1562_v20, 8.507059e+37  ;;  %v1586_v30 = vrot.slane %v5007_v63, 7 }
 0x832   :  { %v1588_v63 = vrot.slane %v5024_v53, 7  ;;  %v1590_v53 = vrot.slane %v5029_v17, 7 }
 0x833   :  { %v1627_v45 = vpop.permute.xlu2 %1626  ;;  %v1602_v60 = vmul.f32 %v1586_v30, %v5096_v41 }
 0x834   :  { %v1645_v34 = vmul.f32 %v1627_v45, %v5114_v39  ;;  %v1519_v45 = vand.u32 2147483648, %v5099_v37 }
 0x836   :  { %1666 = vrot.lane.b32.xlu1 %v1645_v34, %s4292_s16  ;;  %v1556_v34 = vmul.f32 %v5132_v59, %v1555_v19  ;;  %v1520_v25 = vor.u32 1.1754944e-38, %v1519_v45 }
 0x838   :  { %v1557_v11 = vadd.f32 %v5132_v59, %v1556_v34  ;;  %v5186_v37 = vsel %vm1518_vm10, %v1520_v25, %v1516_v12  ;;  %vm1545_vm10 = vmor %vm1543_vm7, %vm1544_vm15 }
 0x839   :  { %v1546_v6 = vsel %vm1545_vm10, %v5144_v27, %v1542_v10  ;;  %v1591_v10 = vrot.slane %v5035_v16, 7 }
 0x83a   :  { %v1561_v49 = vsel %vm1560_vm11, %v5132_v59, %v1557_v11  ;;  %v5203_v59 = vsel %vm1548_vm9, %v1550_v8, %v1546_v6 }
 0x83b   :  { %v5199_v22 = vsel %vm1563_vm8, %v1565_v2, %v1561_v49 }
 0x83c   :  { %v1607_v49 = vmul.f32 %v1591_v10, %v5199_v22 }
 0x841   :  { %v1623_v4 = vpop.permute.xlu1 %1622 }
 0x842   :  { %v1643_v18 = vmul.f32 %v1623_v4, %v5154_v5 }
 0x844   :  { %v1617_v57 = vpop.permute.xlu0 %1616  ;;  %1662 = vrot.lane.b32.xlu0 %v1643_v18, %s4292_s16  ;;  %v1600_v18 = vmul.f32 %v1584_v23, %v5164_v33 }
 0x845   :  { %v1640_v32 = vmul.f32 %v1617_v57, %v5164_v33  ;;  %v1589_v57 = vrot.slane %v5048_v7, 7  ;;  %v1606_v7 = vmul.f32 %v1590_v53, %v5203_v59 }
 0x847   :  { %1656 = vrot.lane.b32.xlu2 %v1640_v32, %s4292_s16  ;;  %v1605_v3 = vmul.f32 %v1589_v57, %v5114_v39  ;;  %v1604_v32 = vmul.f32 %v1588_v63, %v5186_v37 }
 0x849   :  { %v1619_v15 = vpop.permute.xlu1 %1618 }
 0x84a   :  { %v1641_v13 = vmul.f32 %v1619_v15, %v5178_v54 }
 0x84c   :  { %v1625_v52 = vpop.permute.xlu0 %1624  ;;  %1658 = vrot.lane.b32.xlu0 %v1641_v13, %s4292_s16  ;;  %v1603_v13 = vmul.f32 %v1587_v50, %v5154_v5 }
 0x84d   :  { %v1644_v35 = vmul.f32 %v1625_v52, %v5186_v37  ;;  %v1601_v52 = vmul.f32 %v1585_v58, %v5178_v54 }
 0x84f   :  { %1664 = vrot.lane.b32.xlu2 %v1644_v35, %s4292_s16 }
 0x851   :  { %v1631_v21 = vpop.permute.xlu1 %1630 }
 0x852   :  { %v1647_v42 = vmul.f32 %v1631_v21, %v5199_v22 }
 0x854   :  { %v1629_v4 = vpop.permute.xlu0 %1628  ;;  %1670 = vrot.lane.b32.xlu0 %v1647_v42, %s4292_s16 }
 0x855   :  { %v1646_v26 = vmul.f32 %v1629_v4, %v5203_v59 }
 0x857   :  { %1668 = vrot.lane.b32.xlu2 %v1646_v26, %s4292_s16 }
 0x8a0   :  { %v1661_v27 = vpop.permute.xlu1 %1660 }
 0x8a1   :  { %v5212_v43 = vadd.f32 %v1661_v27, %v1602_v60  ;;  %v1657_v19 = vpop.permute.xlu2 %1656 }
 0x8a2   :  { %v5214_v0 = vadd.f32 %v1657_v19, %v1600_v18 }
 0x8a3   :  { %3822 = vtanh.f32 %v5212_v43 }
 0x8a4   :  { %3824 = vtanh.f32 %v5214_v0 }
 0x8a8   :  { %v1667_v1 = vpop.permute.xlu1 %1666 }
 0x8a9   :  { %v3823_v14 = vpop.eup %3822  ;;  %v5222_v55 = vadd.f32 %v1667_v1, %v1605_v3  ;;  %v1665_v47 = vpop.permute.xlu2 %1664 }
 0x8aa   :  { %v3825_v45 = vpop.eup %3824  ;;  %v5224_v34 = vadd.f32 %v1665_v47, %v1604_v32  ;;  %1708 = vrot.lane.b32.xlu0 %v3823_v14, %s4291_s3 }
 0x8ab   :  { %3826 = vtanh.f32 %v5222_v55  ;;  %1704 = vrot.lane.b32.xlu1 %v3825_v45, %s4291_s3 }
 0x8ac   :  { %3828 = vtanh.f32 %v5224_v34 }
 0x8b1   :  { %v3827_v61 = vpop.eup %3826  ;;  %v1669_v40 = vpop.permute.xlu2 %1668 }
 0x8b2   :  { %v3829_v15 = vpop.eup %3828  ;;  %v5232_v12 = vadd.f32 %v1669_v40, %v1606_v7  ;;  %1714 = vrot.lane.b32.xlu0 %v3827_v61, %s4291_s3 }
 0x8b3   :  { %1712 = vrot.lane.b32.xlu1 %v3829_v15, %s4291_s3 }
 0x8b4   :  { %3830 = vtanh.f32 %v5232_v12 }
 0x8b6   :  { %v1663_v25 = vpop.permute.xlu0 %1662 }
 0x8b7   :  { %v5239_v11 = vadd.f32 %v1663_v25, %v1603_v13 }
 0x8b9   :  { %3832 = vtanh.f32 %v5239_v11 }
 0x8ba   :  { %v3831_v17 = vpop.eup %3830 }
 0x8bb   :  { %1716 = vrot.lane.b32.xlu1 %v3831_v17, %s4291_s3 }
 0x8be   :  { %v1659_v20 = vpop.permute.xlu0 %1658 }
 0x8bf   :  { %v3833_v48 = vpop.eup %3832  ;;  %v5245_v35 = vadd.f32 %v1659_v20, %v1601_v52 }
 0x8c0   :  { %1710 = vrot.lane.b32.xlu2 %v3833_v48, %s4291_s3 }
 0x8c1   :  { %3834 = vtanh.f32 %v5245_v35 }
 0x8c6   :  { %v1671_v9 = vpop.permute.xlu0 %1670 }
 0x8c7   :  { %v3835_v2 = vpop.eup %3834  ;;  %v5251_v28 = vadd.f32 %v1671_v9, %v1607_v49 }
 0x8c8   :  { %1706 = vrot.lane.b32.xlu2 %v3835_v2, %s4291_s3 }
 0x8c9   :  { %3836 = vtanh.f32 %v5251_v28 }
 0x8cf   :  { %v3837_v36 = vpop.eup %3836 }
 0x8d0   :  { %1718 = vrot.lane.b32.xlu2 %v3837_v36, %s4291_s3 }
 0x91a   :  { %v1711_v21 = vpop.permute.xlu2 %1710 }
 0x91b   :  { %v1731_v3 = vmul.f32 %v1711_v21, %v5154_v5 }
 0x91c   :  { %v1709_v42 = vpop.permute.xlu0 %1708 }
 0x91d   :  { %v1705_v6 = vpop.permute.xlu1 %1704  ;;  %v1730_v16 = vmul.f32 %v1709_v42, %v5096_v41 }
 0x91e   :  { %v1728_v8 = vmul.f32 %v1705_v6, %v5164_v33 }
 0x91f   :  { %v1747_v27 = vrot.slane %v1730_v16, 1 }
 0x920   :  { %v1744_v30 = vrot.slane %v1728_v8, 3 }
 0x922   :  { %v1707_v4 = vpop.permute.xlu2 %1706 }
 0x923   :  { %v1729_v26 = vmul.f32 %v1707_v4, %v5178_v54 }
 0x924   :  { %v1715_v63 = vpop.permute.xlu0 %1714 }
 0x925   :  { %v1745_v23 = vrot.slane %v1729_v26, 2  ;;  %v1713_v60 = vpop.permute.xlu1 %1712  ;;  %v1733_v41 = vmul.f32 %v1715_v63, %v5114_v39 }
 0x926   :  { %v1732_v18 = vmul.f32 %v1713_v60, %v5186_v37 }
 0x927   :  { %v1746_v19 = vsel %vm568_vm2, %v1745_v23, %v1744_v30  ;;  %v1752_v45 = vrot.slane %v1733_v41, 6 }
 0x928   :  { %v1748_v57 = vsel %vm571_vm3, %v1747_v27, %v1746_v19  ;;  %v1750_v1 = vrot.slane %v1732_v18, 7 }
 0x929   :  { %v1749_v32 = vsel %vm574_vm4, %v1731_v3, %v1748_v57 }
 0x92a   :  { %v1719_v33 = vpop.permute.xlu2 %1718  ;;  %v1751_v47 = vsel %vm577_vm5, %v1750_v1, %v1749_v32 }
 0x92b   :  { %v1735_v54 = vmul.f32 %v1719_v33, %v5199_v22  ;;  %v1753_v61 = vsel %vm580_vm6, %v1752_v45, %v1751_v47 }
 0x92d   :  { %v1717_v14 = vpop.permute.xlu1 %1716  ;;  %v1756_v7 = vrot.slane %v1735_v54, 4 }
 0x92e   :  { %v1734_v37 = vmul.f32 %v1717_v14, %v5203_v59 }
 0x930   :  { %v1754_v53 = vrot.slane %v1734_v37, 5 }
 0x932   :  { %v1755_v5 = vsel %vm583_vm12, %v1754_v53, %v1753_v61 }
 0x933   :  { %v1757_v40 = vsel %vm586_vm13, %v1756_v7, %v1755_v5 }
 0x934   :  { %1758 = vrot.lane.b32.xlu0 %v1757_v40, %s4292_s16 }
 0x9a6   :  { %v1759_v39 = vpop.permute.xlu0 %1758 }
 0x9a7   :  { %3521 = vmatmul.msk.f32.vlgmr.msrb.gmra.mxu2 %vm215_vm14, %v1759_v39 }
 0xa2a   :  { %v1779_v22 = vpop.f32.mrf.mxu2 }
 0xa2b   :  { %v1785_v15 = vrot.slane %v1779_v22, 6  ;;  %v1784_v50 = vrot.slane %v1779_v22, 5  ;;  %v1783_v13 = vrot.slane %v1779_v22, 4  ;;  %v1787_v58 = vrot.slane %v1779_v22, 1 }
 0xa2c   :  { %v1786_v52 = vrot.slane %v1779_v22, 7  ;;  %v1802_v20 = vadd.f32 %v1779_v22, %v4459_v56  ;;  %v1789_v36 = vrot.slane %v1779_v22, 3  ;;  %v1788_v21 = vrot.slane %v1779_v22, 2 }
 0xa2d   :  { %v1800_v59 = vadd.f32 %v1785_v15, %v4444_v38  ;;  %v1799_v25 = vadd.f32 %v1784_v50, %v4440_v31  ;;  %v1798_v17 = vadd.f32 %v1783_v13, %v4438_v29  ;;  %v1803_v48 = vadd.f32 %v1787_v58, %v4464_v62 }
 0xa2e   :  { %v1801_v49 = vadd.f32 %v1786_v52, %v4451_v46  ;;  %v1805_v6 = vadd.f32 %v1789_v36, %v4454_v51  ;;  %v1804_v8 = vadd.f32 %v1788_v21, %v4449_v44  ;;  %v3526_v37 = vmul.f32 -1.442695, %v1802_v20 }
 0xa2f   :  { %3838 = vtanh.f32 %v1800_v59  ;;  %v3523_v23 = vmul.f32 -1.442695, %v1799_v25  ;;  %v3527_v60 = vmul.f32 -1.442695, %v1803_v48  ;;  %v3524_v1 = vmul.f32 -1.442695, %v1800_v59 }
 0xa30   :  { %3840 = vtanh.f32 %v1799_v25  ;;  %v3529_v19 = vmul.f32 -1.442695, %v1805_v6  ;;  %v3522_v33 = vmul.f32 -1.442695, %v1798_v17  ;;  %v3525_v53 = vmul.f32 -1.442695, %v1801_v49 }
 0xa31   :  { %3842 = vtanh.f32 %v1798_v17  ;;  %v3528_v17 = vmul.f32 -1.442695, %v1804_v8 }
 0xa32   :  { %3844 = vtanh.f32 %v1802_v20 }
 0xa33   :  { %3846 = vtanh.f32 %v1803_v48 }
 0xa34   :  { %3848 = vtanh.f32 %v1801_v49 }
 0xa35   :  { %v3839_v10 = vpop.eup %3838  ;;  %3850 = vtanh.f32 %v1805_v6 }
 0xa36   :  { %v3841_v9 = vpop.eup %3840  ;;  %2010 = vrot.lane.b32.xlu0 %v3839_v10, %s4291_s3  ;;  %3852 = vtanh.f32 %v1804_v8 }
 0xa37   :  { %v3843_v2 = vpop.eup %3842  ;;  %2008 = vrot.lane.b32.xlu2 %v3841_v9, %s4291_s3  ;;  %3854 = vpow2.f32 %v3523_v23 }
 0xa38   :  { %2006 = vrot.lane.b32.xlu1 %v3843_v2, %s4291_s3  ;;  %v3845_v42 = vpop.eup %3844  ;;  %3856 = vpow2.f32 %v3527_v60 }
 0xa39   :  { %v3847_v16 = vpop.eup %3846 }
 0xa3a   :  { %v3849_v4 = vpop.eup %3848 }
 0xa3b   :  { %v3851_v26 = vpop.eup %3850 }
 0xa3c   :  { %v3853_v30 = vpop.eup %3852 }
 0xa3d   :  { %v3855_v27 = vpop.eup %3854 }
 0xa3e   :  { %2014 = vrot.lane.b32.xlu0 %v3845_v42, %s4291_s3  ;;  %v1831_v18 = vadd.f32 1.0, %v3855_v27  ;;  %v3857_v57 = vpop.eup %3856 }
 0xa3f   :  { %2016 = vrot.lane.b32.xlu2 %v3847_v16, %s4291_s3  ;;  %v5289_v63 = vadd.f32 1.0, %v3857_v57 }
 0xa40   :  { %2012 = vrot.lane.b32.xlu1 %v3849_v4, %s4291_s3  ;;  %3858 = vrcp.f32 %v1831_v18  ;;  %v1864_v13 = vand.u32 2147483648, %v1831_v18  ;;  %vm1858_vm11 = vweird.f32 %v1831_v18  ;;  %v1862_v59 = vand.u32 2147483647, %v1831_v18 }
 0xa41   :  { %3860 = vpow2.f32 %v3529_v19  ;;  %v1924_v16 = vand.u32 2147483648, %v5289_v63  ;;  %vm1918_vm10 = vweird.f32 %v5289_v63 }
 0xa42   :  { %3862 = vrcp.f32 %v5289_v63  ;;  %v1865_v10 = vor.u32 1.1754944e-38, %v1864_v13  ;;  %vm1863_vm7 = vcmp.eq.f32.partialorder %v1862_v59, 8.507059e+37 }
 0xa43   :  { %3864 = vpow2.f32 %v3524_v1 }
 0xa44   :  { %3866 = vpow2.f32 %v3522_v33 }
 0xa46   :  { %v3859_v3 = vpop.eup %3858 }
 0xa47   :  { %2020 = vrot.lane.b32.xlu2 %v3851_v26, %s4291_s3  ;;  %v3861_v41 = vpop.eup %3860  ;;  %v1854_v32 = vmul.f32 %v3859_v3, %v1831_v18  ;;  %vm1859_vm1 = vweird.f32 %v3859_v3  ;;  %v1922_v26 = vand.u32 2147483647, %v5289_v63  ;;  %v1925_v18 = vor.u32 1.1754944e-38, %v1924_v16 }
 0xa48   :  { %2018 = vrot.lane.b32.xlu1 %v3853_v30, %s4291_s3  ;;  %v5292_v54 = vadd.f32 1.0, %v3861_v41  ;;  %v3863_v47 = vpop.eup %3862  ;;  %vm1860_vm15 = vmor %vm1858_vm11, %vm1859_vm1 }
 0xa49   :  { %v1855_v14 = vsub.f32 1.0, %v1854_v32  ;;  %v3865_v45 = vpop.eup %3864  ;;  %v1914_v61 = vmul.f32 %v3863_v47, %v5289_v63  ;;  %vm1919_vm8 = vweird.f32 %v3863_v47  ;;  %vm1923_vm1 = vcmp.eq.f32.partialorder %v1922_v26, 8.507059e+37 }
 0xa4a   :  { %3868 = vrcp.f32 %v5292_v54  ;;  %v3867_v5 = vpop.eup %3866  ;;  %v5296_v40 = vadd.f32 1.0, %v3865_v45  ;;  %vm1920_vm9 = vmor %vm1918_vm10, %vm1919_vm8  ;;  %v1952_v45 = vand.u32 2147483647, %v5292_v54 }
 0xa4b   :  { %v1856_v7 = vmul.f32 %v3859_v3, %v1855_v14  ;;  %3870 = vpow2.f32 %v3526_v37  ;;  %v1915_v22 = vsub.f32 1.0, %v1914_v61  ;;  %v5298_v15 = vadd.f32 1.0, %v3867_v5 }
 0xa4c   :  { %3872 = vpow2.f32 %v3525_v53  ;;  %v1954_v14 = vand.u32 2147483648, %v5292_v54  ;;  %vm1953_vm8 = vcmp.eq.f32.partialorder %v1952_v45, 8.507059e+37 }
 0xa4d   :  { %v1857_v39 = vadd.f32 %v3859_v3, %v1856_v7  ;;  %3874 = vrcp.f32 %v5296_v40  ;;  %v1916_v52 = vmul.f32 %v3863_v47, %v1915_v22 }
 0xa4e   :  { %3876 = vrcp.f32 %v5298_v15  ;;  %v1955_v5 = vor.u32 1.1754944e-38, %v1954_v14 }
 0xa4f   :  { %v1861_v58 = vsel %vm1860_vm15, %v3859_v3, %v1857_v39  ;;  %3878 = vpow2.f32 %v3528_v17  ;;  %v1917_v6 = vadd.f32 %v3863_v47, %v1916_v52  ;;  %vm1948_vm15 = vweird.f32 %v5292_v54 }
 0xa50   :  { %v5300_v50 = vpop.eup %3868  ;;  %v5308_v2 = vsel %vm1863_vm7, %v1865_v10, %v1861_v58  ;;  %v1877_v58 = vand.u32 2147483647, %v5296_v40  ;;  %v1849_v10 = vand.u32 2147483648, %v5298_v15 }
 0xa51   :  { %v3871_v25 = vpop.eup %3870  ;;  %v1944_v20 = vmul.f32 %v5300_v50, %v5292_v54  ;;  %v1921_v23 = vsel %vm1920_vm9, %v3863_v47, %v1917_v6  ;;  %vm1949_vm11 = vweird.f32 %v5300_v50  ;;  %vm1873_vm9 = vweird.f32 %v5296_v40 }
 0xa52   :  { %v3873_v48 = vpop.eup %3872  ;;  %v5306_v49 = vadd.f32 1.0, %v3871_v25  ;;  %v5328_v57 = vsel %vm1923_vm1, %v1925_v18, %v1921_v23  ;;  %vm1950_vm7 = vmor %vm1948_vm15, %vm1949_vm11  ;;  %vm1843_vm15 = vweird.f32 %v5298_v15 }
 0xa53   :  { %v5310_v36 = vpop.eup %3874  ;;  %v1945_v42 = vsub.f32 1.0, %v1944_v20  ;;  %v5313_v8 = vadd.f32 1.0, %v3873_v48 }
 0xa54   :  { %v5316_v4 = vpop.eup %3876  ;;  %3880 = vrcp.f32 %v5306_v49  ;;  %v1869_v30 = vmul.f32 %v5310_v36, %v5296_v40  ;;  %vm1874_vm10 = vweird.f32 %v5310_v36 }
 0xa55   :  { %v1946_v60 = vmul.f32 %v5300_v50, %v1945_v42  ;;  %3882 = vrcp.f32 %v5313_v8  ;;  %v3879_v27 = vpop.eup %3878  ;;  %v1839_v19 = vmul.f32 %v5316_v4, %v5298_v15  ;;  %vm1844_vm1 = vweird.f32 %v5316_v4  ;;  %vm1875_vm11 = vmor %vm1873_vm9, %vm1874_vm10 }
 0xa56   :  { %v1870_v3 = vsub.f32 1.0, %v1869_v30  ;;  %v5335_v32 = vadd.f32 1.0, %v3879_v27 }
 0xa57   :  { %v1947_v41 = vadd.f32 %v5300_v50, %v1946_v60  ;;  %v1840_v47 = vsub.f32 1.0, %v1839_v19  ;;  %v1909_v19 = vand.u32 2147483648, %v5306_v49 }
 0xa58   :  { %v1871_v53 = vmul.f32 %v5310_v36, %v1870_v3  ;;  %3884 = vrcp.f32 %v5335_v32 }
 0xa59   :  { %v1951_v61 = vsel %vm1950_vm7, %v5300_v50, %v1947_v41  ;;  %v1841_v39 = vmul.f32 %v5316_v4, %v1840_v47  ;;  %v1879_v50 = vand.u32 2147483648, %v5296_v40  ;;  %vm1845_vm7 = vmor %vm1843_vm15, %vm1844_vm1  ;;  %vm1903_vm1 = vweird.f32 %v5306_v49 }
 0xa5a   :  { %v5330_v1 = vpop.eup %3880  ;;  %v5351_v13 = vsel %vm1953_vm8, %v1955_v5, %v1951_v61  ;;  %v1872_v59 = vadd.f32 %v5310_v36, %v1871_v53  ;;  %vm1878_vm8 = vcmp.eq.f32.partialorder %v1877_v58, 8.507059e+37  ;;  %v1894_v41 = vand.u32 2147483648, %v5313_v8 }
 0xa5b   :  { %v5338_v37 = vpop.eup %3882  ;;  %v1899_v7 = vmul.f32 %v5330_v1, %v5306_v49  ;;  %v1842_v52 = vadd.f32 %v5316_v4, %v1841_v39  ;;  %v1880_v6 = vor.u32 1.1754944e-38, %v1879_v50  ;;  %vm1904_vm9 = vweird.f32 %v5330_v1 }
 0xa5c   :  { %v1884_v22 = vmul.f32 %v5338_v37, %v5313_v8  ;;  %vm1905_vm15 = vmor %vm1903_vm1, %vm1904_vm9  ;;  %v1910_v47 = vor.u32 1.1754944e-38, %v1909_v19  ;;  %v1895_v5 = vor.u32 1.1754944e-38, %v1894_v41 }
 0xa5d   :  { %v1900_v25 = vsub.f32 1.0, %v1899_v7  ;;  %v1846_v42 = vsel %vm1845_vm7, %v5316_v4, %v1842_v52  ;;  %v1907_v4 = vand.u32 2147483647, %v5306_v49  ;;  %vm1888_vm7 = vweird.f32 %v5313_v8 }
 0xa5e   :  { %v1885_v20 = vsub.f32 1.0, %v1884_v22  ;;  %v5361_v48 = vpop.eup %3884  ;;  %v1892_v49 = vand.u32 2147483647, %v5313_v8 }
 0xa5f   :  { %v1901_v40 = vmul.f32 %v5330_v1, %v1900_v25  ;;  %v1929_v26 = vmul.f32 %v5361_v48, %v5335_v32  ;;  %vm1934_vm1 = vweird.f32 %v5361_v48 }
 0xa60   :  { %v1886_v16 = vmul.f32 %v5338_v37, %v1885_v20  ;;  %vm1893_vm9 = vcmp.eq.f32.partialorder %v1892_v49, 8.507059e+37  ;;  %v1976_v20 = vrot.slane %v5212_v43, 7  ;;  %v1979_v43 = vrot.slane %v5222_v55, 7 }
 0xa61   :  { %v1981_v55 = vrot.slane %v5251_v28, 7 }
 0xa62   :  { %v1887_v3 = vadd.f32 %v5338_v37, %v1886_v16 }
 0xa91   :  { %v2009_v9 = vpop.permute.xlu2 %2008 }
 0xa92   :  { %v2031_v21 = vmul.f32 %v2009_v9, %v5308_v2  ;;  %v1876_v9 = vsel %vm1875_vm11, %v5310_v36, %v1872_v59  ;;  %v1850_v36 = vor.u32 1.1754944e-38, %v1849_v10  ;;  %vm1889_vm11 = vweird.f32 %v5338_v37 }
 0xa93   :  { %v5373_v23 = vsel %vm1878_vm8, %v1880_v6, %v1876_v9  ;;  %vm1890_vm8 = vmor %vm1888_vm7, %vm1889_vm11  ;;  %vm1933_vm11 = vweird.f32 %v5335_v32  ;;  %v1937_v59 = vand.u32 2147483647, %v5335_v32  ;;  %v1975_v10 = vrot.slane %v5245_v35, 7 }
 0xa94   :  { %2048 = vrot.lane.b32.xlu1 %v2031_v21, %s4292_s16  ;;  %v1847_v21 = vand.u32 2147483647, %v5298_v15  ;;  %v1902_v15 = vadd.f32 %v5330_v1, %v1901_v40  ;;  %v1891_v45 = vsel %vm1890_vm8, %v5338_v37, %v1887_v3  ;;  %v1939_v37 = vand.u32 2147483648, %v5335_v32 }
 0xa95   :  { %v5397_v22 = vsel %vm1893_vm9, %v1895_v5, %v1891_v45  ;;  %vm1938_vm7 = vcmp.eq.f32.partialorder %v1937_v59, 8.507059e+37  ;;  %v1992_v9 = vmul.f32 %v1976_v20, %v5373_v23  ;;  %v1991_v32 = vmul.f32 %v1975_v10, %v5308_v2 }
 0xa96   :  { %vm1848_vm10 = vcmp.eq.f32.partialorder %v1847_v21, 8.507059e+37  ;;  %v1906_v14 = vsel %vm1905_vm15, %v5330_v1, %v1902_v15  ;;  %vm1935_vm15 = vmor %vm1933_vm11, %vm1934_vm1 }
 0xa97   :  { %v5378_v18 = vsel %vm1848_vm10, %v1850_v36, %v1846_v42  ;;  %vm1908_vm10 = vcmp.eq.f32.partialorder %v1907_v4, 8.507059e+37  ;;  %v1978_v42 = vrot.slane %v5224_v34, 7  ;;  %v1997_v34 = vmul.f32 %v1981_v55, %v5351_v13 }
 0xa98   :  { %v5394_v7 = vsel %vm1908_vm10, %v1910_v47, %v1906_v14  ;;  %v1977_v47 = vrot.slane %v5239_v11, 7 }
 0xa99   :  { %v2017_v63 = vpop.permute.xlu2 %2016  ;;  %v1994_v35 = vmul.f32 %v1978_v42, %v5394_v7 }
 0xa9a   :  { %v2035_v33 = vmul.f32 %v2017_v63, %v5328_v57  ;;  %v1993_v45 = vmul.f32 %v1977_v47, %v5397_v22 }
 0xa9c   :  { %2056 = vrot.lane.b32.xlu1 %v2035_v33, %s4292_s16  ;;  %v1930_v33 = vsub.f32 1.0, %v1929_v26  ;;  %v1995_v26 = vmul.f32 %v1979_v43, %v5328_v57 }
 0xa9e   :  { %v1931_v53 = vmul.f32 %v5361_v48, %v1930_v33  ;;  %v1974_v33 = vrot.slane %v5214_v0, 7  ;;  %v1980_v0 = vrot.slane %v5232_v12, 7 }
 0xaa0   :  { %v1932_v8 = vadd.f32 %v5361_v48, %v1931_v53  ;;  %v1990_v41 = vmul.f32 %v1974_v33, %v5378_v18 }
 0xaa1   :  { %v2021_v54 = vpop.permute.xlu2 %2020 }
 0xaa2   :  { %v2037_v17 = vmul.f32 %v2021_v54, %v5351_v13  ;;  %v1936_v25 = vsel %vm1935_vm15, %v5361_v48, %v1932_v8 }
 0xaa4   :  { %2060 = vrot.lane.b32.xlu1 %v2037_v17, %s4292_s16  ;;  %v1940_v17 = vor.u32 1.1754944e-38, %v1939_v37 }
 0xaa6   :  { %v5408_v50 = vsel %vm1938_vm7, %v1940_v17, %v1936_v25 }
 0xaa8   :  { %v2011_v30 = vpop.permute.xlu0 %2010 }
 0xaa9   :  { %v2032_v60 = vmul.f32 %v2011_v30, %v5373_v23 }
 0xaaa   :  { %v2007_v27 = vpop.permute.xlu1 %2006 }
 0xaab   :  { %v2030_v63 = vmul.f32 %v2007_v27, %v5378_v18  ;;  %2050 = vrot.lane.b32.xlu2 %v2032_v60, %s4292_s16 }
 0xaad   :  { %2046 = vrot.lane.b32.xlu0 %v2030_v63, %s4292_s16 }
 0xab0   :  { %v2015_v61 = vpop.permute.xlu0 %2014 }
 0xab1   :  { %v2034_v39 = vmul.f32 %v2015_v61, %v5394_v7 }
 0xab2   :  { %v2013_v1 = vpop.permute.xlu1 %2012 }
 0xab3   :  { %v2033_v54 = vmul.f32 %v2013_v1, %v5397_v22  ;;  %2054 = vrot.lane.b32.xlu2 %v2034_v39, %s4292_s16  ;;  %v1996_v39 = vmul.f32 %v1980_v0, %v5408_v50 }
 0xab5   :  { %2052 = vrot.lane.b32.xlu0 %v2033_v54, %s4292_s16 }
 0xaba   :  { %v2019_v58 = vpop.permute.xlu1 %2018 }
 0xabb   :  { %v2036_v52 = vmul.f32 %v2019_v58, %v5408_v50 }
 0xabd   :  { %2058 = vrot.lane.b32.xlu0 %v2036_v52, %s4292_s16 }
 0xb05   :  { %v2051_v21 = vpop.permute.xlu2 %2050 }
 0xb06   :  { %v5416_v40 = vadd.f32 %v2051_v21, %v1992_v9  ;;  %v2049_v48 = vpop.permute.xlu1 %2048 }
 0xb07   :  { %v5418_v6 = vadd.f32 %v2049_v48, %v1991_v32 }
 0xb08   :  { %3886 = vtanh.f32 %v5416_v40 }
 0xb09   :  { %3888 = vtanh.f32 %v5418_v6 }
 0xb0d   :  { %v2055_v16 = vpop.permute.xlu2 %2054 }
 0xb0e   :  { %v3887_v30 = vpop.eup %3886  ;;  %v5426_v36 = vadd.f32 %v2055_v16, %v1994_v35  ;;  %v2057_v60 = vpop.permute.xlu1 %2056 }
 0xb0f   :  { %v3889_v15 = vpop.eup %3888  ;;  %v5428_v27 = vadd.f32 %v2057_v60, %v1995_v26  ;;  %2098 = vrot.lane.b32.xlu1 %v3887_v30, %s4291_s3 }
 0xb10   :  { %3890 = vtanh.f32 %v5426_v36  ;;  %2096 = vrot.lane.b32.xlu0 %v3889_v15, %s4291_s3 }
 0xb11   :  { %3892 = vtanh.f32 %v5428_v27 }
 0xb16   :  { %v3891_v4 = vpop.eup %3890  ;;  %v2061_v19 = vpop.permute.xlu1 %2060 }
 0xb17   :  { %v3893_v63 = vpop.eup %3892  ;;  %v5436_v3 = vadd.f32 %v2061_v19, %v1997_v34  ;;  %2102 = vrot.lane.b32.xlu1 %v3891_v4, %s4291_s3 }
 0xb18   :  { %2104 = vrot.lane.b32.xlu0 %v3893_v63, %s4291_s3 }
 0xb19   :  { %3894 = vtanh.f32 %v5436_v3 }
 0xb1f   :  { %v3895_v14 = vpop.eup %3894  ;;  %v2047_v49 = vpop.permute.xlu0 %2046 }
 0xb20   :  { %v5443_v28 = vadd.f32 %v2047_v49, %v1990_v41  ;;  %2108 = vrot.lane.b32.xlu0 %v3895_v14, %s4291_s3 }
 0xb22   :  { %3896 = vtanh.f32 %v5443_v28 }
 0xb27   :  { %v2053_v53 = vpop.permute.xlu0 %2052 }
 0xb28   :  { %v3897_v61 = vpop.eup %3896  ;;  %v5449_v5 = vadd.f32 %v2053_v53, %v1993_v45 }
 0xb29   :  { %2094 = vrot.lane.b32.xlu2 %v3897_v61, %s4291_s3 }
 0xb2a   :  { %3898 = vtanh.f32 %v5449_v5 }
 0xb2f   :  { %v2059_v1 = vpop.permute.xlu0 %2058 }
 0xb30   :  { %v3899_v54 = vpop.eup %3898  ;;  %v5455_v8 = vadd.f32 %v2059_v1, %v1996_v39 }
 0xb31   :  { %2100 = vrot.lane.b32.xlu2 %v3899_v54, %s4291_s3 }
 0xb32   :  { %3900 = vtanh.f32 %v5455_v8 }
 0xb38   :  { %v3901_v11 = vpop.eup %3900 }
 0xb39   :  { %2106 = vrot.lane.b32.xlu2 %v3901_v11, %s4291_s3 }
 0xb81   :  { %v2099_v25 = vpop.permute.xlu1 %2098 }
 0xb82   :  { %v2097_v37 = vpop.permute.xlu0 %2096  ;;  %v2120_v58 = vmul.f32 %v2099_v25, %v5373_v23 }
 0xb83   :  { %v2095_v59 = vpop.permute.xlu2 %2094  ;;  %v2119_v17 = vmul.f32 %v2097_v37, %v5308_v2 }
 0xb84   :  { %v2118_v12 = vmul.f32 %v2095_v59, %v5378_v18  ;;  %v2137_v21 = vrot.slane %v2120_v58, 2 }
 0xb85   :  { %v2135_v52 = vrot.slane %v2119_v17, 3 }
 0xb86   :  { %v2134_v20 = vrot.slane %v2118_v12, 4 }
 0xb88   :  { %v2136_v48 = vsel %vm568_vm2, %v2135_v52, %v2134_v20 }
 0xb89   :  { %v2103_v43 = vpop.permute.xlu1 %2102  ;;  %v2138_v35 = vsel %vm571_vm3, %v2137_v21, %v2136_v48 }
 0xb8a   :  { %v2105_v10 = vpop.permute.xlu0 %2104  ;;  %v2122_v18 = vmul.f32 %v2103_v43, %v5394_v7 }
 0xb8b   :  { %v2101_v9 = vpop.permute.xlu2 %2100  ;;  %v2123_v16 = vmul.f32 %v2105_v10, %v5328_v57 }
 0xb8c   :  { %v2121_v32 = vmul.f32 %v2101_v9, %v5397_v22 }
 0xb8d   :  { %v2142_v15 = vrot.slane %v2123_v16, 7 }
 0xb8e   :  { %v2139_v42 = vrot.slane %v2121_v32, 1 }
 0xb90   :  { %v2140_v2 = vsel %vm574_vm4, %v2139_v42, %v2138_v35 }
 0xb91   :  { %v2141_v60 = vsel %vm577_vm5, %v2122_v18, %v2140_v2 }
 0xb92   :  { %v2109_v23 = vpop.permute.xlu0 %2108  ;;  %v2143_v4 = vsel %vm580_vm6, %v2142_v15, %v2141_v60 }
 0xb93   :  { %v2125_v26 = vmul.f32 %v2109_v23, %v5351_v13  ;;  %v2107_v30 = vpop.permute.xlu2 %2106 }
 0xb94   :  { %v2124_v22 = vmul.f32 %v2107_v30, %v5408_v50 }
 0xb95   :  { %v2146_v55 = vrot.slane %v2125_v26, 5 }
 0xb96   :  { %v2144_v34 = vrot.slane %v2124_v22, 6 }
 0xb98   :  { %v2145_v19 = vsel %vm583_vm12, %v2144_v34, %v2143_v4 }
 0xb99   :  { %v2147_v57 = vsel %vm586_vm13, %v2146_v55, %v2145_v19 }
 0xb9a   :  { %2148 = vrot.lane.b32.xlu1 %v2147_v57, %s4292_s16 }
 0xc0c   :  { %v2149_v7 = vpop.permute.xlu1 %2148 }
 0xc0d   :  { %3530 = vmatmul.msk.f32.vlgmr.msra.gmra.mxu3 %vm215_vm14, %v2149_v7 }
 0xc90   :  { %v2169_v13 = vpop.f32.mrf.mxu3 }
 0xc91   :  { %v2175_v63 = vrot.slane %v2169_v13, 5  ;;  %v2174_v33 = vrot.slane %v2169_v13, 4  ;;  %v2173_v41 = vrot.slane %v2169_v13, 3  ;;  %v2178_v47 = vrot.slane %v2169_v13, 1 }
 0xc92   :  { %v2177_v45 = vrot.slane %v2169_v13, 7  ;;  %v2176_v53 = vrot.slane %v2169_v13, 6  ;;  %v2179_v37 = vrot.slane %v2169_v13, 2  ;;  %v2193_v17 = vadd.f32 %v2169_v13, %v4464_v62 }
 0xc93   :  { %v2190_v50 = vadd.f32 %v2175_v63, %v4444_v38  ;;  %v2189_v14 = vadd.f32 %v2174_v33, %v4440_v31  ;;  %v2188_v49 = vadd.f32 %v2173_v41, %v4438_v29  ;;  %v2194_v61 = vadd.f32 %v2178_v47, %v4449_v44 }
 0xc94   :  { %v2192_v0 = vadd.f32 %v2177_v45, %v4459_v56  ;;  %v2191_v1 = vadd.f32 %v2176_v53, %v4451_v46  ;;  %v2195_v59 = vadd.f32 %v2179_v37, %v4454_v51  ;;  %v3536_v48 = vmul.f32 -1.442695, %v2193_v17 }
 0xc95   :  { %3902 = vtanh.f32 %v2190_v50  ;;  %v3531_v10 = vmul.f32 -1.442695, %v2188_v49  ;;  %v3533_v35 = vmul.f32 -1.442695, %v2190_v50  ;;  %v3532_v2 = vmul.f32 -1.442695, %v2189_v14 }
 0xc96   :  { %3904 = vtanh.f32 %v2189_v14  ;;  %v3534_v9 = vmul.f32 -1.442695, %v2191_v1  ;;  %v3537_v30 = vmul.f32 -1.442695, %v2194_v61  ;;  %v3535_v15 = vmul.f32 -1.442695, %v2192_v0 }
 0xc97   :  { %3906 = vtanh.f32 %v2188_v49  ;;  %v3538_v41 = vmul.f32 -1.442695, %v2195_v59 }
 0xc98   :  { %3908 = vtanh.f32 %v2194_v61 }
 0xc99   :  { %3910 = vtanh.f32 %v2192_v0 }
 0xc9a   :  { %3912 = vtanh.f32 %v2191_v1 }
 0xc9b   :  { %v3903_v39 = vpop.eup %3902  ;;  %3914 = vtanh.f32 %v2195_v59 }
 0xc9c   :  { %v3905_v54 = vpop.eup %3904  ;;  %2400 = vrot.lane.b32.xlu1 %v3903_v39, %s4291_s3  ;;  %3916 = vtanh.f32 %v2193_v17 }
 0xc9d   :  { %v3907_v11 = vpop.eup %3906  ;;  %2398 = vrot.lane.b32.xlu0 %v3905_v54, %s4291_s3  ;;  %3918 = vpow2.f32 %v3531_v10 }
 0xc9e   :  { %2396 = vrot.lane.b32.xlu2 %v3907_v11, %s4291_s3  ;;  %v3909_v25 = vpop.eup %3908  ;;  %3920 = vpow2.f32 %v3534_v9 }
 0xc9f   :  { %v3911_v12 = vpop.eup %3910 }
 0xca0   :  { %v3913_v58 = vpop.eup %3912 }
 0xca1   :  { %v3915_v52 = vpop.eup %3914 }
 0xca2   :  { %v3917_v20 = vpop.eup %3916 }
 0xca3   :  { %v3919_v21 = vpop.eup %3918 }
 0xca4   :  { %2408 = vrot.lane.b32.xlu1 %v3909_v25, %s4291_s3  ;;  %v2220_v32 = vadd.f32 1.0, %v3919_v21  ;;  %v3921_v42 = vpop.eup %3920 }
 0xca5   :  { %2404 = vrot.lane.b32.xlu0 %v3911_v12, %s4291_s3  ;;  %v5493_v43 = vadd.f32 1.0, %v3921_v42 }
 0xca6   :  { %2402 = vrot.lane.b32.xlu2 %v3913_v58, %s4291_s3  ;;  %3922 = vrcp.f32 %v2220_v32  ;;  %v2239_v50 = vand.u32 2147483648, %v2220_v32  ;;  %vm2233_vm10 = vweird.f32 %v2220_v32  ;;  %v2237_v49 = vand.u32 2147483647, %v2220_v32 }
 0xca7   :  { %3924 = vpow2.f32 %v3536_v48  ;;  %v2284_v58 = vand.u32 2147483648, %v5493_v43  ;;  %vm2278_vm15 = vweird.f32 %v5493_v43 }
 0xca8   :  { %3926 = vrcp.f32 %v5493_v43  ;;  %v2240_v0 = vor.u32 1.1754944e-38, %v2239_v50  ;;  %vm2238_vm1 = vcmp.eq.f32.partialorder %v2237_v49, 8.507059e+37 }
 0xca9   :  { %3928 = vpow2.f32 %v3533_v35  ;;  %v2285_v48 = vor.u32 1.1754944e-38, %v2284_v58 }
 0xcaa   :  { %3930 = vpow2.f32 %v3532_v2 }
 0xcac   :  { %v3923_v16 = vpop.eup %3922 }
 0xcad   :  { %2410 = vrot.lane.b32.xlu0 %v3915_v52, %s4291_s3  ;;  %v3925_v18 = vpop.eup %3924  ;;  %v2229_v23 = vmul.f32 %v3923_v16, %v2220_v32  ;;  %vm2234_vm8 = vweird.f32 %v3923_v16  ;;  %v2282_v52 = vand.u32 2147483647, %v5493_v43 }
 0xcae   :  { %2406 = vrot.lane.b32.xlu2 %v3917_v20, %s4291_s3  ;;  %v5496_v26 = vadd.f32 1.0, %v3925_v18  ;;  %v3927_v22 = vpop.eup %3926  ;;  %vm2235_vm9 = vmor %vm2233_vm10, %vm2234_vm8 }
 0xcaf   :  { %v2230_v60 = vsub.f32 1.0, %v2229_v23  ;;  %v3929_v55 = vpop.eup %3928  ;;  %v2274_v19 = vmul.f32 %v3927_v22, %v5493_v43  ;;  %vm2279_vm11 = vweird.f32 %v3927_v22  ;;  %vm2283_vm8 = vcmp.eq.f32.partialorder %v2282_v52, 8.507059e+37 }
 0xcb0   :  { %v3931_v34 = vpop.eup %3930  ;;  %3932 = vrcp.f32 %v5496_v26  ;;  %v5500_v57 = vadd.f32 1.0, %v3929_v55  ;;  %vm2280_vm7 = vmor %vm2278_vm15, %vm2279_vm11 }
 0xcb1   :  { %v2231_v4 = vmul.f32 %v3923_v16, %v2230_v60  ;;  %3934 = vpow2.f32 %v3537_v30  ;;  %v5502_v7 = vadd.f32 1.0, %v3931_v34  ;;  %v2275_v63 = vsub.f32 1.0, %v2274_v19 }
 0xcb2   :  { %3936 = vpow2.f32 %v3535_v15  ;;  %v2312_v15 = vand.u32 2147483647, %v5496_v26 }
 0xcb3   :  { %v2232_v13 = vadd.f32 %v3923_v16, %v2231_v4  ;;  %3938 = vrcp.f32 %v5500_v57  ;;  %v2276_v53 = vmul.f32 %v3927_v22, %v2275_v63 }
 0xcb4   :  { %3940 = vrcp.f32 %v5502_v7  ;;  %vm2313_vm11 = vcmp.eq.f32.partialorder %v2312_v15, 8.507059e+37 }
 0xcb5   :  { %v2236_v45 = vsel %vm2235_vm9, %v3923_v16, %v2232_v13  ;;  %3942 = vpow2.f32 %v3538_v41  ;;  %v2277_v17 = vadd.f32 %v3927_v22, %v2276_v53  ;;  %vm2308_vm9 = vweird.f32 %v5496_v26 }
 0xcb6   :  { %v5504_v33 = vpop.eup %3932  ;;  %v5516_v37 = vsel %vm2238_vm1, %v2240_v0, %v2236_v45  ;;  %v2269_v41 = vand.u32 2147483648, %v5500_v57  ;;  %v2254_v0 = vand.u32 2147483648, %v5502_v7 }
 0xcb7   :  { %v3935_v14 = vpop.eup %3934  ;;  %v2304_v61 = vmul.f32 %v5504_v33, %v5496_v26  ;;  %v2281_v21 = vsel %vm2280_vm7, %v3927_v22, %v2277_v17  ;;  %vm2309_vm10 = vweird.f32 %v5504_v33  ;;  %v2314_v22 = vand.u32 2147483648, %v5496_v26 }
 0xcb8   :  { %v3937_v47 = vpop.eup %3936  ;;  %v5510_v39 = vadd.f32 1.0, %v3935_v14  ;;  %v5536_v43 = vsel %vm2283_vm8, %v2285_v48, %v2281_v21  ;;  %vm2310_vm1 = vmor %vm2308_vm9, %vm2309_vm10  ;;  %vm2263_vm8 = vweird.f32 %v5500_v57  ;;  %vm2248_vm9 = vweird.f32 %v5502_v7 }
 0xcb9   :  { %v5512_v1 = vadd.f32 1.0, %v3937_v47  ;;  %v5514_v54 = vpop.eup %3938  ;;  %v2305_v12 = vsub.f32 1.0, %v2304_v61  ;;  %v2315_v63 = vor.u32 1.1754944e-38, %v2314_v22  ;;  %v2267_v61 = vand.u32 2147483647, %v5500_v57 }
 0xcba   :  { %v5518_v59 = vpop.eup %3940  ;;  %3944 = vrcp.f32 %v5510_v39  ;;  %v2259_v20 = vmul.f32 %v5514_v54, %v5500_v57  ;;  %vm2264_vm15 = vweird.f32 %v5514_v54 }
 0xcbb   :  { %3946 = vrcp.f32 %v5512_v1  ;;  %v3943_v10 = vpop.eup %3942  ;;  %v2244_v9 = vmul.f32 %v5518_v59, %v5502_v7  ;;  %v2306_v32 = vmul.f32 %v5504_v33, %v2305_v12  ;;  %vm2249_vm7 = vweird.f32 %v5518_v59  ;;  %vm2265_vm10 = vmor %vm2263_vm8, %vm2264_vm15 }
 0xcbc   :  { %v2260_v42 = vsub.f32 1.0, %v2259_v20  ;;  %v5532_v35 = vadd.f32 1.0, %v3943_v10  ;;  %v2270_v12 = vor.u32 1.1754944e-38, %v2269_v41  ;;  %v2255_v20 = vor.u32 1.1754944e-38, %v2254_v0 }
 0xcbd   :  { %v2245_v18 = vsub.f32 1.0, %v2244_v9  ;;  %v2307_v60 = vadd.f32 %v5504_v33, %v2306_v32  ;;  %v2364_v0 = vrot.slane %v5443_v28, 7 }
 0xcbe   :  { %v2261_v55 = vmul.f32 %v5514_v54, %v2260_v42  ;;  %3948 = vrcp.f32 %v5532_v35 }
 0xcbf   :  { %v2246_v4 = vmul.f32 %v5518_v59, %v2245_v18  ;;  %v2311_v13 = vsel %vm2310_vm1, %v5504_v33, %v2307_v60  ;;  %vm2250_vm1 = vmor %vm2248_vm9, %vm2249_vm7  ;;  %v2327_v18 = vand.u32 2147483647, %v5510_v39  ;;  %v2297_v60 = vand.u32 2147483647, %v5512_v1 }
 0xcc0   :  { %v5534_v16 = vpop.eup %3944  ;;  %v2262_v26 = vadd.f32 %v5514_v54, %v2261_v55  ;;  %v5558_v14 = vsel %vm2313_vm11, %v2315_v63, %v2311_v13  ;;  %vm2268_vm11 = vcmp.eq.f32.partialorder %v2267_v61, 8.507059e+37  ;;  %v2365_v61 = vrot.slane %v5418_v6, 7 }
 0xcc1   :  { %v5538_v23 = vpop.eup %3946  ;;  %v2319_v34 = vmul.f32 %v5534_v16, %v5510_v39  ;;  %v2247_v47 = vadd.f32 %v5518_v59, %v2246_v4  ;;  %vm2324_vm7 = vweird.f32 %v5534_v16  ;;  %vm2298_vm0 = vcmp.eq.f32.partialorder %v2297_v60, 8.507059e+37 }
 0xcc2   :  { %v2289_v19 = vmul.f32 %v5538_v23, %v5512_v1  ;;  %vm2294_vm8 = vweird.f32 %v5538_v23  ;;  %v2367_v6 = vrot.slane %v5449_v5, 7  ;;  %v2369_v5 = vrot.slane %v5428_v27, 7 }
 0xcc3   :  { %v2320_v50 = vsub.f32 1.0, %v2319_v34  ;;  %v2251_v58 = vsel %vm2250_vm1, %v5518_v59, %v2247_v47  ;;  %vm2293_vm1 = vweird.f32 %v5512_v1  ;;  %v2366_v27 = vrot.slane %v5416_v40, 7 }
 0xcc4   :  { %v2290_v45 = vsub.f32 1.0, %v2289_v19  ;;  %v5562_v53 = vpop.eup %3948 }
 0xcc5   :  { %v2321_v17 = vmul.f32 %v5534_v16, %v2320_v50  ;;  %v2334_v57 = vmul.f32 %v5562_v53, %v5532_v35 }
 0xcc6   :  { %v2291_v52 = vmul.f32 %v5538_v23, %v2290_v45 }
 0xcc7   :  { %v2322_v59 = vadd.f32 %v5534_v16, %v2321_v17 }
 0xcc8   :  { %v2292_v42 = vadd.f32 %v5538_v23, %v2291_v52 }
 0xcf8   :  { %v2397_v11 = vpop.permute.xlu2 %2396 }
 0xcf9   :  { %v2420_v25 = vmul.f32 %v2397_v11, %v5516_v37  ;;  %v2252_v11 = vand.u32 2147483647, %v5502_v7  ;;  %v2329_v7 = vand.u32 2147483648, %v5510_v39 }
 0xcfb   :  { %2436 = vrot.lane.b32.xlu1 %v2420_v25, %s4292_s16  ;;  %v2266_v25 = vsel %vm2265_vm10, %v5514_v54, %v2262_v26  ;;  %vm2253_vm15 = vcmp.eq.f32.partialorder %v2252_v11, 8.507059e+37  ;;  %vm2323_vm10 = vweird.f32 %v5510_v39  ;;  %v2330_v15 = vor.u32 1.1754944e-38, %v2329_v7 }
 0xcfc   :  { %v5577_v9 = vsel %vm2268_vm11, %v2270_v12, %v2266_v25  ;;  %v5581_v32 = vsel %vm2253_vm15, %v2255_v20, %v2251_v58  ;;  %vm2325_vm9 = vmor %vm2323_vm10, %vm2324_vm7  ;;  %vm2328_vm15 = vcmp.eq.f32.partialorder %v2327_v18, 8.507059e+37  ;;  %vm2339_vm7 = vweird.f32 %v5562_v53 }
 0xcfd   :  { %v2326_v22 = vsel %vm2325_vm9, %v5534_v16, %v2322_v59  ;;  %vm2295_vm11 = vmor %vm2293_vm1, %vm2294_vm8  ;;  %vm2338_vm8 = vweird.f32 %v5532_v35  ;;  %v2342_v26 = vand.u32 2147483647, %v5532_v35  ;;  %v2381_v11 = vmul.f32 %v2365_v61, %v5581_v32 }
 0xcfe   :  { %v2296_v55 = vsel %vm2295_vm11, %v5538_v23, %v2292_v42  ;;  %v5598_v39 = vsel %vm2328_vm15, %v2330_v15, %v2326_v22  ;;  %v2344_v23 = vand.u32 2147483648, %v5532_v35  ;;  %vm2340_vm10 = vmor %vm2338_vm8, %vm2339_vm7  ;;  %v2380_v35 = vmul.f32 %v2364_v0, %v5516_v37 }
 0xcff   :  { %v2368_v58 = vrot.slane %v5426_v36, 7  ;;  %v2371_v36 = vrot.slane %v5436_v3, 7  ;;  %v2385_v42 = vmul.f32 %v2369_v5, %v5558_v14  ;;  %v2382_v3 = vmul.f32 %v2366_v27, %v5577_v9 }
 0xd00   :  { %v2403_v2 = vpop.permute.xlu2 %2402 }
 0xd01   :  { %v2423_v30 = vmul.f32 %v2403_v2, %v5536_v43  ;;  %v2335_v2 = vsub.f32 1.0, %v2334_v57  ;;  %v2383_v57 = vmul.f32 %v2367_v6, %v5536_v43 }
 0xd03   :  { %2442 = vrot.lane.b32.xlu1 %v2423_v30, %s4292_s16  ;;  %v2299_v30 = vand.u32 2147483648, %v5512_v1  ;;  %v2336_v34 = vmul.f32 %v5562_v53, %v2335_v2 }
 0xd05   :  { %v2300_v4 = vor.u32 1.1754944e-38, %v2299_v30  ;;  %v2337_v16 = vadd.f32 %v5562_v53, %v2336_v34 }
 0xd07   :  { %v5601_v63 = vsel %vm2298_vm0, %v2300_v4, %v2296_v55  ;;  %v2341_v50 = vsel %vm2340_vm10, %v5562_v53, %v2337_v16  ;;  %vm2343_vm0 = vcmp.eq.f32.partialorder %v2342_v26, 8.507059e+37 }
 0xd08   :  { %v2407_v49 = vpop.permute.xlu2 %2406  ;;  %v2384_v28 = vmul.f32 %v2368_v58, %v5601_v63 }
 0xd09   :  { %v2425_v33 = vmul.f32 %v2407_v49, %v5558_v14  ;;  %v2345_v49 = vor.u32 1.1754944e-38, %v2344_v23 }
 0xd0b   :  { %2446 = vrot.lane.b32.xlu1 %v2425_v33, %s4292_s16  ;;  %v5612_v47 = vsel %vm2343_vm0, %v2345_v49, %v2341_v50 }
 0xd0c   :  { %v2387_v59 = vmul.f32 %v2371_v36, %v5612_v47 }
 0xd0e   :  { %v2401_v10 = vpop.permute.xlu1 %2400 }
 0xd0f   :  { %v2422_v54 = vmul.f32 %v2401_v10, %v5577_v9  ;;  %v2399_v21 = vpop.permute.xlu0 %2398 }
 0xd10   :  { %v2421_v48 = vmul.f32 %v2399_v21, %v5581_v32 }
 0xd11   :  { %2440 = vrot.lane.b32.xlu0 %v2422_v54, %s4292_s16 }
 0xd12   :  { %2438 = vrot.lane.b32.xlu2 %v2421_v48, %s4292_s16 }
 0xd16   :  { %v2409_v19 = vpop.permute.xlu1 %2408 }
 0xd17   :  { %v2426_v13 = vmul.f32 %v2409_v19, %v5598_v39  ;;  %v2405_v41 = vpop.permute.xlu0 %2404  ;;  %v2370_v19 = vrot.slane %v5455_v8, 7 }
 0xd18   :  { %v2424_v1 = vmul.f32 %v2405_v41, %v5601_v63 }
 0xd19   :  { %2448 = vrot.lane.b32.xlu0 %v2426_v13, %s4292_s16  ;;  %v2386_v13 = vmul.f32 %v2370_v19, %v5598_v39 }
 0xd1a   :  { %2444 = vrot.lane.b32.xlu2 %v2424_v1, %s4292_s16 }
 0xd1f   :  { %v2411_v45 = vpop.permute.xlu0 %2410 }
 0xd20   :  { %v2427_v33 = vmul.f32 %v2411_v45, %v5612_v47 }
 0xd22   :  { %2450 = vrot.lane.b32.xlu2 %v2427_v33, %s4292_s16 }
 0xd6c   :  { %v2439_v25 = vpop.permute.xlu2 %2438 }
 0xd6d   :  { %v5620_v17 = vadd.f32 %v2439_v25, %v2381_v11  ;;  %v2437_v53 = vpop.permute.xlu1 %2436 }
 0xd6e   :  { %v5622_v12 = vadd.f32 %v2437_v53, %v2380_v35 }
 0xd6f   :  { %3950 = vtanh.f32 %v5620_v17 }
 0xd70   :  { %3952 = vtanh.f32 %v5622_v12 }
 0xd74   :  { %v2445_v52 = vpop.permute.xlu2 %2444 }
 0xd75   :  { %v3951_v20 = vpop.eup %3950  ;;  %v5630_v10 = vadd.f32 %v2445_v52, %v2384_v28  ;;  %v2443_v7 = vpop.permute.xlu1 %2442 }
 0xd76   :  { %v3953_v54 = vpop.eup %3952  ;;  %v5632_v21 = vadd.f32 %v2443_v7, %v2383_v57  ;;  %2486 = vrot.lane.b32.xlu1 %v3951_v20, %s4291_s3 }
 0xd77   :  { %3954 = vtanh.f32 %v5630_v10  ;;  %2484 = vrot.lane.b32.xlu0 %v3953_v54, %s4291_s3 }
 0xd78   :  { %3956 = vtanh.f32 %v5632_v21 }
 0xd7c   :  { %v2451_v48 = vpop.permute.xlu2 %2450 }
 0xd7d   :  { %v3955_v2 = vpop.eup %3954  ;;  %v5642_v18 = vadd.f32 %v2451_v48, %v2387_v59  ;;  %v2447_v30 = vpop.permute.xlu1 %2446 }
 0xd7e   :  { %v3957_v60 = vpop.eup %3956  ;;  %v5644_v22 = vadd.f32 %v2447_v30, %v2385_v42  ;;  %2492 = vrot.lane.b32.xlu1 %v3955_v2, %s4291_s3 }
 0xd7f   :  { %3958 = vtanh.f32 %v5642_v18  ;;  %2490 = vrot.lane.b32.xlu0 %v3957_v60, %s4291_s3 }
 0xd80   :  { %3960 = vtanh.f32 %v5644_v22 }
 0xd83   :  { %v2441_v15 = vpop.permute.xlu0 %2440 }
 0xd84   :  { %v5652_v55 = vadd.f32 %v2441_v15, %v2382_v3 }
 0xd85   :  { %v3959_v34 = vpop.eup %3958 }
 0xd86   :  { %v3961_v4 = vpop.eup %3960  ;;  %3962 = vtanh.f32 %v5652_v55  ;;  %2498 = vrot.lane.b32.xlu1 %v3959_v34, %s4291_s3 }
 0xd87   :  { %2494 = vrot.lane.b32.xlu0 %v3961_v4, %s4291_s3 }
 0xd8b   :  { %v2449_v40 = vpop.permute.xlu0 %2448 }
 0xd8c   :  { %v3963_v41 = vpop.eup %3962  ;;  %v5659_v1 = vadd.f32 %v2449_v40, %v2386_v13 }
 0xd8d   :  { %2488 = vrot.lane.b32.xlu2 %v3963_v41, %s4291_s3 }
 0xd8e   :  { %3964 = vtanh.f32 %v5659_v1 }
 0xd94   :  { %v3965_v16 = vpop.eup %3964 }
 0xd95   :  { %2496 = vrot.lane.b32.xlu2 %v3965_v16, %s4291_s3 }
 0xde7   :  { %v2489_v50 = vpop.permute.xlu2 %2488 }
 0xde8   :  { %v2487_v23 = vpop.permute.xlu1 %2486  ;;  %v2510_v45 = vmul.f32 %v2489_v50, %v5577_v9 }
 0xde9   :  { %v2485_v26 = vpop.permute.xlu0 %2484  ;;  %v2509_v49 = vmul.f32 %v2487_v23, %v5581_v32 }
 0xdea   :  { %v2508_v8 = vmul.f32 %v2485_v26, %v5516_v37  ;;  %v2527_v35 = vrot.slane %v2510_v45, 3 }
 0xdeb   :  { %v2525_v33 = vrot.slane %v2509_v49, 4 }
 0xdec   :  { %v2524_v61 = vrot.slane %v2508_v8, 5 }
 0xdee   :  { %v2526_v58 = vsel %vm568_vm2, %v2525_v33, %v2524_v61 }
 0xdef   :  { %v2497_v6 = vpop.permute.xlu2 %2496  ;;  %v2528_v37 = vsel %vm571_vm3, %v2527_v35, %v2526_v58 }
 0xdf0   :  { %v2493_v0 = vpop.permute.xlu1 %2492  ;;  %v2514_v52 = vmul.f32 %v2497_v6, %v5598_v39 }
 0xdf1   :  { %v2491_v11 = vpop.permute.xlu0 %2490  ;;  %v2512_v53 = vmul.f32 %v2493_v0, %v5601_v63 }
 0xdf2   :  { %v2511_v25 = vmul.f32 %v2491_v11, %v5536_v43  ;;  %v2534_v54 = vrot.slane %v2514_v52, 7 }
 0xdf3   :  { %v2531_v32 = vrot.slane %v2512_v53, 1 }
 0xdf4   :  { %v2529_v28 = vrot.slane %v2511_v25, 2 }
 0xdf6   :  { %v2530_v9 = vsel %vm574_vm4, %v2529_v28, %v2528_v37 }
 0xdf7   :  { %v2532_v63 = vsel %vm577_vm5, %v2531_v32, %v2530_v9 }
 0xdf8   :  { %v2499_v57 = vpop.permute.xlu1 %2498 }
 0xdf9   :  { %v2515_v20 = vmul.f32 %v2499_v57, %v5612_v47  ;;  %v2495_v7 = vpop.permute.xlu0 %2494 }
 0xdfa   :  { %v2513_v43 = vmul.f32 %v2495_v7, %v5558_v14 }
 0xdfb   :  { %v2536_v36 = vrot.slane %v2515_v20, 6 }
 0xdfc   :  { %v2533_v5 = vsel %vm580_vm6, %v2513_v43, %v2532_v63 }
 0xdfd   :  { %v2535_v59 = vsel %vm583_vm12, %v2534_v54, %v2533_v5 }
 0xdfe   :  { %v2537_v39 = vsel %vm586_vm13, %v2536_v36, %v2535_v59 }
 0xdff   :  { %2538 = vrot.lane.b32.xlu2 %v2537_v39, %s4292_s16 }
 0xe59   :  { %v2539_v48 = vpop.permute.xlu2 %2538 }
 0xe5a   :  { %3539 = vmatmul.msk.f32.vlgmr.msrb.gmra.mxu1 %vm215_vm14, %v2539_v48 }
 0xed7   :  { %v2559_v42 = vpop.f32.mrf.mxu1 }
 0xed8   :  { %v2563_v47 = vrot.slane %v2559_v42, 2  ;;  %v2564_v2 = vrot.slane %v2559_v42, 3  ;;  %v2565_v30 = vrot.slane %v2559_v42, 4  ;;  %v2566_v3 = vrot.slane %v2559_v42, 5 }
 0xed9   :  { %v2567_v15 = vrot.slane %v2559_v42, 6  ;;  %v2568_v34 = vrot.slane %v2559_v42, 7  ;;  %v2569_v23 = vrot.slane %v2559_v42, 1  ;;  %v2584_v50 = vadd.f32 %v2559_v42, %v4449_v44 }
 0xeda   :  { %v2578_v14 = vadd.f32 %v2563_v47, %v4438_v29  ;;  %v2579_v60 = vadd.f32 %v2564_v2, %v4440_v31  ;;  %v2580_v27 = vadd.f32 %v2565_v30, %v4444_v38  ;;  %v2581_v4 = vadd.f32 %v2566_v3, %v4451_v46 }
 0xedb   :  { %v2582_v19 = vadd.f32 %v2567_v15, %v4459_v56  ;;  %v2583_v40 = vadd.f32 %v2568_v34, %v4464_v62  ;;  %v2585_v26 = vadd.f32 %v2569_v23, %v4454_v51  ;;  %v3546_v47 = vmul.f32 -1.442695, %v2584_v50 }
 0xedc   :  { %3966 = vtanh.f32 %v2578_v14  ;;  %v3542_v0 = vmul.f32 -1.442695, %v2580_v27  ;;  %v3540_v6 = vmul.f32 -1.442695, %v2578_v14  ;;  %v3541_v52 = vmul.f32 -1.442695, %v2579_v60 }
 0xedd   :  { %3968 = vtanh.f32 %v2579_v60  ;;  %v3545_v11 = vmul.f32 -1.442695, %v2583_v40  ;;  %v3543_v9 = vmul.f32 -1.442695, %v2581_v4  ;;  %v3544_v20 = vmul.f32 -1.442695, %v2582_v19 }
 0xede   :  { %3970 = vtanh.f32 %v2580_v27  ;;  %v3547_v48 = vmul.f32 -1.442695, %v2585_v26 }
 0xedf   :  { %3972 = vtanh.f32 %v2581_v4 }
 0xee0   :  { %3974 = vtanh.f32 %v2582_v19 }
 0xee1   :  { %3976 = vtanh.f32 %v2583_v40 }
 0xee2   :  { %v3967_v13 = vpop.eup %3966  ;;  %3978 = vtanh.f32 %v2585_v26 }
 0xee3   :  { %v3969_v41 = vpop.eup %3968  ;;  %2786 = vrot.lane.b32.xlu0 %v3967_v13, %s4291_s3  ;;  %3980 = vtanh.f32 %v2584_v50 }
 0xee4   :  { %v3971_v16 = vpop.eup %3970  ;;  %2788 = vrot.lane.b32.xlu1 %v3969_v41, %s4291_s3  ;;  %3982 = vpow2.f32 %v3542_v0 }
 0xee5   :  { %2790 = vrot.lane.b32.xlu2 %v3971_v16, %s4291_s3  ;;  %v3973_v49 = vpop.eup %3972  ;;  %3984 = vpow2.f32 %v3545_v11 }
 0xee6   :  { %v3975_v8 = vpop.eup %3974 }
 0xee7   :  { %v3977_v45 = vpop.eup %3976 }
 0xee8   :  { %v3979_v33 = vpop.eup %3978 }
 0xee9   :  { %v3981_v61 = vpop.eup %3980 }
 0xeea   :  { %v3983_v25 = vpop.eup %3982 }
 0xeeb   :  { %2792 = vrot.lane.b32.xlu0 %v3973_v49, %s4291_s3  ;;  %v2612_v35 = vadd.f32 1.0, %v3983_v25  ;;  %v3985_v53 = vpop.eup %3984 }
 0xeec   :  { %2794 = vrot.lane.b32.xlu1 %v3975_v8, %s4291_s3  ;;  %v2615_v58 = vadd.f32 1.0, %v3985_v53 }
 0xeed   :  { %2796 = vrot.lane.b32.xlu2 %v3977_v45, %s4291_s3  ;;  %3986 = vrcp.f32 %v2612_v35  ;;  %v2659_v42 = vand.u32 2147483648, %v2612_v35  ;;  %vm2653_vm1 = vweird.f32 %v2612_v35  ;;  %v2657_v30 = vand.u32 2147483647, %v2612_v35 }
 0xeee   :  { %3988 = vrcp.f32 %v2615_v58  ;;  %v2704_v23 = vand.u32 2147483648, %v2615_v58  ;;  %vm2698_vm8 = vweird.f32 %v2615_v58  ;;  %v2702_v50 = vand.u32 2147483647, %v2615_v58 }
 0xeef   :  { %3990 = vpow2.f32 %v3540_v6  ;;  %v2660_v3 = vor.u32 1.1754944e-38, %v2659_v42  ;;  %vm2658_vm15 = vcmp.eq.f32.partialorder %v2657_v30, 8.507059e+37 }
 0xef0   :  { %3992 = vpow2.f32 %v3541_v52  ;;  %vm2703_vm0 = vcmp.eq.f32.partialorder %v2702_v50, 8.507059e+37 }
 0xef1   :  { %3994 = vpow2.f32 %v3543_v9 }
 0xef2   :  { %3996 = vpow2.f32 %v3544_v20 }
 0xef3   :  { %2800 = vrot.lane.b32.xlu0 %v3979_v33, %s4291_s3  ;;  %v3987_v28 = vpop.eup %3986 }
 0xef4   :  { %2798 = vrot.lane.b32.xlu1 %v3981_v61, %s4291_s3  ;;  %v2649_v32 = vmul.f32 %v3987_v28, %v2612_v35  ;;  %v3989_v57 = vpop.eup %3988  ;;  %vm2654_vm9 = vweird.f32 %v3987_v28  ;;  %v2705_v61 = vor.u32 1.1754944e-38, %v2704_v23 }
 0xef5   :  { %v3991_v7 = vpop.eup %3990  ;;  %v2694_v36 = vmul.f32 %v3989_v57, %v2615_v58  ;;  %vm2655_vm11 = vmor %vm2653_vm1, %vm2654_vm9  ;;  %vm2699_vm7 = vweird.f32 %v3989_v57 }
 0xef6   :  { %v2650_v37 = vsub.f32 1.0, %v2649_v32  ;;  %v3993_v43 = vpop.eup %3992  ;;  %v5697_v63 = vadd.f32 1.0, %v3991_v7  ;;  %vm2700_vm10 = vmor %vm2698_vm8, %vm2699_vm7 }
 0xef7   :  { %v5699_v5 = vadd.f32 1.0, %v3993_v43  ;;  %v2695_v39 = vsub.f32 1.0, %v2694_v36  ;;  %v3995_v2 = vpop.eup %3994 }
 0xef8   :  { %v2651_v54 = vmul.f32 %v3987_v28, %v2650_v37  ;;  %3998 = vrcp.f32 %v5697_v63  ;;  %v3997_v14 = vpop.eup %3996  ;;  %v5703_v15 = vadd.f32 1.0, %v3995_v2  ;;  %v2629_v36 = vand.u32 2147483648, %v5697_v63 }
 0xef9   :  { %4000 = vrcp.f32 %v5699_v5  ;;  %v2696_v27 = vmul.f32 %v3989_v57, %v2695_v39  ;;  %v5705_v34 = vadd.f32 1.0, %v3997_v14  ;;  %v2627_v42 = vand.u32 2147483647, %v5697_v63 }
 0xefa   :  { %v2652_v59 = vadd.f32 %v3987_v28, %v2651_v54  ;;  %4002 = vpow2.f32 %v3547_v48  ;;  %v2644_v48 = vand.u32 2147483648, %v5699_v5 }
 0xefb   :  { %4004 = vpow2.f32 %v3546_v47  ;;  %v2697_v16 = vadd.f32 %v3989_v57, %v2696_v27  ;;  %v2642_v47 = vand.u32 2147483647, %v5699_v5  ;;  %v2630_v27 = vor.u32 1.1754944e-38, %v2629_v36 }
 0xefc   :  { %v2656_v60 = vsel %vm2655_vm11, %v3987_v28, %v2652_v59  ;;  %4006 = vrcp.f32 %v5703_v15  ;;  %vm2623_vm11 = vweird.f32 %v5697_v63 }
 0xefd   :  { %v5709_v13 = vsel %vm2658_vm15, %v2660_v3, %v2656_v60  ;;  %4008 = vrcp.f32 %v5705_v34  ;;  %v2701_v33 = vsel %vm2700_vm10, %v3989_v57, %v2697_v16  ;;  %vm2638_vm15 = vweird.f32 %v5699_v5 }
 0xefe   :  { %v5707_v4 = vpop.eup %3998  ;;  %v5727_v53 = vsel %vm2703_vm0, %v2705_v61, %v2701_v33  ;;  %vm2628_vm10 = vcmp.eq.f32.partialorder %v2627_v42, 8.507059e+37  ;;  %vm2643_vm0 = vcmp.eq.f32.partialorder %v2642_v47, 8.507059e+37  ;;  %v2674_v16 = vand.u32 2147483648, %v5703_v15 }
 0xeff   :  { %v5711_v40 = vpop.eup %4000  ;;  %v2619_v49 = vmul.f32 %v5707_v4, %v5697_v63  ;;  %vm2624_vm9 = vweird.f32 %v5707_v4  ;;  %v2689_v61 = vand.u32 2147483648, %v5705_v34 }
 0xf00   :  { %v4003_v26 = vpop.eup %4002  ;;  %v2634_v45 = vmul.f32 %v5711_v40, %v5699_v5  ;;  %vm2639_vm1 = vweird.f32 %v5711_v40  ;;  %vm2625_vm7 = vmor %vm2623_vm11, %vm2624_vm9  ;;  %vm2668_vm11 = vweird.f32 %v5703_v15 }
 0xf01   :  { %v4005_v8 = vpop.eup %4004  ;;  %v5721_v0 = vadd.f32 1.0, %v4003_v26  ;;  %v2620_v11 = vsub.f32 1.0, %v2619_v49  ;;  %vm5755_vm8 = vmor %vm2638_vm15, %vm2639_vm1  ;;  %vm2683_vm15 = vweird.f32 %v5705_v34 }
 0xf02   :  { %v5723_v25 = vadd.f32 1.0, %v4005_v8  ;;  %v5725_v35 = vpop.eup %4006  ;;  %v2635_v6 = vsub.f32 1.0, %v2634_v45 }
 0xf03   :  { %v5729_v28 = vpop.eup %4008  ;;  %4010 = vrcp.f32 %v5721_v0  ;;  %v2621_v32 = vmul.f32 %v5707_v4, %v2620_v11  ;;  %v2664_v37 = vmul.f32 %v5725_v35, %v5703_v15  ;;  %vm2669_vm9 = vweird.f32 %v5725_v35 }
 0xf04   :  { %4012 = vrcp.f32 %v5723_v25  ;;  %v2636_v9 = vmul.f32 %v5711_v40, %v2635_v6  ;;  %v2679_v57 = vmul.f32 %v5729_v28, %v5705_v34  ;;  %vm2684_vm1 = vweird.f32 %v5729_v28 }
 0xf05   :  { %v2622_v20 = vadd.f32 %v5707_v4, %v2621_v32  ;;  %v2665_v7 = vsub.f32 1.0, %v2664_v37  ;;  %v2672_v11 = vand.u32 2147483647, %v5703_v15  ;;  %v2675_v37 = vor.u32 1.1754944e-38, %v2674_v16 }
 0xf06   :  { %v2637_v54 = vadd.f32 %v5711_v40, %v2636_v9  ;;  %v2680_v59 = vsub.f32 1.0, %v2679_v57  ;;  %v2690_v15 = vor.u32 1.1754944e-38, %v2689_v61  ;;  %v2732_v42 = vand.u32 2147483647, %v5721_v0 }
 0xf07   :  { %v2626_v30 = vsel %vm2625_vm7, %v5707_v4, %v2622_v20  ;;  %v2666_v14 = vmul.f32 %v5725_v35, %v2665_v7  ;;  %vm2670_vm7 = vmor %vm2668_vm11, %vm2669_vm9  ;;  %vm2728_vm11 = vweird.f32 %v5721_v0  ;;  %v2717_v47 = vand.u32 2147483647, %v5723_v25 }
 0xf08   :  { %v2641_v63 = vsel %vm5755_vm8, %v5711_v40, %v2637_v54  ;;  %v2681_v3 = vmul.f32 %v5729_v28, %v2680_v59  ;;  %v5769_v4 = vsel %vm2628_vm10, %v2630_v27, %v2626_v30  ;;  %vm2685_vm8 = vmor %vm2683_vm15, %vm2684_vm1  ;;  %vm2673_vm10 = vcmp.eq.f32.partialorder %v2672_v11, 8.507059e+37 }
 0xf09   :  { %v5743_v43 = vpop.eup %4010  ;;  %v2667_v50 = vadd.f32 %v5725_v35, %v2666_v14  ;;  %v2734_v59 = vand.u32 2147483648, %v5721_v0  ;;  %vm2713_vm15 = vweird.f32 %v5723_v25 }
 0xf0a   :  { %v5748_v39 = vpop.eup %4012  ;;  %v2724_v60 = vmul.f32 %v5743_v43, %v5721_v0  ;;  %v2682_v45 = vadd.f32 %v5729_v28, %v2681_v3  ;;  %vm2729_vm9 = vweird.f32 %v5743_v43 }
 0xf0b   :  { %v2709_v5 = vmul.f32 %v5748_v39, %v5723_v25  ;;  %v2671_v6 = vsel %vm2670_vm7, %v5725_v35, %v2667_v50  ;;  %vm2714_vm1 = vweird.f32 %v5748_v39  ;;  %vm2730_vm7 = vmor %vm2728_vm11, %vm2729_vm9  ;;  %v2735_v14 = vor.u32 1.1754944e-38, %v2734_v59 }
 0xf0c   :  { %v2725_v49 = vsub.f32 1.0, %v2724_v60  ;;  %v2686_v32 = vsel %vm2685_vm8, %v5729_v28, %v2682_v45  ;;  %v5793_v57 = vsel %vm2673_vm10, %v2675_v37, %v2671_v6  ;;  %vm2715_vm8 = vmor %vm2713_vm15, %vm2714_vm1  ;;  %vm2733_vm10 = vcmp.eq.f32.partialorder %v2732_v42, 8.507059e+37 }
 0xf0d   :  { %v2710_v33 = vsub.f32 1.0, %v2709_v5  ;;  %vm6105_vm9 = vcmask 1043456   ;;  %vm6106_vm1 = vcmask 97280  }
 0xf0f   :  { %v2711_v9 = vmul.f32 %v5748_v39, %v2710_v33 }
 0xf11   :  { %v2712_v36 = vadd.f32 %v5748_v39, %v2711_v9 }
 0xf13   :  { %v2716_v30 = vsel %vm2715_vm8, %v5748_v39, %v2712_v36  ;;  %v2756_v39 = vrot.slane %v5652_v55, 7 }
 0xf15   :  { %v2772_v16 = vmul.f32 %v2756_v39, %v5709_v13 }
 0xf3f   :  { %v2791_v19 = vpop.permute.xlu2 %2790 }
 0xf40   :  { %v2812_v41 = vmul.f32 %v2791_v19, %v5709_v13  ;;  %v2645_v19 = vor.u32 1.1754944e-38, %v2644_v48  ;;  %v2719_v48 = vand.u32 2147483648, %v5723_v25 }
 0xf42   :  { %2830 = vrot.lane.b32.xlu1 %v2812_v41, %s4292_s16  ;;  %v5773_v26 = vsel %vm2643_vm0, %v2645_v19, %v2641_v63  ;;  %v2720_v60 = vor.u32 1.1754944e-38, %v2719_v48 }
 0xf47   :  { %v2797_v58 = vpop.permute.xlu2 %2796 }
 0xf48   :  { %v2815_v52 = vmul.f32 %v2797_v58, %v5727_v53  ;;  %v2687_v58 = vand.u32 2147483647, %v5705_v34 }
 0xf4a   :  { %2836 = vrot.lane.b32.xlu1 %v2815_v52, %s4292_s16  ;;  %v2726_v52 = vmul.f32 %v5743_v43, %v2725_v49  ;;  %vm2688_vm0 = vcmp.eq.f32.partialorder %v2687_v58, 8.507059e+37  ;;  %v2757_v49 = vrot.slane %v5632_v21, 7  ;;  %v2761_v21 = vrot.slane %v5642_v18, 7 }
 0xf4b   :  { %v5795_v34 = vsel %vm2688_vm0, %v2690_v15, %v2686_v32  ;;  %vm2718_vm0 = vcmp.eq.f32.partialorder %v2717_v47, 8.507059e+37  ;;  %v2755_v15 = vrot.slane %v5620_v17, 7  ;;  %v2760_v17 = vrot.slane %v5659_v1, 7 }
 0xf4c   :  { %v2727_v35 = vadd.f32 %v5743_v43, %v2726_v52  ;;  %v5815_v0 = vsel %vm2718_vm0, %v2720_v60, %v2716_v30  ;;  %v2773_v55 = vmul.f32 %v2757_v49, %v5793_v57 }
 0xf4d   :  { %v2776_v42 = vmul.f32 %v2760_v17, %v5815_v0 }
 0xf4e   :  { %v2731_v2 = vsel %vm2730_vm7, %v5743_v43, %v2727_v35  ;;  %v2754_v43 = vrot.slane %v5622_v12, 7  ;;  %v2759_v12 = vrot.slane %v5644_v22, 7  ;;  %v2758_v35 = vrot.slane %v5630_v10, 7 }
 0xf4f   :  { %v5813_v63 = vsel %vm2733_vm10, %v2735_v14, %v2731_v2 }
 0xf50   :  { %v2770_v19 = vmul.f32 %v2754_v43, %v5769_v4  ;;  %v2775_v33 = vmul.f32 %v2759_v12, %v5727_v53  ;;  %v2777_v22 = vmul.f32 %v2761_v21, %v5813_v63 }
 0xf55   :  { %v2787_v41 = vpop.permute.xlu0 %2786 }
 0xf56   :  { %v2789_v23 = vpop.permute.xlu1 %2788  ;;  %v2810_v40 = vmul.f32 %v2787_v41, %v5769_v4 }
 0xf57   :  { %v2811_v8 = vmul.f32 %v2789_v23, %v5773_v26 }
 0xf58   :  { %2826 = vrot.lane.b32.xlu2 %v2810_v40, %s4292_s16 }
 0xf59   :  { %2828 = vrot.lane.b32.xlu0 %v2811_v8, %s4292_s16 }
 0xf5d   :  { %v2793_v20 = vpop.permute.xlu0 %2792 }
 0xf5e   :  { %v2795_v7 = vpop.permute.xlu1 %2794  ;;  %v2813_v54 = vmul.f32 %v2793_v20, %v5793_v57  ;;  %v2771_v20 = vmul.f32 %v2755_v15, %v5773_v26 }
 0xf5f   :  { %v2814_v28 = vmul.f32 %v2795_v7, %v5795_v34 }
 0xf60   :  { %2832 = vrot.lane.b32.xlu2 %v2813_v54, %s4292_s16 }
 0xf61   :  { %2834 = vrot.lane.b32.xlu0 %v2814_v28, %s4292_s16  ;;  %v2774_v28 = vmul.f32 %v2758_v35, %v5795_v34 }
 0xf65   :  { %v2801_v27 = vpop.permute.xlu0 %2800 }
 0xf66   :  { %v2799_v3 = vpop.permute.xlu1 %2798  ;;  %v2817_v5 = vmul.f32 %v2801_v27, %v5813_v63 }
 0xf67   :  { %v2816_v25 = vmul.f32 %v2799_v3, %v5815_v0 }
 0xf68   :  { %2840 = vrot.lane.b32.xlu2 %v2817_v5, %s4292_s16 }
 0xf69   :  { %2838 = vrot.lane.b32.xlu0 %v2816_v25, %s4292_s16 }
 0xfb2   :  { %v2827_v41 = vpop.permute.xlu2 %2826 }
 0xfb3   :  { %v5825_v23 = vadd.f32 %v2827_v41, %v2770_v19 }
 0xfb4   :  { %v2831_v40 = vpop.permute.xlu1 %2830 }
 0xfb5   :  { %v5827_v50 = vadd.f32 %v2831_v40, %v2772_v16  ;;  %4014 = vtanh.f32 %v5825_v23 }
 0xfb7   :  { %4016 = vtanh.f32 %v5827_v50 }
 0xfba   :  { %v2833_v8 = vpop.permute.xlu2 %2832 }
 0xfbb   :  { %v4015_v45 = vpop.eup %4014  ;;  %v5835_v61 = vadd.f32 %v2833_v8, %v2773_v55 }
 0xfbc   :  { %v2837_v11 = vpop.permute.xlu1 %2836  ;;  %2874 = vrot.lane.b32.xlu1 %v4015_v45, %s4291_s3 }
 0xfbd   :  { %v4017_v58 = vpop.eup %4016  ;;  %v5838_v6 = vadd.f32 %v2837_v11, %v2775_v33  ;;  %4018 = vtanh.f32 %v5835_v61 }
 0xfbe   :  { %2878 = vrot.lane.b32.xlu0 %v4017_v58, %s4291_s3 }
 0xfbf   :  { %4020 = vtanh.f32 %v5838_v6 }
 0xfc2   :  { %v2841_v52 = vpop.permute.xlu2 %2840 }
 0xfc3   :  { %v4019_v32 = vpop.eup %4018  ;;  %v5845_v37 = vadd.f32 %v2841_v52, %v2777_v22 }
 0xfc4   :  { %2880 = vrot.lane.b32.xlu1 %v4019_v32, %s4291_s3 }
 0xfc5   :  { %v4021_v9 = vpop.eup %4020  ;;  %4022 = vtanh.f32 %v5845_v37 }
 0xfc6   :  { %2884 = vrot.lane.b32.xlu0 %v4021_v9, %s4291_s3  ;;  %v4102_v9 = vld [vmem:[#allocation2 + $0x30] sm:$0xff] }
 0xfc7   :  { %v3313_v15 = vrot.slane %v4102_v9, 1 }
 0xfcb   :  { %v4023_v18 = vpop.eup %4022  ;;  %v2829_v7 = vpop.permute.xlu0 %2828 }
 0xfcc   :  { %v5852_v54 = vadd.f32 %v2829_v7, %v2771_v20  ;;  %2888 = vrot.lane.b32.xlu1 %v4023_v18, %s4291_s3  ;;  %v3297_v20 = vld [vmem:[#allocation8 + $0x8] sm:$0xf]  ;;  %v3296_v18 = vld [vmem:[#allocation8] sm:$0xff] }
 0xfcd   :  { %3557 = vmatpush.msk.msrb.mxu3 %vm6105_vm9, %v3297_v20 }
 0xfce   :  { %4024 = vtanh.f32 %v5852_v54 }
 0xfcf   :  { %3336 = vmatpush.msrb.mxu3 %v3296_v18 }
 0xfd3   :  { %v2835_v36 = vpop.permute.xlu0 %2834 }
 0xfd4   :  { %v4025_v59 = vpop.eup %4024  ;;  %v5858_v48 = vadd.f32 %v2835_v36, %v2774_v28 }
 0xfd5   :  { %2876 = vrot.lane.b32.xlu2 %v4025_v59, %s4291_s3 }
 0xfd6   :  { %4026 = vtanh.f32 %v5858_v48 }
 0xfdb   :  { %v2839_v47 = vpop.permute.xlu0 %2838 }
 0xfdc   :  { %v4027_v2 = vpop.eup %4026  ;;  %v5864_v30 = vadd.f32 %v2839_v47, %v2776_v42 }
 0xfdd   :  { %2882 = vrot.lane.b32.xlu2 %v4027_v2, %s4291_s3 }
 0xfde   :  { %4028 = vtanh.f32 %v5864_v30 }
 0xfe4   :  { %v4029_v10 = vpop.eup %4028 }
 0xfe5   :  { %2886 = vrot.lane.b32.xlu2 %v4029_v10, %s4291_s3 }
0x102e   :  { %v2875_v14 = vpop.permute.xlu1 %2874 }
0x102f   :  { %v2877_v60 = vpop.permute.xlu2 %2876  ;;  %v2898_v27 = vmul.f32 %v2875_v14, %v5769_v4 }
0x1030   :  { %v2879_v3 = vpop.permute.xlu0 %2878  ;;  %v2899_v1 = vmul.f32 %v2877_v60, %v5773_v26 }
0x1031   :  { %v2900_v5 = vmul.f32 %v2879_v3, %v5709_v13  ;;  %v2914_v43 = vrot.slane %v2898_v27, 6 }
0x1032   :  { %v2915_v25 = vrot.slane %v2899_v1, 5 }
0x1033   :  { %v2917_v39 = vrot.slane %v2900_v5, 4 }
0x1034   :  { %v2916_v41 = vsel %vm568_vm2, %v2915_v25, %v2914_v43 }
0x1035   :  { %v2918_v4 = vsel %vm571_vm3, %v2917_v39, %v2916_v41 }
0x1036   :  { %v2881_v19 = vpop.permute.xlu1 %2880 }
0x1037   :  { %v2883_v16 = vpop.permute.xlu2 %2882  ;;  %v2901_v40 = vmul.f32 %v2881_v19, %v5793_v57 }
0x1038   :  { %v2885_v49 = vpop.permute.xlu0 %2884  ;;  %v2902_v12 = vmul.f32 %v2883_v16, %v5795_v34 }
0x1039   :  { %v2919_v55 = vrot.slane %v2901_v40, 3  ;;  %v2903_v26 = vmul.f32 %v2885_v49, %v5727_v53 }
0x103a   :  { %v2921_v8 = vrot.slane %v2902_v12, 2 }
0x103b   :  { %v2920_v13 = vsel %vm574_vm4, %v2919_v55, %v2918_v4  ;;  %v2923_v11 = vrot.slane %v2903_v26, 1 }
0x103c   :  { %v2922_v45 = vsel %vm577_vm5, %v2921_v8, %v2920_v13 }
0x103d   :  { %v2924_v22 = vsel %vm580_vm6, %v2923_v11, %v2922_v45 }
0x103e   :  { %v2889_v33 = vpop.permute.xlu1 %2888 }
0x103f   :  { %v2887_v58 = vpop.permute.xlu2 %2886  ;;  %v2905_v21 = vmul.f32 %v2889_v33, %v5813_v63  ;;  %v3314_v63 = vsel %vm583_vm12, %v3313_v15, %v4408_v24 }
0x1040   :  { %v2904_v57 = vmul.f32 %v2887_v58, %v5815_v0  ;;  %v4103_v0 = vld [vmem:[#allocation2 + $0x38] sm:$0xff] }
0x1041   :  { %v2926_v34 = vrot.slane %v2905_v21, 7  ;;  %v3315_v7 = vsel %vm586_vm13, %v4103_v0, %v3314_v63 }
0x1042   :  { %v2925_v52 = vsel %vm583_vm12, %v2904_v57, %v2924_v22  ;;  %3558 = vmatmul.msk.f32.vlgmr.msrb.gmra.mxu3 %vm6106_vm1, %v3315_v7 }
0x1043   :  { %v2927_v32 = vsel %vm586_vm13, %v2926_v34, %v2925_v52 }
0x1044   :  { %2928 = vrot.lane.b32.xlu0 %v2927_v32, %s4292_s16 }
0x10b6   :  { %v2929_v53 = vpop.permute.xlu0 %2928 }
0x10b7   :  { %3548 = vmatmul.msk.f32.vlgmr.msra.gmra.mxu2 %vm215_vm14, %v2929_v53 }
0x113a   :  { %v2949_v35 = vpop.f32.mrf.mxu2 }
0x113b   :  { %v2953_v28 = vrot.slane %v2949_v35, 1  ;;  %v2954_v36 = vrot.slane %v2949_v35, 2  ;;  %v2955_v59 = vrot.slane %v2949_v35, 3  ;;  %v2956_v2 = vrot.slane %v2949_v35, 4 }
0x113c   :  { %v2957_v24 = vrot.slane %v2949_v35, 5  ;;  %v2958_v10 = vrot.slane %v2949_v35, 6 }
0x113d   :  { %v2968_v17 = vadd.f32 %v2953_v28, %v4438_v29  ;;  %v2969_v42 = vadd.f32 %v2954_v36, %v4440_v31  ;;  %v2970_v47 = vadd.f32 %v2955_v59, %v4444_v38  ;;  %v2971_v14 = vadd.f32 %v2956_v2, %v4451_v46 }
0x113e   :  { %v2972_v60 = vadd.f32 %v2957_v24, %v4459_v56  ;;  %v2973_v3 = vadd.f32 %v2958_v10, %v4464_v62  ;;  %v2959_v31 = vrot.slane %v2949_v35, 7  ;;  %v2975_v46 = vadd.f32 %v2949_v35, %v4454_v51 }
0x113f   :  { %4030 = vtanh.f32 %v2968_v17  ;;  %v3549_v12 = vmul.f32 -1.442695, %v2968_v17  ;;  %v3551_v55 = vmul.f32 -1.442695, %v2970_v47  ;;  %v3552_v33 = vmul.f32 -1.442695, %v2971_v14 }
0x1140   :  { %4032 = vtanh.f32 %v2969_v42  ;;  %v2974_v38 = vadd.f32 %v2959_v31, %v4449_v44  ;;  %v3550_v44 = vmul.f32 -1.442695, %v2969_v42  ;;  %v3553_v51 = vmul.f32 -1.442695, %v2972_v60 }
0x1141   :  { %4034 = vtanh.f32 %v2970_v47  ;;  %v3556_v41 = vmul.f32 -1.442695, %v2975_v46  ;;  %v3554_v11 = vmul.f32 -1.442695, %v2973_v3 }
0x1142   :  { %4036 = vtanh.f32 %v2971_v14  ;;  %v3555_v20 = vmul.f32 -1.442695, %v2974_v38 }
0x1143   :  { %4038 = vtanh.f32 %v2972_v60 }
0x1144   :  { %4040 = vtanh.f32 %v2973_v3 }
0x1145   :  { %v4031_v27 = vpop.eup %4030  ;;  %4042 = vtanh.f32 %v2974_v38 }
0x1146   :  { %v4033_v1 = vpop.eup %4032  ;;  %3176 = vrot.lane.b32.xlu1 %v4031_v27, %s4291_s3  ;;  %4044 = vtanh.f32 %v2975_v46 }
0x1147   :  { %v4035_v29 = vpop.eup %4034  ;;  %3178 = vrot.lane.b32.xlu2 %v4033_v1, %s4291_s3  ;;  %4046 = vpow2.f32 %v3550_v44 }
0x1148   :  { %3180 = vrot.lane.b32.xlu0 %v4035_v29, %s4291_s3  ;;  %v4037_v56 = vpop.eup %4036  ;;  %4048 = vpow2.f32 %v3553_v51 }
0x1149   :  { %v4039_v5 = vpop.eup %4038 }
0x114a   :  { %v4041_v62 = vpop.eup %4040 }
0x114b   :  { %v4043_v25 = vpop.eup %4042 }
0x114c   :  { %v4045_v43 = vpop.eup %4044 }
0x114d   :  { %v4047_v39 = vpop.eup %4046 }
0x114e   :  { %3182 = vrot.lane.b32.xlu1 %v4037_v56, %s4291_s3  ;;  %v3001_v19 = vadd.f32 1.0, %v4047_v39  ;;  %v4049_v16 = vpop.eup %4048 }
0x114f   :  { %3184 = vrot.lane.b32.xlu2 %v4039_v5, %s4291_s3  ;;  %v5907_v40 = vadd.f32 1.0, %v4049_v16 }
0x1150   :  { %3186 = vrot.lane.b32.xlu0 %v4041_v62, %s4291_s3  ;;  %4050 = vrcp.f32 %v3001_v19  ;;  %v3034_v15 = vand.u32 2147483648, %v3001_v19  ;;  %vm3028_vm15 = vweird.f32 %v3001_v19  ;;  %v3032_v18 = vand.u32 2147483647, %v3001_v19 }
0x1151   :  { %4052 = vpow2.f32 %v3556_v41  ;;  %v3079_v60 = vand.u32 2147483648, %v5907_v40  ;;  %vm3073_vm0 = vweird.f32 %v5907_v40  ;;  %v3077_v3 = vand.u32 2147483647, %v5907_v40 }
0x1152   :  { %4054 = vrcp.f32 %v5907_v40  ;;  %v3035_v36 = vor.u32 1.1754944e-38, %v3034_v15  ;;  %vm3033_vm8 = vcmp.eq.f32.partialorder %v3032_v18, 8.507059e+37 }
0x1153   :  { %4056 = vpow2.f32 %v3549_v12  ;;  %v3080_v46 = vor.u32 1.1754944e-38, %v3079_v60  ;;  %vm3078_vm1 = vcmp.eq.f32.partialorder %v3077_v3, 8.507059e+37 }
0x1154   :  { %4058 = vpow2.f32 %v3551_v55 }
0x1156   :  { %3188 = vrot.lane.b32.xlu1 %v4043_v25, %s4291_s3  ;;  %v4051_v49 = vpop.eup %4050 }
0x1157   :  { %3190 = vrot.lane.b32.xlu2 %v4045_v43, %s4291_s3  ;;  %v4053_v8 = vpop.eup %4052  ;;  %v3024_v4 = vmul.f32 %v4051_v49, %v3001_v19  ;;  %vm3029_vm11 = vweird.f32 %v4051_v49 }
0x1158   :  { %v5910_v26 = vadd.f32 1.0, %v4053_v8  ;;  %v4055_v45 = vpop.eup %4054  ;;  %vm3030_vm7 = vmor %vm3028_vm15, %vm3029_vm11 }
0x1159   :  { %v3025_v13 = vsub.f32 1.0, %v3024_v4  ;;  %v4057_v58 = vpop.eup %4056  ;;  %v3069_v57 = vmul.f32 %v4055_v45, %v5907_v40  ;;  %vm3074_vm10 = vweird.f32 %v4055_v45 }
0x115a   :  { %4060 = vrcp.f32 %v5910_v26  ;;  %v4059_v22 = vpop.eup %4058  ;;  %v5914_v34 = vadd.f32 1.0, %v4057_v58  ;;  %vm3075_vm9 = vmor %vm3073_vm0, %vm3074_vm10  ;;  %v3124_v19 = vand.u32 2147483648, %v5910_v26  ;;  %vm3118_vm15 = vweird.f32 %v5910_v26 }
0x115b   :  { %v3026_v21 = vmul.f32 %v4051_v49, %v3025_v13  ;;  %4062 = vpow2.f32 %v3552_v33  ;;  %v3070_v32 = vsub.f32 1.0, %v3069_v57  ;;  %v5916_v53 = vadd.f32 1.0, %v4059_v22 }
0x115c   :  { %4064 = vpow2.f32 %v3554_v11  ;;  %v3122_v40 = vand.u32 2147483647, %v5910_v26  ;;  %v3125_v8 = vor.u32 1.1754944e-38, %v3124_v19  ;;  %vm3013_vm0 = vweird.f32 %v5914_v34 }
0x115d   :  { %v3027_v52 = vadd.f32 %v4051_v49, %v3026_v21  ;;  %4066 = vrcp.f32 %v5914_v34  ;;  %v3071_v35 = vmul.f32 %v4055_v45, %v3070_v32  ;;  %v3019_v57 = vand.u32 2147483648, %v5914_v34 }
0x115e   :  { %4068 = vrcp.f32 %v5916_v53  ;;  %v3049_v15 = vand.u32 2147483648, %v5916_v53 }
0x115f   :  { %v3031_v7 = vsel %vm3030_vm7, %v4051_v49, %v3027_v52  ;;  %4070 = vpow2.f32 %v3555_v20  ;;  %v3072_v10 = vadd.f32 %v4055_v45, %v3071_v35  ;;  %v3017_v52 = vand.u32 2147483647, %v5914_v34 }
0x1160   :  { %v5918_v9 = vpop.eup %4060  ;;  %v5926_v42 = vsel %vm3033_vm8, %v3035_v36, %v3031_v7  ;;  %vm3123_vm8 = vcmp.eq.f32.partialorder %v3122_v40, 8.507059e+37  ;;  %v3050_v35 = vor.u32 1.1754944e-38, %v3049_v15 }
0x1161   :  { %v4063_v63 = vpop.eup %4062  ;;  %v3114_v28 = vmul.f32 %v5918_v9, %v5910_v26  ;;  %v3076_v31 = vsel %vm3075_vm9, %v4055_v45, %v3072_v10  ;;  %vm3119_vm11 = vweird.f32 %v5918_v9 }
0x1162   :  { %v4065_v0 = vpop.eup %4064  ;;  %v5924_v59 = vadd.f32 1.0, %v4063_v63  ;;  %v5948_v62 = vsel %vm3078_vm1, %v3080_v46, %v3076_v31  ;;  %vm3120_vm7 = vmor %vm3118_vm15, %vm3119_vm11  ;;  %vm3043_vm11 = vweird.f32 %v5916_v53  ;;  %v3338_v46 = vpop.f32.mrf.mxu3 }
0x1163   :  { %v5928_v47 = vadd.f32 1.0, %v4065_v0  ;;  %v5930_v2 = vpop.eup %4066  ;;  %v3115_v14 = vsub.f32 1.0, %v3114_v28  ;;  %v3020_v0 = vor.u32 1.1754944e-38, %v3019_v57 }
0x1164   :  { %v5934_v27 = vpop.eup %4068  ;;  %4072 = vrcp.f32 %v5924_v59  ;;  %v3009_v29 = vmul.f32 %v5930_v2, %v5914_v34  ;;  %vm3014_vm10 = vweird.f32 %v5930_v2  ;;  %v3062_v3 = vand.u32 2147483647, %v5924_v59 }
0x1165   :  { %v4071_v1 = vpop.eup %4070  ;;  %v3116_v38 = vmul.f32 %v5918_v9, %v3115_v14  ;;  %4074 = vrcp.f32 %v5928_v47  ;;  %v3039_v56 = vmul.f32 %v5934_v27, %v5916_v53  ;;  %vm3044_vm9 = vweird.f32 %v5934_v27  ;;  %vm3015_vm1 = vmor %vm3013_vm0, %vm3014_vm10 }
0x1166   :  { %v5946_v5 = vadd.f32 1.0, %v4071_v1  ;;  %v3010_v43 = vsub.f32 1.0, %v3009_v29  ;;  %vm3045_vm15 = vmor %vm3043_vm11, %vm3044_vm9  ;;  %v3064_v14 = vand.u32 2147483648, %v5924_v59  ;;  %vm3058_vm9 = vweird.f32 %v5924_v59  ;;  %v3580_v29 = vld [vmem:[%s6090_s5] ss:$0 sm:$0xff]  ;;  %s4293_s5 = smov 96  }
0x1167   :  { %v3117_v39 = vadd.f32 %v5918_v9, %v3116_v38  ;;  %v3040_v41 = vsub.f32 1.0, %v3039_v56  ;;  %v3094_v1 = vand.u32 2147483648, %v5928_v47  ;;  %vm3088_vm11 = vweird.f32 %v5928_v47 }
0x1168   :  { %4076 = vrcp.f32 %v5946_v5  ;;  %v3011_v49 = vmul.f32 %v5930_v2, %v3010_v43  ;;  %v3092_v31 = vand.u32 2147483647, %v5928_v47  ;;  %v3339_v19 = vadd.f32 %v3580_v29, %v3338_v46 }
0x1169   :  { %v3121_v55 = vsel %vm3120_vm7, %v5918_v9, %v3117_v39  ;;  %v3041_v4 = vmul.f32 %v5934_v27, %v3040_v41  ;;  %v3047_v9 = vand.u32 2147483647, %v5916_v53  ;;  %vm3018_vm7 = vcmp.eq.f32.partialorder %v3017_v52, 8.507059e+37 }
0x116a   :  { %v5950_v44 = vpop.eup %4072  ;;  %v5969_v45 = vsel %vm3123_vm8, %v3125_v8, %v3121_v55  ;;  %v3012_v33 = vadd.f32 %v5930_v2, %v3011_v49  ;;  %v3095_v43 = vor.u32 1.1754944e-38, %v3094_v1  ;;  %v3109_v49 = vand.u32 2147483648, %v5946_v5 }
0x116b   :  { %v5956_v16 = vpop.eup %4074  ;;  %v3054_v12 = vmul.f32 %v5950_v44, %v5924_v59  ;;  %v3042_v22 = vadd.f32 %v5934_v27, %v3041_v4  ;;  %vm3048_vm8 = vcmp.eq.f32.partialorder %v3047_v9, 8.507059e+37  ;;  %vm3059_vm10 = vweird.f32 %v5950_v44 }
0x116c   :  { %v3084_v13 = vmul.f32 %v5956_v16, %v5928_v47  ;;  %v3016_v20 = vsel %vm3015_vm1, %v5930_v2, %v3012_v33  ;;  %vm3089_vm0 = vweird.f32 %v5956_v16  ;;  %vm3060_vm1 = vmor %vm3058_vm9, %vm3059_vm10  ;;  %v3065_v59 = vor.u32 1.1754944e-38, %v3064_v14 }
0x116d   :  { %v3055_v11 = vsub.f32 1.0, %v3054_v12  ;;  %v3046_v34 = vsel %vm3045_vm15, %v5934_v27, %v3042_v22  ;;  %v5991_v36 = vsel %vm3018_vm7, %v3020_v0, %v3016_v20  ;;  %vm3090_vm15 = vmor %vm3088_vm11, %vm3089_vm0  ;;  %vm3063_vm7 = vcmp.eq.f32.partialorder %v3062_v3, 8.507059e+37 }
0x116e   :  { %v5973_v58 = vpop.eup %4076  ;;  %v3085_v32 = vsub.f32 1.0, %v3084_v13  ;;  %v5996_v10 = vsel %vm3048_vm8, %v3050_v35, %v3046_v34  ;;  %vm3093_vm8 = vcmp.eq.f32.partialorder %v3092_v31, 8.507059e+37  ;;  %vm3103_vm0 = vweird.f32 %v5946_v5 }
0x116f   :  { %v3056_v18 = vmul.f32 %v5950_v44, %v3055_v11  ;;  %v3099_v63 = vmul.f32 %v5973_v58, %v5946_v5  ;;  %vm3104_vm10 = vweird.f32 %v5973_v58  ;;  %v3107_v12 = vand.u32 2147483647, %v5946_v5 }
0x1170   :  { %v3086_v7 = vmul.f32 %v5956_v16, %v3085_v32  ;;  %4078 = vtanh.f32 %v3339_v19  ;;  %vm3105_vm9 = vmor %vm3103_vm0, %vm3104_vm10  ;;  %v3110_v8 = vor.u32 1.1754944e-38, %v3109_v49  ;;  %v3559_v11 = vmul.f32 -1.442695, %v3339_v19 }
0x1171   :  { %v3100_v2 = vsub.f32 1.0, %v3099_v63  ;;  %v3146_v22 = vrot.slane %v5827_v50, 7  ;;  %v3148_v34 = vrot.slane %v5858_v48, 7  ;;  %v3147_v49 = vrot.slane %v5835_v61, 7 }
0x1172   :  { %v3087_v27 = vadd.f32 %v5956_v16, %v3086_v7  ;;  %4080 = vpow2.f32 %v3559_v11  ;;  %v3149_v7 = vrot.slane %v5838_v6, 7  ;;  %v3151_v6 = vrot.slane %v5845_v37, 7 }
0x1173   :  { %v3101_v56 = vmul.f32 %v5973_v58, %v3100_v2  ;;  %v3162_v9 = vmul.f32 %v3146_v22, %v5996_v10  ;;  %v3379_v22 = vld [vmem:[#allocation11 + $0x18] sm:$0xff] }
0x1174   :  { %v3167_v29 = vmul.f32 %v3151_v6, %v5969_v45  ;;  %3397 = vmatpush.msra.mxu1 %v3379_v22 }
0x1176   :  { %v4079_v33 = vpop.eup %4078 }
0x1178   :  { %v4081_v5 = vpop.eup %4080 }
0x11a1   :  { %v3179_v17 = vpop.permute.xlu2 %3178 }
0x11a2   :  { %v3201_v24 = vmul.f32 %v3179_v17, %v5926_v42  ;;  %v3057_v17 = vadd.f32 %v5950_v44, %v3056_v18 }
0x11a4   :  { %3218 = vrot.lane.b32.xlu1 %v3201_v24, %s4292_s16  ;;  %v3061_v38 = vsel %vm3060_vm1, %v5950_v44, %v3057_v17  ;;  %v3102_v44 = vadd.f32 %v5973_v58, %v3101_v56  ;;  %vm3108_vm1 = vcmp.eq.f32.partialorder %v3107_v12, 8.507059e+37 }
0x11a6   :  { %v3106_v55 = vsel %vm3105_vm9, %v5973_v58, %v3102_v44  ;;  %v3145_v58 = vrot.slane %v5852_v54, 7  ;;  %v3164_v54 = vmul.f32 %v3148_v34, %v5948_v62 }
0x11a7   :  { %v6031_v4 = vsel %vm3108_vm1, %v3110_v8, %v3106_v55 }
0x11a8   :  { %v3161_v32 = vmul.f32 %v3145_v58, %v5926_v42 }
0x11a9   :  { %v3185_v25 = vpop.permute.xlu2 %3184 }
0x11aa   :  { %v3204_v51 = vmul.f32 %v3185_v25, %v5948_v62  ;;  %v3091_v25 = vsel %vm3090_vm15, %v5956_v16, %v3087_v27 }
0x11ab   :  { %v6022_v41 = vsel %vm3093_vm8, %v3095_v43, %v3091_v25 }
0x11ac   :  { %3224 = vrot.lane.b32.xlu1 %v3204_v51, %s4292_s16  ;;  %v6017_v51 = vsel %vm3063_vm7, %v3065_v59, %v3061_v38  ;;  %v3165_v50 = vmul.f32 %v3149_v7, %v6022_v41 }
0x11b1   :  { %v3191_v26 = vpop.permute.xlu2 %3190 }
0x11b2   :  { %v3207_v21 = vmul.f32 %v3191_v26, %v5969_v45 }
0x11b4   :  { %3230 = vrot.lane.b32.xlu1 %v3207_v21, %s4292_s16  ;;  %v3344_v21 = vadd.f32 1.0, %v4081_v5 }
0x11b6   :  { %4082 = vrcp.f32 %v3344_v21  ;;  %vm3350_vm11 = vweird.f32 %v3344_v21  ;;  %v3354_v48 = vand.u32 2147483647, %v3344_v21 }
0x11b8   :  { %v3177_v28 = vpop.permute.xlu1 %3176  ;;  %vm3355_vm8 = vcmp.eq.f32.partialorder %v3354_v48, 8.507059e+37 }
0x11b9   :  { %v3200_v53 = vmul.f32 %v3177_v28, %v5991_v36 }
0x11ba   :  { %v3181_v24 = vpop.permute.xlu0 %3180 }
0x11bb   :  { %v3202_v60 = vmul.f32 %v3181_v24, %v5996_v10  ;;  %3216 = vrot.lane.b32.xlu0 %v3200_v53, %s4292_s16  ;;  %v3356_v24 = vand.u32 2147483648, %v3344_v21 }
0x11bc   :  { %v4083_v57 = vpop.eup %4082 }
0x11bd   :  { %3220 = vrot.lane.b32.xlu2 %v3202_v60, %s4292_s16  ;;  %v3346_v52 = vmul.f32 %v4083_v57, %v3344_v21  ;;  %vm3351_vm15 = vweird.f32 %v4083_v57  ;;  %v3357_v3 = vor.u32 1.1754944e-38, %v3356_v24 }
0x11be   :  { %vm3352_vm7 = vmor %vm3350_vm11, %vm3351_vm15 }
0x11bf   :  { %v3347_v0 = vsub.f32 1.0, %v3346_v52  ;;  %v3378_v52 = vld [vmem:[#allocation11 + $0x10] sm:$0xff] }
0x11c0   :  { %v3183_v39 = vpop.permute.xlu1 %3182  ;;  %3398 = vmatpush.msra.mxu1 %v3378_v52 }
0x11c1   :  { %v3203_v47 = vmul.f32 %v3183_v39, %v6017_v51  ;;  %v3348_v35 = vmul.f32 %v4083_v57, %v3347_v0  ;;  %v3144_v39 = vrot.slane %v5825_v23, 7  ;;  %v3150_v23 = vrot.slane %v5864_v30, 7  ;;  %v3377_v30 = vld [vmem:[#allocation11 + $0x8] sm:$0xff] }
0x11c2   :  { %v3187_v40 = vpop.permute.xlu0 %3186  ;;  %3399 = vmatpush.msra.mxu1 %v3377_v30 }
0x11c3   :  { %v3205_v16 = vmul.f32 %v3187_v40, %v6022_v41  ;;  %3222 = vrot.lane.b32.xlu0 %v3203_v47, %s4292_s16  ;;  %v3349_v27 = vadd.f32 %v4083_v57, %v3348_v35  ;;  %v3160_v37 = vmul.f32 %v3144_v39, %v5991_v36 }
0x11c5   :  { %3226 = vrot.lane.b32.xlu2 %v3205_v16, %s4292_s16  ;;  %v3353_v1 = vsel %vm3352_vm7, %v4083_v57, %v3349_v27  ;;  %v3163_v16 = vmul.f32 %v3147_v49, %v6017_v51 }
0x11c6   :  { %v3358_v46 = vsel %vm3355_vm8, %v3357_v3, %v3353_v1 }
0x11c8   :  { %v3189_v13 = vpop.permute.xlu1 %3188 }
0x11c9   :  { %v3206_v26 = vmul.f32 %v3189_v13, %v6031_v4  ;;  %v3166_v13 = vmul.f32 %v3150_v23, %v6031_v4 }
0x11cb   :  { %3228 = vrot.lane.b32.xlu0 %v3206_v26, %s4292_s16 }
0x11cd   :  { %3362 = vrot.lane.b32.xlu2 %v4079_v33, %s4291_s3 }
0x1216   :  { %v3219_v15 = vpop.permute.xlu1 %3218 }
0x1217   :  { %v3221_v20 = vpop.permute.xlu2 %3220  ;;  %v3241_v18 = vadd.f32 %v3219_v15, %v3161_v32  ;;  %v3376_v32 = vld [vmem:[#allocation11] sm:$0xff] }
0x1218   :  { %v3242_v63 = vadd.f32 %v3221_v20, %v3162_v9  ;;  %3400 = vmatpush.msra.mxu1 %v3376_v32 }
0x1219   :  { %4084 = vtanh.f32 %v3241_v18 }
0x121a   :  { %4086 = vtanh.f32 %v3242_v63 }
0x121e   :  { %v3225_v28 = vpop.permute.xlu1 %3224 }
0x121f   :  { %v4085_v53 = vpop.eup %4084  ;;  %v3227_v17 = vpop.permute.xlu2 %3226  ;;  %v3244_v2 = vadd.f32 %v3225_v28, %v3164_v54 }
0x1220   :  { %v4087_v14 = vpop.eup %4086  ;;  %v3245_v60 = vadd.f32 %v3227_v17, %v3165_v50  ;;  %3266 = vrot.lane.b32.xlu1 %v4085_v53, %s4291_s3 }
0x1221   :  { %4088 = vtanh.f32 %v3244_v2  ;;  %3268 = vrot.lane.b32.xlu2 %v4087_v14, %s4291_s3 }
0x1222   :  { %4090 = vtanh.f32 %v3245_v60 }
0x1226   :  { %v3231_v31 = vpop.permute.xlu1 %3230 }
0x1227   :  { %v4089_v38 = vpop.eup %4088  ;;  %v3363_v56 = vpop.permute.xlu2 %3362  ;;  %v3247_v59 = vadd.f32 %v3231_v31, %v3167_v29  ;;  %v3374_v29 = vld [vmem:[#allocation10 + $0x10] sm:$0xff]  ;;  %v3373_v31 = vld [vmem:[#allocation10 + $0x8] sm:$0xff] }
0x1228   :  { %v4091_v25 = vpop.eup %4090  ;;  %v3365_v43 = vmul.f32 %v3363_v56, %v3358_v46  ;;  %3272 = vrot.lane.b32.xlu1 %v4089_v38, %s4291_s3  ;;  %v3372_v38 = vld [vmem:[#allocation10] sm:$0xff] }
0x1229   :  { %4092 = vtanh.f32 %v3247_v59  ;;  %3274 = vrot.lane.b32.xlu2 %v4091_v25, %s4291_s3 }
0x122a   :  { %4094 = vtanh.f32 %v3365_v43 }
0x122d   :  { %v3217_v19 = vpop.permute.xlu0 %3216 }
0x122e   :  { %v3240_v47 = vadd.f32 %v3217_v19, %v3160_v37 }
0x122f   :  { %v4093_v44 = vpop.eup %4092 }
0x1230   :  { %v4095_v40 = vpop.eup %4094  ;;  %4096 = vtanh.f32 %v3240_v47  ;;  %3278 = vrot.lane.b32.xlu1 %v4093_v44, %s4291_s3 }
0x1231   :  { %3368 = vrot.lane.b32.xlu2 %v4095_v40, %s4293_s5 }
0x1235   :  { %v3223_v12 = vpop.permute.xlu0 %3222 }
0x1236   :  { %v4097_v55 = vpop.eup %4096  ;;  %v3243_v8 = vadd.f32 %v3223_v12, %v3163_v16 }
0x1237   :  { %3264 = vrot.lane.b32.xlu0 %v4097_v55, %s4291_s3 }
0x1238   :  { %4098 = vtanh.f32 %v3243_v8 }
0x123d   :  { %v3229_v26 = vpop.permute.xlu0 %3228 }
0x123e   :  { %v4099_v33 = vpop.eup %4098  ;;  %v3246_v11 = vadd.f32 %v3229_v26, %v3166_v13 }
0x123f   :  { %3270 = vrot.lane.b32.xlu0 %v4099_v33, %s4291_s3 }
0x1240   :  { %4100 = vtanh.f32 %v3246_v11 }
0x1246   :  { %v4101_v5 = vpop.eup %4100 }
0x1247   :  { %3276 = vrot.lane.b32.xlu0 %v4101_v5, %s4291_s3 }
0x127b   :  { %v3269_v61 = vpop.permute.xlu2 %3268 }
0x127c   :  { %v3290_v0 = vmul.f32 %v3269_v61, %v5996_v10 }
0x127e   :  { %v3416_v28 = vrot.slane %v3290_v0, 5 }
0x1283   :  { %v3275_v21 = vpop.permute.xlu2 %3274 }
0x128b   :  { %v3369_v57 = vpop.permute.xlu2 %3368 }
0x128c   :  { %v3371_v58 = vmul.f32 %v3369_v57, %v3358_v46  ;;  %v3581_v46 = vld [vmem:[%s6093_s8] ss:$0 sm:$0xff] }
0x128e   :  { %3381 = vrot.lane.b32.xlu1 %v3371_v58, %s4292_s16 }
0x1292   :  { %v3267_v9 = vpop.permute.xlu1 %3266 }
0x1293   :  { %v3289_v18 = vmul.f32 %v3267_v9, %v5926_v42 }
0x1295   :  { %v3414_v7 = vrot.slane %v3289_v18, 6 }
0x129a   :  { %v3273_v34 = vpop.permute.xlu1 %3272 }
0x129b   :  { %v3292_v53 = vmul.f32 %v3273_v34, %v5948_v62 }
0x129d   :  { %v3420_v24 = vrot.slane %v3292_v53, 3 }
0x12a2   :  { %v3279_v10 = vpop.permute.xlu1 %3278 }
0x12a3   :  { %v3295_v6 = vmul.f32 %v3279_v10, %v5969_v45 }
0x12a9   :  { %v3265_v15 = vpop.permute.xlu0 %3264 }
0x12aa   :  { %v3288_v20 = vmul.f32 %v3265_v15, %v5991_v36  ;;  %v3293_v36 = vmul.f32 %v3275_v21, %v6022_v41  ;;  %v3375_v41 = vld [vmem:[#allocation10 + $0x18] sm:$0xff] }
0x12ab   :  { %3443 = vmatpush.msrb.mxu2 %v3375_v41 }
0x12ac   :  { %v3413_v63 = vrot.slane %v3288_v20, 7 }
0x12ad   :  { %3444 = vmatpush.msrb.mxu2 %v3374_v29 }
0x12ae   :  { %v3415_v50 = vsel %vm568_vm2, %v3414_v7, %v3413_v63 }
0x12af   :  { %v3417_v2 = vsel %vm571_vm3, %v3416_v28, %v3415_v50  ;;  %3445 = vmatpush.msrb.mxu2 %v3373_v31 }
0x12b1   :  { %v3271_v35 = vpop.permute.xlu0 %3270  ;;  %3446 = vmatpush.msrb.mxu2 %v3372_v38 }
0x12b2   :  { %v3291_v54 = vmul.f32 %v3271_v35, %v6017_v51  ;;  %v3422_v51 = vrot.slane %v3293_v36, 2 }
0x12b4   :  { %v3418_v17 = vrot.slane %v3291_v54, 4 }
0x12b6   :  { %v3419_v42 = vsel %vm574_vm4, %v3418_v17, %v3417_v2 }
0x12b7   :  { %v3421_v60 = vsel %vm577_vm5, %v3420_v24, %v3419_v42 }
0x12b8   :  { %v3423_v62 = vsel %vm580_vm6, %v3422_v51, %v3421_v60 }
0x12b9   :  { %v3277_v14 = vpop.permute.xlu0 %3276 }
0x12ba   :  { %v3294_v27 = vmul.f32 %v3277_v14, %v6031_v4 }
0x12bc   :  { %v3424_v48 = vrot.slane %v3294_v27, 1 }
0x12be   :  { %v3425_v3 = vsel %vm583_vm12, %v3424_v48, %v3423_v62 }
0x12bf   :  { %v3426_v1 = vsel %vm586_vm13, %v3295_v6, %v3425_v3 }
0x12c0   :  { %3427 = vrot.lane.b32.xlu0 %v3426_v1, %s4292_s16 }
0x1300   :  { %v3382_v4 = vpop.permute.xlu1 %3381 }
0x1301   :  { %3560 = vmatmul.msk.f32.vlgmr.msra.gmra.mxu1 %vm215_vm14, %v3382_v4 }
0x1332   :  { %v3428_v45 = vpop.permute.xlu0 %3427 }
0x1333   :  { %3561 = vmatmul.msk.f32.vlgmr.msrb.gmra.mxu2 %vm215_vm14, %v3428_v45 }
0x137e   :  { %v3402_v56 = vpop.f32.mrf.mxu1 }
0x13b6   :  { %v3448_v59 = vpop.f32.mrf.mxu2 }
0x13b7   :  { %v3449_v25 = vadd.f32 %v3448_v59, %v3402_v56 }
0x13b9   :  { %v3455_v43 = vadd.f32 %v3581_v46, %v3449_v25 }
0x13bb   :  { %3456 = vst [vmem:[#allocation13] sm:$0xff] %v3455_v43 }
0x13bc   :  { %3467 = dma.vmem_to_hbm [thread:$0]  %s3463_s22, 128, %s3465_s23, [#allocation4]  }
0x13bd   :  { %4280 = dma.done.wait [#allocation4], 128  }
0x13be   :  { %4281 = vsyncadd [#allocation4], 4294967168 }
0x13bf   :  { %3472 = vsyncpa [#allocation3], 1 }
0x13c0   :  { %3473 = vsyncpa [#allocation6], 1 }
0x13c1   :  { %3474 = vsyncpa [#allocation9], 1 }
0x13c2   :  { %3475 = vsyncpa [#allocation12], 1 }
0x13c3   :  { %3476 = vsyncpa [#allocation4], 1 }

</bundles_post_ra>
